<compile_context>
chip_gen: v7x
topology: tpu7x:2x2x1
jax: 0.10.0
libtpu: 0.0.40
codegen_flags: <defaults>
</compile_context>

<pallas_src>
import functools

import jax
import jax.numpy as jnp
from jax import lax
from jax.experimental import pallas as pl
from jax.experimental.pallas import tpu as pltpu


def attention_module_kernel(x_ref, w1_ref, w2_ref, wc_ref, bc_ref, o_ref, xp_ref,
                            *, B, H, W, C, Cout, WOFF):
    """Single grid step == whole batch.

    x_ref  : (B, C, H*W)          NCHW-flat features (free reshape of the module's NCHW input)
    w1_ref : (C, C//ratio)        first FC of ChannelAttention (no bias)
    w2_ref : (C//ratio, C)        second FC of ChannelAttention (no bias)
    wc_ref : (9*C, Cout)          3x3 conv weights, tap-major rows (kh*3+kw)*C + cin
    bc_ref : (1, Cout)            conv bias
    o_ref  : (B*Cout, H*W)        NCHW-flat output (row index = b*Cout + cout), lane-dense
    xp_ref : (B, H+2, WOFF+W+8, C) VMEM scratch holding the zero-padded, gated NHWC features
    """
    HW = H * W
    x_chw = x_ref[...]                                   # (B, C, HW)

    # --- ChannelAttention: global average pool -> FC -> ReLU -> FC -> sigmoid
    avg = jnp.sum(x_chw, axis=-1) * (1.0 / float(HW))    # (B, C)  lane reduction, no relayout
    h1 = jnp.maximum(
        jnp.dot(avg, w1_ref[...], preferred_element_type=jnp.float32), 0.0)
    g = jnp.dot(h1, w2_ref[...], preferred_element_type=jnp.float32)     # (B, C)
    gate = 1.0 / (1.0 + jnp.exp(-g))                     # exact sigmoid, (B, C)

    # --- Targeted halo zeroing: only cells the conv windows read.
    #   halo columns WOFF-1 and WOFF+W over all padded rows, and rows 0 / H+1 over interior cols.
    zc = jnp.zeros((B, H + 2, 1, C), jnp.float32)
    xp_ref[:, :, WOFF - 1:WOFF, :] = zc
    xp_ref[:, :, WOFF + W:WOFF + W + 1, :] = zc
    zr = jnp.zeros((B, 1, W, C), jnp.float32)
    xp_ref[:, 0:1, WOFF:WOFF + W, :] = zr
    xp_ref[:, H + 1:H + 2, WOFF:WOFF + W, :] = zr

    # --- Fused CHW->HWC transpose (XLU) + channel gate, stored into the padded-scratch interior.
    # Interior lives at rows [1, 1+H) and cols [WOFF, WOFF+W) (sublane-aligned offset).
    for b in range(B):
        xb = x_chw[b].T                                  # (HW, C)  2-D XLU transpose
        gb = gate[b:b + 1, :]                            # (1, C)
        xp_ref[b, 1:1 + H, WOFF:WOFF + W, :] = (xb * gb).reshape(H, W, C)

    # --- 3x3 conv + bias + ReLU: single K = 9*C im2col matmul.
    # Taps loaded as direct ref-window slices (no full-scratch value load); concat order is
    # tap-major (kh*3+kw) with cin inside, matching the pre-flattened (9*C, Cout) weights.
    pieces = []
    for kh in range(3):
        for kw in range(3):
            c0 = WOFF - 1 + kw
            v = xp_ref[:, kh:kh + H, c0:c0 + W, :]       # (B, H, W, C)
            pieces.append(v.reshape(B * HW, C))
    p = jnp.concatenate(pieces, axis=-1)                 # (B*H*W, 9*C)
    acc = jnp.dot(p, wc_ref[...], preferred_element_type=jnp.float32)    # (B*H*W, Cout)
    out = jnp.maximum(acc + bc_ref[...], 0.0)            # (B*H*W, Cout)

    # --- Emit NCHW-flat: per-batch (HW, Cout) -> (Cout, HW); lane-dense (HW = 2*128) stores.
    for b in range(B):
        ob = out[b * HW:(b + 1) * HW, :]                 # (HW, Cout)
        o_ref[b * Cout:(b + 1) * Cout, :] = ob.T.astype(o_ref.dtype)


def attention_module(x_nchw, w1, w2, wconv, bconv):
    """x_nchw: (B, C, H, W) float32. Returns (B, Cout, H, W)."""
    B, C, H, W = x_nchw.shape
    Cr = w1.shape[1]
    Cout = wconv.shape[-1]
    HW = H * W
    WOFF = 8                              # sublane-aligned interior offset; halo cols at 7 / 8+W
    WPAD = WOFF + W + 8

    # Free reshapes only at the boundary (no transpose ops, no pad op).
    x = x_nchw.reshape(B, C, HW).astype(jnp.float32)
    wc_flat = wconv.reshape(9 * C, Cout).astype(jnp.float32)   # tap-major (t*C + cin, cout)

    kern = functools.partial(attention_module_kernel,
                             B=B, H=H, W=W, C=C, Cout=Cout, WOFF=WOFF)

    out_flat = pl.pallas_call(
        kern,
        out_shape=jax.ShapeDtypeStruct((B * Cout, HW), jnp.float32),
        grid_spec=pltpu.PrefetchScalarGridSpec(
            num_scalar_prefetch=0,
            grid=(1,),
            in_specs=[
                pl.BlockSpec((B, C, HW), lambda i: (0, 0, 0)),
                pl.BlockSpec((C, Cr), lambda i: (0, 0)),
                pl.BlockSpec((Cr, C), lambda i: (0, 0)),
                pl.BlockSpec((9 * C, Cout), lambda i: (0, 0)),
                pl.BlockSpec((1, Cout), lambda i: (0, 0)),
            ],
            out_specs=pl.BlockSpec((B * Cout, HW), lambda i: (0, 0)),
            scratch_shapes=[pltpu.VMEM((B, H + 2, WPAD, C), jnp.float32)],
        ),
        compiler_params=pltpu.CompilerParams(
            dimension_semantics=("arbitrary",)),
    )(x, w1, w2, wc_flat, bconv)

    # (B*Cout, H*W) -> NCHW is a pure (free) reshape.
    return out_flat.reshape(B, Cout, H, W)


def reference(x_nchw, w1, w2, wconv, bconv):
    """Pure-JAX reference matching the PyTorch forward semantics."""
    B, C, H, W = x_nchw.shape
    Cout = wconv.shape[-1]
    avg = jnp.mean(x_nchw, axis=(2, 3))                  # (B, C)
    h = jnp.maximum(avg @ w1, 0.0)
    gate = jax.nn.sigmoid(h @ w2)                        # (B, C)
    xg = x_nchw * gate[:, :, None, None]
    w_oihw = jnp.transpose(wconv.reshape(3, 3, C, Cout), (3, 2, 0, 1))
    y = lax.conv_general_dilated(
        xg, w_oihw, window_strides=(1, 1), padding=((1, 1), (1, 1)),
        dimension_numbers=("NCHW", "OIHW", "NCHW"))
    y = y + bconv.reshape(1, Cout, 1, 1)
    return jnp.maximum(y, 0.0)


if __name__ == "__main__":
    B, C, H, W = 2, 32, 16, 16          # high_feature_channel = 32
    ratio = 16
    Cr = C // ratio                     # hidden width of ChannelAttention MLP
    Cout = C                            # output_channel=None -> same as input

    key = jax.random.PRNGKey(0)
    k0, k1, k2, k3, k4 = jax.random.split(key, 5)

    x = jax.random.normal(k0, (B, C, H, W), jnp.float32)
    w1 = jax.random.normal(k1, (C, Cr), jnp.float32) * 0.1    # Linear(C, C//16)
    w2 = jax.random.normal(k2, (Cr, C), jnp.float32) * 0.1    # Linear(C//16, C)
    wconv = jax.random.normal(k3, (9, C, Cout), jnp.float32) * 0.05
    bconv = jax.random.normal(k4, (1, Cout), jnp.float32) * 0.1

    out = jax.block_until_ready(attention_module(x, w1, w2, wconv, bconv))
    ref = jax.block_until_ready(reference(x, w1, w2, wconv, bconv))

    assert out.shape == (B, Cout, H, W)
    assert jnp.allclose(out, ref, atol=1e-4, rtol=1e-4), (
        float(jnp.max(jnp.abs(out - ref))))

    print("KERNEL_OK")
</pallas_src>

<mosaic_0001>
module attributes {stable_mosaic.version = 11 : i64} {
  func.func @attention_module_kernel(%arg0: i32, %arg1: memref<2x32x256xf32, #tpu.memory_space<vmem>>, %arg2: memref<32x2xf32, #tpu.memory_space<vmem>>, %arg3: memref<2x32xf32, #tpu.memory_space<vmem>>, %arg4: memref<288x32xf32, #tpu.memory_space<vmem>>, %arg5: memref<1x32xf32, #tpu.memory_space<vmem>>, %arg6: memref<64x256xf32, #tpu.memory_space<vmem>>, %arg7: memref<2x18x32x32xf32, #tpu.memory_space<vmem>>) attributes {dimension_semantics = [#tpu.dimension_semantics<arbitrary>], iteration_bounds = array<i64: 1>, scalar_prefetch = 0 : i64, scratch_operands = 1 : i64, tpu.core_type = #tpu.core_type<tc>, window_params = [{pipeline_mode = #tpu.pipeline_mode<synchronous>, transform_indices = @transform_0, window_bounds = array<i64: 2, 32, 256>}, {pipeline_mode = #tpu.pipeline_mode<synchronous>, transform_indices = @transform_1, window_bounds = array<i64: 32, 2>}, {pipeline_mode = #tpu.pipeline_mode<synchronous>, transform_indices = @transform_2, window_bounds = array<i64: 2, 32>}, {pipeline_mode = #tpu.pipeline_mode<synchronous>, transform_indices = @transform_3, window_bounds = array<i64: 288, 32>}, {pipeline_mode = #tpu.pipeline_mode<synchronous>, transform_indices = @transform_4, window_bounds = array<i64: 1, 32>}, {pipeline_mode = #tpu.pipeline_mode<synchronous>, transform_indices = @transform_5, window_bounds = array<i64: 64, 256>}]} {
    %c0 = arith.constant 0 : index
    %c0_0 = arith.constant 0 : index
    %c0_1 = arith.constant 0 : index
    %0 = vector.load %arg1[%c0, %c0_0, %c0_1] : memref<2x32x256xf32, #tpu.memory_space<vmem>>, vector<2x32x256xf32>
    %cst = arith.constant dense<0.000000e+00> : vector<2x32xf32>
    %1 = vector.multi_reduction <add>, %0, %cst [2] : vector<2x32x256xf32> to vector<2x32xf32>
    %cst_2 = arith.constant 3.906250e-03 : f32
    %2 = vector.broadcast %cst_2 : f32 to vector<2x32xf32>
    %3 = arith.mulf %1, %2 : vector<2x32xf32>
    %c0_3 = arith.constant 0 : index
    %c0_4 = arith.constant 0 : index
    %4 = vector.load %arg2[%c0_3, %c0_4] : memref<32x2xf32, #tpu.memory_space<vmem>>, vector<32x2xf32>
    %cst_5 = arith.constant dense<0.000000e+00> : vector<2x2xf32>
    %5 = tpu.matmul %3, %4, %cst_5 {dimension_numbers = #tpu.dot_dimension_numbers<[1], [0], [0], [1], [0, 0, 1, 1], [], []>} : vector<2x32xf32>, vector<32x2xf32>, vector<2x2xf32> -> vector<2x2xf32>
    %cst_6 = arith.constant 0.000000e+00 : f32
    %6 = vector.broadcast %cst_6 : f32 to vector<2x2xf32>
    %7 = arith.maximumf %5, %6 : vector<2x2xf32>
    %c0_7 = arith.constant 0 : index
    %c0_8 = arith.constant 0 : index
    %8 = vector.load %arg3[%c0_7, %c0_8] : memref<2x32xf32, #tpu.memory_space<vmem>>, vector<2x32xf32>
    %cst_9 = arith.constant dense<0.000000e+00> : vector<2x32xf32>
    %9 = tpu.matmul %7, %8, %cst_9 {dimension_numbers = #tpu.dot_dimension_numbers<[1], [0], [0], [1], [0, 0, 1, 1], [], []>} : vector<2x2xf32>, vector<2x32xf32>, vector<2x32xf32> -> vector<2x32xf32>
    %cst_10 = arith.constant 0.000000e+00 : f32
    %10 = vector.broadcast %cst_10 : f32 to vector<2x32xf32>
    %11 = arith.subf %10, %9 : vector<2x32xf32>
    %12 = math.exp %11 : vector<2x32xf32>
    %cst_11 = arith.constant 1.000000e+00 : f32
    %13 = vector.broadcast %cst_11 : f32 to vector<2x32xf32>
    %14 = arith.addf %13, %12 : vector<2x32xf32>
    %cst_12 = arith.constant 1.000000e+00 : f32
    %15 = vector.broadcast %cst_12 : f32 to vector<2x32xf32>
    %16 = arith.divf %15, %14 : vector<2x32xf32>
    %cst_13 = arith.constant 0.000000e+00 : f32
    %17 = vector.broadcast %cst_13 : f32 to vector<2x18x1x32xf32>
    %c0_14 = arith.constant 0 : index
    %c0_15 = arith.constant 0 : index
    %c7 = arith.constant 7 : index
    %c0_16 = arith.constant 0 : index
    %18 = vector.load %arg7[%c0_14, %c0_15, %c7, %c0_16] : memref<2x18x32x32xf32, #tpu.memory_space<vmem>>, vector<2x18x1x32xf32>
    tpu.vector_store %arg7[%c0_14, %c0_15, %c7, %c0_16], %17 {strides = array<i32>} : memref<2x18x32x32xf32, #tpu.memory_space<vmem>>, vector<2x18x1x32xf32>,
    %c0_17 = arith.constant 0 : index
    %c0_18 = arith.constant 0 : index
    %c24 = arith.constant 24 : index
    %c0_19 = arith.constant 0 : index
    %19 = vector.load %arg7[%c0_17, %c0_18, %c24, %c0_19] : memref<2x18x32x32xf32, #tpu.memory_space<vmem>>, vector<2x18x1x32xf32>
    tpu.vector_store %arg7[%c0_17, %c0_18, %c24, %c0_19], %17 {strides = array<i32>} : memref<2x18x32x32xf32, #tpu.memory_space<vmem>>, vector<2x18x1x32xf32>,
    %cst_20 = arith.constant 0.000000e+00 : f32
    %20 = vector.broadcast %cst_20 : f32 to vector<2x1x16x32xf32>
    %c0_21 = arith.constant 0 : index
    %c0_22 = arith.constant 0 : index
    %c8 = arith.constant 8 : index
    %c0_23 = arith.constant 0 : index
    %21 = vector.load %arg7[%c0_21, %c0_22, %c8, %c0_23] : memref<2x18x32x32xf32, #tpu.memory_space<vmem>>, vector<2x1x16x32xf32>
    tpu.vector_store %arg7[%c0_21, %c0_22, %c8, %c0_23], %20 {strides = array<i32>} : memref<2x18x32x32xf32, #tpu.memory_space<vmem>>, vector<2x1x16x32xf32>,
    %c0_24 = arith.constant 0 : index
    %c17 = arith.constant 17 : index
    %c8_25 = arith.constant 8 : index
    %c0_26 = arith.constant 0 : index
    %22 = vector.load %arg7[%c0_24, %c17, %c8_25, %c0_26] : memref<2x18x32x32xf32, #tpu.memory_space<vmem>>, vector<2x1x16x32xf32>
    tpu.vector_store %arg7[%c0_24, %c17, %c8_25, %c0_26], %20 {strides = array<i32>} : memref<2x18x32x32xf32, #tpu.memory_space<vmem>>, vector<2x1x16x32xf32>,
    %23 = vector.extract_strided_slice %0 {offsets = [0, 0, 0], sizes = [1, 32, 256], strides = [1, 1, 1]} : vector<2x32x256xf32> to vector<1x32x256xf32>
    %24 = vector.shape_cast %23 : vector<1x32x256xf32> to vector<32x256xf32>
    %25 = tpu.transpose %24, [1, 0] : vector<32x256xf32> -> vector<256x32xf32>
    %26 = vector.extract_strided_slice %16 {offsets = [0, 0], sizes = [1, 32], strides = [1, 1]} : vector<2x32xf32> to vector<1x32xf32>
    %27 = vector.broadcast %26 : vector<1x32xf32> to vector<256x32xf32>
    %28 = arith.mulf %25, %27 : vector<256x32xf32>
    %29 = vector.shape_cast %28 : vector<256x32xf32> to vector<16x16x32xf32>
    %c0_27 = arith.constant 0 : index
    %c1 = arith.constant 1 : index
    %c8_28 = arith.constant 8 : index
    %c0_29 = arith.constant 0 : index
    %30 = vector.load %arg7[%c0_27, %c1, %c8_28, %c0_29] : memref<2x18x32x32xf32, #tpu.memory_space<vmem>>, vector<1x16x16x32xf32>
    %31 = vector.shape_cast %30 : vector<1x16x16x32xf32> to vector<16x16x32xf32>
    %32 = vector.shape_cast %29 : vector<16x16x32xf32> to vector<1x16x16x32xf32>
    tpu.vector_store %arg7[%c0_27, %c1, %c8_28, %c0_29], %32 {strides = array<i32>} : memref<2x18x32x32xf32, #tpu.memory_space<vmem>>, vector<1x16x16x32xf32>,
    %33 = vector.extract_strided_slice %0 {offsets = [1, 0, 0], sizes = [1, 32, 256], strides = [1, 1, 1]} : vector<2x32x256xf32> to vector<1x32x256xf32>
    %34 = vector.shape_cast %33 : vector<1x32x256xf32> to vector<32x256xf32>
    %35 = tpu.transpose %34, [1, 0] : vector<32x256xf32> -> vector<256x32xf32>
    %36 = vector.extract_strided_slice %16 {offsets = [1, 0], sizes = [1, 32], strides = [1, 1]} : vector<2x32xf32> to vector<1x32xf32>
    %37 = vector.broadcast %36 : vector<1x32xf32> to vector<256x32xf32>
    %38 = arith.mulf %35, %37 : vector<256x32xf32>
    %39 = vector.shape_cast %38 : vector<256x32xf32> to vector<16x16x32xf32>
    %c1_30 = arith.constant 1 : index
    %c1_31 = arith.constant 1 : index
    %c8_32 = arith.constant 8 : index
    %c0_33 = arith.constant 0 : index
    %40 = vector.load %arg7[%c1_30, %c1_31, %c8_32, %c0_33] : memref<2x18x32x32xf32, #tpu.memory_space<vmem>>, vector<1x16x16x32xf32>
    %41 = vector.shape_cast %40 : vector<1x16x16x32xf32> to vector<16x16x32xf32>
    %42 = vector.shape_cast %39 : vector<16x16x32xf32> to vector<1x16x16x32xf32>
    tpu.vector_store %arg7[%c1_30, %c1_31, %c8_32, %c0_33], %42 {strides = array<i32>} : memref<2x18x32x32xf32, #tpu.memory_space<vmem>>, vector<1x16x16x32xf32>,
    %c0_34 = arith.constant 0 : index
    %c0_35 = arith.constant 0 : index
    %c7_36 = arith.constant 7 : index
    %c0_37 = arith.constant 0 : index
    %43 = vector.load %arg7[%c0_34, %c0_35, %c7_36, %c0_37] : memref<2x18x32x32xf32, #tpu.memory_space<vmem>>, vector<2x16x16x32xf32>
    %44 = vector.shape_cast %43 : vector<2x16x16x32xf32> to vector<512x32xf32>
    %c0_38 = arith.constant 0 : index
    %c0_39 = arith.constant 0 : index
    %c8_40 = arith.constant 8 : index
    %c0_41 = arith.constant 0 : index
    %45 = vector.load %arg7[%c0_38, %c0_39, %c8_40, %c0_41] : memref<2x18x32x32xf32, #tpu.memory_space<vmem>>, vector<2x16x16x32xf32>
    %46 = vector.shape_cast %45 : vector<2x16x16x32xf32> to vector<512x32xf32>
    %c0_42 = arith.constant 0 : index
    %c0_43 = arith.constant 0 : index
    %c9 = arith.constant 9 : index
    %c0_44 = arith.constant 0 : index
    %47 = vector.load %arg7[%c0_42, %c0_43, %c9, %c0_44] : memref<2x18x32x32xf32, #tpu.memory_space<vmem>>, vector<2x16x16x32xf32>
    %48 = vector.shape_cast %47 : vector<2x16x16x32xf32> to vector<512x32xf32>
    %c0_45 = arith.constant 0 : index
    %c1_46 = arith.constant 1 : index
    %c7_47 = arith.constant 7 : index
    %c0_48 = arith.constant 0 : index
    %49 = vector.load %arg7[%c0_45, %c1_46, %c7_47, %c0_48] : memref<2x18x32x32xf32, #tpu.memory_space<vmem>>, vector<2x16x16x32xf32>
    %50 = vector.shape_cast %49 : vector<2x16x16x32xf32> to vector<512x32xf32>
    %c0_49 = arith.constant 0 : index
    %c1_50 = arith.constant 1 : index
    %c8_51 = arith.constant 8 : index
    %c0_52 = arith.constant 0 : index
    %51 = vector.load %arg7[%c0_49, %c1_50, %c8_51, %c0_52] : memref<2x18x32x32xf32, #tpu.memory_space<vmem>>, vector<2x16x16x32xf32>
    %52 = vector.shape_cast %51 : vector<2x16x16x32xf32> to vector<512x32xf32>
    %c0_53 = arith.constant 0 : index
    %c1_54 = arith.constant 1 : index
    %c9_55 = arith.constant 9 : index
    %c0_56 = arith.constant 0 : index
    %53 = vector.load %arg7[%c0_53, %c1_54, %c9_55, %c0_56] : memref<2x18x32x32xf32, #tpu.memory_space<vmem>>, vector<2x16x16x32xf32>
    %54 = vector.shape_cast %53 : vector<2x16x16x32xf32> to vector<512x32xf32>
    %c0_57 = arith.constant 0 : index
    %c2 = arith.constant 2 : index
    %c7_58 = arith.constant 7 : index
    %c0_59 = arith.constant 0 : index
    %55 = vector.load %arg7[%c0_57, %c2, %c7_58, %c0_59] : memref<2x18x32x32xf32, #tpu.memory_space<vmem>>, vector<2x16x16x32xf32>
    %56 = vector.shape_cast %55 : vector<2x16x16x32xf32> to vector<512x32xf32>
    %c0_60 = arith.constant 0 : index
    %c2_61 = arith.constant 2 : index
    %c8_62 = arith.constant 8 : index
    %c0_63 = arith.constant 0 : index
    %57 = vector.load %arg7[%c0_60, %c2_61, %c8_62, %c0_63] : memref<2x18x32x32xf32, #tpu.memory_space<vmem>>, vector<2x16x16x32xf32>
    %58 = vector.shape_cast %57 : vector<2x16x16x32xf32> to vector<512x32xf32>
    %c0_64 = arith.constant 0 : index
    %c2_65 = arith.constant 2 : index
    %c9_66 = arith.constant 9 : index
    %c0_67 = arith.constant 0 : index
    %59 = vector.load %arg7[%c0_64, %c2_65, %c9_66, %c0_67] : memref<2x18x32x32xf32, #tpu.memory_space<vmem>>, vector<2x16x16x32xf32>
    %60 = vector.shape_cast %59 : vector<2x16x16x32xf32> to vector<512x32xf32>
    %61 = tpu.concatenate %44, %46, %48, %50, %52, %54, %56, %58, %60 in 1 : vector<512x32xf32>, vector<512x32xf32>, vector<512x32xf32>, vector<512x32xf32>, vector<512x32xf32>, vector<512x32xf32>, vector<512x32xf32>, vector<512x32xf32>, vector<512x32xf32> -> vector<512x288xf32>
    %c0_68 = arith.constant 0 : index
    %c0_69 = arith.constant 0 : index
    %62 = vector.load %arg4[%c0_68, %c0_69] : memref<288x32xf32, #tpu.memory_space<vmem>>, vector<288x32xf32>
    %cst_70 = arith.constant dense<0.000000e+00> : vector<512x32xf32>
    %63 = tpu.matmul %61, %62, %cst_70 {dimension_numbers = #tpu.dot_dimension_numbers<[1], [0], [0], [1], [0, 0, 1, 1], [], []>} : vector<512x288xf32>, vector<288x32xf32>, vector<512x32xf32> -> vector<512x32xf32>
    %c0_71 = arith.constant 0 : index
    %c0_72 = arith.constant 0 : index
    %64 = vector.load %arg5[%c0_71, %c0_72] : memref<1x32xf32, #tpu.memory_space<vmem>>, vector<1x32xf32>
    %65 = vector.broadcast %64 : vector<1x32xf32> to vector<512x32xf32>
    %66 = arith.addf %63, %65 : vector<512x32xf32>
    %cst_73 = arith.constant 0.000000e+00 : f32
    %67 = vector.broadcast %cst_73 : f32 to vector<512x32xf32>
    %68 = arith.maximumf %66, %67 : vector<512x32xf32>
    %69 = vector.extract_strided_slice %68 {offsets = [0, 0], sizes = [256, 32], strides = [1, 1]} : vector<512x32xf32> to vector<256x32xf32>
    %70 = tpu.transpose %69, [1, 0] : vector<256x32xf32> -> vector<32x256xf32>
    %c0_74 = arith.constant 0 : index
    %c0_75 = arith.constant 0 : index
    %71 = vector.load %arg6[%c0_74, %c0_75] : memref<64x256xf32, #tpu.memory_space<vmem>>, vector<32x256xf32>
    tpu.vector_store %arg6[%c0_74, %c0_75], %70 {strides = array<i32>} : memref<64x256xf32, #tpu.memory_space<vmem>>, vector<32x256xf32>,
    %72 = vector.extract_strided_slice %68 {offsets = [256, 0], sizes = [256, 32], strides = [1, 1]} : vector<512x32xf32> to vector<256x32xf32>
    %73 = tpu.transpose %72, [1, 0] : vector<256x32xf32> -> vector<32x256xf32>
    %c32 = arith.constant 32 : index
    %c0_76 = arith.constant 0 : index
    %74 = vector.load %arg6[%c32, %c0_76] : memref<64x256xf32, #tpu.memory_space<vmem>>, vector<32x256xf32>
    tpu.vector_store %arg6[%c32, %c0_76], %73 {strides = array<i32>} : memref<64x256xf32, #tpu.memory_space<vmem>>, vector<32x256xf32>,
    return
  }
  func.func @transform_0(%arg0: i32) -> (i32, i32, i32) {
    %c0_i32 = arith.constant 0 : i32
    %c0_i32_0 = arith.constant 0 : i32
    %c0_i32_1 = arith.constant 0 : i32
    %c0_i32_2 = arith.constant 0 : i32
    return %c0_i32, %c0_i32_0, %c0_i32_1 : i32, i32, i32
  }
  func.func @transform_1(%arg0: i32) -> (i32, i32) {
    %c0_i32 = arith.constant 0 : i32
    %c0_i32_0 = arith.constant 0 : i32
    %c0_i32_1 = arith.constant 0 : i32
    return %c0_i32, %c0_i32_0 : i32, i32
  }
  func.func @transform_2(%arg0: i32) -> (i32, i32) {
    %c0_i32 = arith.constant 0 : i32
    %c0_i32_0 = arith.constant 0 : i32
    %c0_i32_1 = arith.constant 0 : i32
    return %c0_i32, %c0_i32_0 : i32, i32
  }
  func.func @transform_3(%arg0: i32) -> (i32, i32) {
    %c0_i32 = arith.constant 0 : i32
    %c0_i32_0 = arith.constant 0 : i32
    %c0_i32_1 = arith.constant 0 : i32
    return %c0_i32, %c0_i32_0 : i32, i32
  }
  func.func @transform_4(%arg0: i32) -> (i32, i32) {
    %c0_i32 = arith.constant 0 : i32
    %c0_i32_0 = arith.constant 0 : i32
    %c0_i32_1 = arith.constant 0 : i32
    return %c0_i32, %c0_i32_0 : i32, i32
  }
  func.func @transform_5(%arg0: i32) -> (i32, i32) {
    %c0_i32 = arith.constant 0 : i32
    %c0_i32_0 = arith.constant 0 : i32
    %c0_i32_1 = arith.constant 0 : i32
    return %c0_i32, %c0_i32_0 : i32, i32
  }
}

</mosaic_0001>

<bundles_post_ra>
// kernel: tpu_custom_call.1
= control target key start
LH: loop header
LB: loop body
LE: loop exit
PB: predicated region body
PF: predicated region fallthrough
CT: control target
= control target key end

     0   :  { %s8617_s0 = inlined_call_operand.vmem [shape: f32[2,32,256], index: 0, kind: input, shape index: {}]   ;;  %s8618_s1 = inlined_call_operand.vmem [shape: f32[32,2], index: 1, kind: input, shape index: {}]   ;;  %s8619_s2 = inlined_call_operand.vmem [shape: f32[2,32], index: 2, kind: input, shape index: {}]   ;;  %s8620_s3 = inlined_call_operand.vmem [shape: f32[288,32], index: 3, kind: input, shape index: {}]   ;;  %s8621_s4 = inlined_call_operand.vmem [shape: f32[1,32], index: 4, kind: input, shape index: {}]   ;;  %s8622_s5 = inlined_call_operand.hbm [shape: f32[64,256], index: 5, kind: output, shape index: {}]  }
   0x1   :  { %v25_v0 = vld [vmem:[%s8617_s0 + $0x20] sm:$0xff]  ;;  %v5748_v1 = vld [vmem:[%s8617_s0 + $0x28] sm:$0xff]  ;;  %v27_v5 = vld [vmem:[%s8617_s0 + $0x30] sm:$0xff] }
   0x2   :  { %v21_v2 = vld [vmem:[%s8617_s0] sm:$0xff]  ;;  %v43_v3 = vadd.f32 %v5748_v1, %v25_v0  ;;  %v22_v4 = vld [vmem:[%s8617_s0 + $0x8] sm:$0xff]  ;;  %v28_v6 = vld [vmem:[%s8617_s0 + $0x38] sm:$0xff] }
   0x3   :  { %v37_v7 = vadd.f32 %v22_v4, %v21_v2  ;;  %v23_v8 = vld [vmem:[%s8617_s0 + $0x10] sm:$0xff]  ;;  %v24_v9 = vld [vmem:[%s8617_s0 + $0x18] sm:$0xff]  ;;  %v46_v10 = vadd.f32 %v28_v6, %v27_v5  ;;  %v29_v14 = vld [vmem:[%s8617_s0 + $0x40] sm:$0xff] }
   0x4   :  { %44 = vadd.xlane.f32.xlu1 %v43_v3  ;;  %v40_v11 = vadd.f32 %v24_v9, %v23_v8  ;;  %v31_v12 = vld [vmem:[%s8617_s0 + $0x50] sm:$0xff]  ;;  %v32_v13 = vld [vmem:[%s8617_s0 + $0x58] sm:$0xff]  ;;  %v30_v15 = vld [vmem:[%s8617_s0 + $0x48] sm:$0xff] }
   0x5   :  { %38 = vadd.xlane.f32.xlu0 %v37_v7 }
   0x6   :  { %10 = vsyncpa [#allocation4], 0  ;;  %v52_v16 = vadd.f32 %v32_v13, %v31_v12  ;;  %v49_v17 = vadd.f32 %v30_v15, %v29_v14  ;;  %v35_v18 = vld [vmem:[%s8617_s0 + $0x70] sm:$0xff]  ;;  %v36_v19 = vld [vmem:[%s8617_s0 + $0x78] sm:$0xff]  ;;  %v8623_v27 = vmov 0.0|0.0   ;;  %vm5704_vm0 = vmmov 0  }
   0x7   :  { %v33_v20 = vld [vmem:[%s8617_s0 + $0x60] sm:$0xff]  ;;  %v34_v21 = vld [vmem:[%s8617_s0 + $0x68] sm:$0xff]  ;;  %v58_v22 = vadd.f32 %v36_v19, %v35_v18  ;;  %4627 = vmatprep.subr.bf16.mxu0 %v8623_v27  ;;  %v71_v28 = vld [vmem:[%s8618_s1 + $0x10] sm:$0xff]  ;;  %v5705_v31 = vmov 0.0   ;;  %vm129_vm1 = vcmask 261120   ;;  %v81_v32 = vlaneseq  ;;  %s5707_s8 = smov 64  }
   0x8   :  { %47 = vadd.xlane.f32.xlu1 %v46_v10  ;;  %v55_v23 = vadd.f32 %v34_v21, %v33_v20  ;;  %v69_v24 = vld [vmem:[%s8618_s1] sm:$0xff]  ;;  %v70_v25 = vld [vmem:[%s8618_s1 + $0x8] sm:$0xff]  ;;  %v72_v29 = vld [vmem:[%s8618_s1 + $0x18] sm:$0xff]  ;;  %4515 = vmatprep.mubr.msk.f32.mxu0 %vm5704_vm0, %v5705_v31  ;;  %361 = vst.msk [vmem:[#allocation2 + $0x8] sm:$0xff] %vm129_vm1, %v5705_v31  ;;  %vm92_vm2 = vcmask 130112   ;;  %vm99_vm3 = vcmask 195712  }
   0x9   :  { %41 = vadd.xlane.f32.xlu0 %v40_v11  ;;  %v4628_v26 = vpack.c.bf16 %v70_v25, %v69_v24  ;;  %v4631_v30 = vpack.c.bf16 %v72_v29, %v71_v28  ;;  %4518 = vmatprep.subr.mxu1 %v5705_v31  ;;  %362 = vst.msk [vmem:[#allocation2 + $0x10] sm:$0xff] %vm129_vm1, %v5705_v31  ;;  %363 = vst.msk [vmem:[#allocation2 + $0x248] sm:$0xff] %vm129_vm1, %v5705_v31  ;;  %v82_v33 = vand.u32 127, %v81_v32  ;;  %vm106_vm4 = vcmask 261312   ;;  %s5708_s9 = smov 96  }
   0xa   :  { %4520 = vmatprep.mubr.msk.f32.mxu1 %vm5704_vm0, %v5705_v31  ;;  %364 = vst.msk [vmem:[#allocation2 + $0x250] sm:$0xff] %vm129_vm1, %v5705_v31  ;;  %366 = vst.msk [vmem:[#allocation2 + $0x228] sm:$0xff] %vm129_vm1, %v5705_v31  ;;  %v5828_v37 = vshrl.u32 %v81_v32, 7  ;;  %vm127_vm5 = vcmask 1041409   ;;  %vm208_vm6 = vcmask 1041408   ;;  %vm204_vm7 = vcmask 15360  }
   0xb   :  { %4629 = vmatpush3.bf16.msra.mxu0 %v4628_v26  ;;  %367 = vst.msk [vmem:[#allocation2 + $0x230] sm:$0xff] %vm129_vm1, %v5705_v31  ;;  %368 = vst.msk [vmem:[#allocation2 + $0x468] sm:$0xff] %vm129_vm1, %v5705_v31  ;;  %v87_v36 = vadd.s32 4294967288, %v82_v33  ;;  %v94_v41 = vadd.s32 4294967280, %v82_v33  ;;  %v101_v45 = vadd.s32 4294967272, %v82_v33  ;;  %vm288_vm8 = vcmask 253952  }
   0xc   :  { %53 = vadd.xlane.f32.xlu1 %v52_v16  ;;  %4630 = vmatprep.subr.bf16.mxu0 %v8623_v27  ;;  %369 = vst.msk [vmem:[#allocation2 + $0x470] sm:$0xff] %vm129_vm1, %v5705_v31  ;;  %v85_v43 = vsub.s32 %v82_v33, %v5828_v37  ;;  %vm2813_vm9 = vcmask 523264   ;;  %vm2878_vm10 = vcmask 785408  }
   0xd   :  { %50 = vadd.xlane.f32.xlu0 %v49_v17  ;;  %v90_v39 = vsub.s32 %v87_v36, %v5828_v37  ;;  %v97_v50 = vsub.s32 %v94_v41, %v5828_v37  ;;  %v104_v54 = vsub.s32 %v101_v45, %v5828_v37  ;;  %325 = vst.msk [vmem:[#allocation2 + $0x18] sm:$0x1] %vm288_vm8, %v5705_v31  ;;  %289 = vst.msk [vmem:[#allocation2 + $0x7] sm:$0x1] %vm288_vm8, %v5705_v31 }
   0xe   :  { %290 = vst.msk [vmem:[#allocation2 + $0x27] sm:$0x1] %vm288_vm8, %v5705_v31  ;;  %291 = vst.msk [vmem:[#allocation2 + $0x47] sm:$0x1] %vm288_vm8, %v5705_v31 }
   0xf   :  { %4632 = vmatpush3.bf16.msra.mxu0 %v4631_v30  ;;  %292 = vst.msk [vmem:[#allocation2 + $0x67] sm:$0x1] %vm288_vm8, %v5705_v31  ;;  %293 = vst.msk [vmem:[#allocation2 + $0x87] sm:$0x1] %vm288_vm8, %v5705_v31 }
  0x10   :  { %59 = vadd.xlane.f32.xlu1 %v58_v22  ;;  %4633 = vmatprep.subr.bf16.mxu0 %v8623_v27  ;;  %v5883_v36 = vld [vmem:[#allocation2 + $0x10] sm:$0xff]  ;;  %294 = vst.msk [vmem:[#allocation2 + $0xa7] sm:$0x1] %vm288_vm8, %v5705_v31  ;;  %295 = vst.msk [vmem:[#allocation2 + $0xc7] sm:$0x1] %vm288_vm8, %v5705_v31 }
  0x11   :  { %56 = vadd.xlane.f32.xlu0 %v55_v23  ;;  %296 = vst.msk [vmem:[#allocation2 + $0xe7] sm:$0x1] %vm288_vm8, %v5705_v31  ;;  %297 = vst.msk [vmem:[#allocation2 + $0x107] sm:$0x1] %vm288_vm8, %v5705_v31 }
  0x12   :  { %298 = vst.msk [vmem:[#allocation2 + $0x127] sm:$0x1] %vm288_vm8, %v5705_v31  ;;  %299 = vst.msk [vmem:[#allocation2 + $0x147] sm:$0x1] %vm288_vm8, %v5705_v31 }
  0x13   :  { %300 = vst.msk [vmem:[#allocation2 + $0x167] sm:$0x1] %vm288_vm8, %v5705_v31  ;;  %301 = vst.msk [vmem:[#allocation2 + $0x187] sm:$0x1] %vm288_vm8, %v5705_v31 }
  0x14   :  { %302 = vst.msk [vmem:[#allocation2 + $0x1a7] sm:$0x1] %vm288_vm8, %v5705_v31  ;;  %303 = vst.msk [vmem:[#allocation2 + $0x1c7] sm:$0x1] %vm288_vm8, %v5705_v31  ;;  %v765_v45 = vld [vmem:[#allocation2 + $0x11] sm:$0xff] }
  0x15   :  { %304 = vst.msk [vmem:[#allocation2 + $0x1e7] sm:$0x1] %vm288_vm8, %v5705_v31  ;;  %305 = vst.msk [vmem:[#allocation2 + $0x207] sm:$0x1] %vm288_vm8, %v5705_v31 }
  0x16   :  { %306 = vst.msk [vmem:[#allocation2 + $0x227] sm:$0x1] %vm288_vm8, %v5705_v31  ;;  %307 = vst.msk [vmem:[#allocation2 + $0x247] sm:$0x1] %vm288_vm8, %v5705_v31 }
  0x17   :  { %308 = vst.msk [vmem:[#allocation2 + $0x267] sm:$0x1] %vm288_vm8, %v5705_v31  ;;  %309 = vst.msk [vmem:[#allocation2 + $0x287] sm:$0x1] %vm288_vm8, %v5705_v31 }
  0x18   :  { %310 = vst.msk [vmem:[#allocation2 + $0x2a7] sm:$0x1] %vm288_vm8, %v5705_v31  ;;  %311 = vst.msk [vmem:[#allocation2 + $0x2c7] sm:$0x1] %vm288_vm8, %v5705_v31 }
  0x19   :  { %312 = vst.msk [vmem:[#allocation2 + $0x2e7] sm:$0x1] %vm288_vm8, %v5705_v31  ;;  %313 = vst.msk [vmem:[#allocation2 + $0x307] sm:$0x1] %vm288_vm8, %v5705_v31 }
  0x1a   :  { %314 = vst.msk [vmem:[#allocation2 + $0x327] sm:$0x1] %vm288_vm8, %v5705_v31  ;;  %315 = vst.msk [vmem:[#allocation2 + $0x347] sm:$0x1] %vm288_vm8, %v5705_v31 }
  0x1b   :  { %316 = vst.msk [vmem:[#allocation2 + $0x367] sm:$0x1] %vm288_vm8, %v5705_v31  ;;  %317 = vst.msk [vmem:[#allocation2 + $0x387] sm:$0x1] %vm288_vm8, %v5705_v31 }
  0x1c   :  { %318 = vst.msk [vmem:[#allocation2 + $0x3a7] sm:$0x1] %vm288_vm8, %v5705_v31  ;;  %319 = vst.msk [vmem:[#allocation2 + $0x3c7] sm:$0x1] %vm288_vm8, %v5705_v31 }
  0x1d   :  { %320 = vst.msk [vmem:[#allocation2 + $0x3e7] sm:$0x1] %vm288_vm8, %v5705_v31  ;;  %321 = vst.msk [vmem:[#allocation2 + $0x407] sm:$0x1] %vm288_vm8, %v5705_v31 }
  0x1e   :  { %322 = vst.msk [vmem:[#allocation2 + $0x427] sm:$0x1] %vm288_vm8, %v5705_v31  ;;  %323 = vst.msk [vmem:[#allocation2 + $0x447] sm:$0x1] %vm288_vm8, %v5705_v31 }
  0x1f   :  { %324 = vst.msk [vmem:[#allocation2 + $0x467] sm:$0x1] %vm288_vm8, %v5705_v31  ;;  %326 = vst.msk [vmem:[#allocation2 + $0x38] sm:$0x1] %vm288_vm8, %v5705_v31 }
  0x20   :  { %327 = vst.msk [vmem:[#allocation2 + $0x58] sm:$0x1] %vm288_vm8, %v5705_v31  ;;  %328 = vst.msk [vmem:[#allocation2 + $0x78] sm:$0x1] %vm288_vm8, %v5705_v31 }
  0x21   :  { %329 = vst.msk [vmem:[#allocation2 + $0x98] sm:$0x1] %vm288_vm8, %v5705_v31  ;;  %330 = vst.msk [vmem:[#allocation2 + $0xb8] sm:$0x1] %vm288_vm8, %v5705_v31 }
  0x22   :  { %331 = vst.msk [vmem:[#allocation2 + $0xd8] sm:$0x1] %vm288_vm8, %v5705_v31  ;;  %332 = vst.msk [vmem:[#allocation2 + $0xf8] sm:$0x1] %vm288_vm8, %v5705_v31 }
  0x23   :  { %333 = vst.msk [vmem:[#allocation2 + $0x118] sm:$0x1] %vm288_vm8, %v5705_v31  ;;  %334 = vst.msk [vmem:[#allocation2 + $0x138] sm:$0x1] %vm288_vm8, %v5705_v31 }
  0x24   :  { %335 = vst.msk [vmem:[#allocation2 + $0x158] sm:$0x1] %vm288_vm8, %v5705_v31  ;;  %336 = vst.msk [vmem:[#allocation2 + $0x178] sm:$0x1] %vm288_vm8, %v5705_v31 }
  0x25   :  { %337 = vst.msk [vmem:[#allocation2 + $0x198] sm:$0x1] %vm288_vm8, %v5705_v31  ;;  %338 = vst.msk [vmem:[#allocation2 + $0x1b8] sm:$0x1] %vm288_vm8, %v5705_v31 }
  0x26   :  { %339 = vst.msk [vmem:[#allocation2 + $0x1d8] sm:$0x1] %vm288_vm8, %v5705_v31  ;;  %340 = vst.msk [vmem:[#allocation2 + $0x1f8] sm:$0x1] %vm288_vm8, %v5705_v31 }
  0x27   :  { %341 = vst.msk [vmem:[#allocation2 + $0x218] sm:$0x1] %vm288_vm8, %v5705_v31  ;;  %342 = vst.msk [vmem:[#allocation2 + $0x238] sm:$0x1] %vm288_vm8, %v5705_v31 }
  0x28   :  { %343 = vst.msk [vmem:[#allocation2 + $0x258] sm:$0x1] %vm288_vm8, %v5705_v31  ;;  %344 = vst.msk [vmem:[#allocation2 + $0x278] sm:$0x1] %vm288_vm8, %v5705_v31 }
  0x29   :  { %345 = vst.msk [vmem:[#allocation2 + $0x298] sm:$0x1] %vm288_vm8, %v5705_v31  ;;  %346 = vst.msk [vmem:[#allocation2 + $0x2b8] sm:$0x1] %vm288_vm8, %v5705_v31 }
  0x2a   :  { %347 = vst.msk [vmem:[#allocation2 + $0x2d8] sm:$0x1] %vm288_vm8, %v5705_v31  ;;  %348 = vst.msk [vmem:[#allocation2 + $0x2f8] sm:$0x1] %vm288_vm8, %v5705_v31 }
  0x2b   :  { %349 = vst.msk [vmem:[#allocation2 + $0x318] sm:$0x1] %vm288_vm8, %v5705_v31  ;;  %350 = vst.msk [vmem:[#allocation2 + $0x338] sm:$0x1] %vm288_vm8, %v5705_v31 }
  0x2c   :  { %351 = vst.msk [vmem:[#allocation2 + $0x358] sm:$0x1] %vm288_vm8, %v5705_v31  ;;  %352 = vst.msk [vmem:[#allocation2 + $0x378] sm:$0x1] %vm288_vm8, %v5705_v31 }
  0x2d   :  { %353 = vst.msk [vmem:[#allocation2 + $0x398] sm:$0x1] %vm288_vm8, %v5705_v31  ;;  %354 = vst.msk [vmem:[#allocation2 + $0x3b8] sm:$0x1] %vm288_vm8, %v5705_v31 }
  0x2e   :  { %355 = vst.msk [vmem:[#allocation2 + $0x3d8] sm:$0x1] %vm288_vm8, %v5705_v31  ;;  %356 = vst.msk [vmem:[#allocation2 + $0x3f8] sm:$0x1] %vm288_vm8, %v5705_v31 }
  0x2f   :  { %357 = vst.msk [vmem:[#allocation2 + $0x418] sm:$0x1] %vm288_vm8, %v5705_v31  ;;  %358 = vst.msk [vmem:[#allocation2 + $0x438] sm:$0x1] %vm288_vm8, %v5705_v31 }
  0x30   :  { %359 = vst.msk [vmem:[#allocation2 + $0x458] sm:$0x1] %vm288_vm8, %v5705_v31  ;;  %360 = vst.msk [vmem:[#allocation2 + $0x478] sm:$0x1] %vm288_vm8, %v5705_v31  ;;  %v797_v31 = vld [vmem:[#allocation2 + $0x251] sm:$0xff] }
  0x3e   :  { %370 = vxpose.xlu0.b32.start [1/4] (short) %v21_v2, 128 }
  0x42   :  { %371 = vxpose.xlu0.b32.cont [2/4] (short) %v23_v8, 128 }
  0x43   :  { %402 = vxpose.xlu1.b32.start [1/4] (short) %v22_v4, 128 }
  0x46   :  { %372 = vxpose.xlu0.b32.cont [3/4] (short) %v25_v0, 128 }
  0x47   :  { %403 = vxpose.xlu1.b32.cont [2/4] (short) %v24_v9, 128  ;;  %v203_v9 = vld [vmem:[%s8619_s2] sm:$0x3]  ;;  %s5706_s2 = smov 32  }
  0x48   :  { %4519 = vmatpush3.msk.msra.mxu1 %vm208_vm6, %v203_v9 }
  0x49   :  { %4689 = vmatprep.subr.bf16.mxu1 %v8623_v27 }
  0x4a   :  { %373 = vxpose.xlu0.b32.end [4/4] (short) %v27_v5, 128 }
  0x4b   :  { %404 = vxpose.xlu1.b32.cont [3/4] (short) %v5748_v1, 128 }
  0x4f   :  { %405 = vxpose.xlu1.b32.end [4/4] (short) %v28_v6, 128 }
  0x7b   :  { %503 = vxpose.xlu0.b32.start [1/4] (short) %v29_v14, 128 }
  0x7f   :  { %504 = vxpose.xlu0.b32.cont [2/4] (short) %v31_v12, 128 }
  0x80   :  { %535 = vxpose.xlu1.b32.start [1/4] (short) %v30_v15, 128 }
  0x83   :  { %505 = vxpose.xlu0.b32.cont [3/4] (short) %v33_v20, 128 }
  0x84   :  { %536 = vxpose.xlu1.b32.cont [2/4] (short) %v32_v13, 128 }
  0x87   :  { %506 = vxpose.xlu0.b32.end [4/4] (short) %v35_v18, 128 }
  0x88   :  { %537 = vxpose.xlu1.b32.cont [3/4] (short) %v34_v21, 128 }
  0x8c   :  { %538 = vxpose.xlu1.b32.end [4/4] (short) %v36_v19, 128 }
  0x91   :  { %v45_v34 = vpop.xlane.xlu1 %44 }
  0x92   :  { %v39_v35 = vpop.xlane.xlu0 %38  ;;  %v63_v51 = vmul.f32 0.00390625, %v45_v34 }
  0x93   :  { %v61_v44 = vmul.f32 0.00390625, %v39_v35  ;;  %v5881_v35 = vld [vmem:[#allocation2 + $0x8] sm:$0xff] }
  0x94   :  { %v98_v62 = vrot.slane %v63_v51, %v97_v50 }
  0x95   :  { %v48_v38 = vpop.xlane.xlu1 %47  ;;  %v86_v53 = vrot.slane %v61_v44, %v85_v43  ;;  %v764_v44 = vld [vmem:[#allocation2 + $0x9] sm:$0xff] }
  0x96   :  { %v42_v40 = vpop.xlane.xlu0 %41  ;;  %v64_v55 = vmul.f32 0.00390625, %v48_v38  ;;  %v4730_v38 = vpack.i.bf16 %v5883_v36, %v5881_v35 }
  0x97   :  { %v62_v42 = vmul.f32 0.00390625, %v42_v40  ;;  %v733_v40 = vld [vmem:[#allocation2 + $0x250] sm:$0xff] }
  0x98   :  { %v105_v0 = vrot.slane %v64_v55, %v104_v54 }
  0x99   :  { %v54_v46 = vpop.xlane.xlu1 %53  ;;  %v91_v47 = vrot.slane %v62_v42, %v90_v39 }
  0x9a   :  { %v66_v48 = vmul.f32 0.00390625, %v54_v46  ;;  %v51_v49 = vpop.xlane.xlu0 %50  ;;  %v4740_v46 = vpack.i.bf16 %v765_v45, %v764_v44 }
  0x9b   :  { %v65_v52 = vmul.f32 0.00390625, %v51_v49  ;;  %v93_v57 = vsel %vm92_vm2, %v91_v47, %v86_v53  ;;  %v796_v47 = vld [vmem:[#allocation2 + $0x249] sm:$0xff] }
  0x9c   :  { %v115_v58 = vrot.slane %v66_v48, %v90_v39  ;;  %v100_v3 = vsel %vm99_vm3, %v98_v62, %v93_v57  ;;  %v732_v39 = vld [vmem:[#allocation2 + $0x248] sm:$0xff]  ;;  %v4745_v49 = vpack.i.bf16 %v797_v31, %v796_v47 }
  0x9d   :  { %v60_v56 = vpop.xlane.xlu1 %59  ;;  %v111_v59 = vrot.slane %v65_v52, %v85_v43  ;;  %v107_v6 = vsel %vm106_vm4, %v105_v0, %v100_v3  ;;  %v4735_v42 = vpack.i.bf16 %v733_v40, %v732_v39 }
  0x9e   :  { %v57_v60 = vpop.xlane.xlu0 %56  ;;  %v68_v61 = vmul.f32 0.00390625, %v60_v56 }
  0x9f   :  { %v67_v63 = vmul.f32 0.00390625, %v57_v60  ;;  %v116_v4 = vsel %vm92_vm2, %v115_v58, %v111_v59 }
  0xa0   :  { %v125_v1 = vrot.slane %v68_v61, %v104_v54 }
  0xa1   :  { %v120_v2 = vrot.slane %v67_v63, %v97_v50 }
  0xa3   :  { %v121_v5 = vsel %vm99_vm3, %v120_v2, %v116_v4 }
  0xa4   :  { %v126_v7 = vsel %vm106_vm4, %v125_v1, %v121_v5 }
  0xa5   :  { %v128_v8 = vsel %vm127_vm5, %v126_v7, %v107_v6 }
  0xa6   :  { %4516 = vmatmul.mubr.msk.f32.vlgmr.msra.gmra.mrb[0].mxu0 %vm129_vm1, %v128_v8 }
  0xbe   :  { %v5843_v14 = vpop.trf.xlu0 }
  0xc2   :  { %v5847_v16 = vpop.trf.xlu0 }
  0xc3   :  { %v5841_v13 = vpop.trf.xlu1 }
  0xc6   :  { %v5851_v18 = vpop.trf.xlu0 }
  0xc7   :  { %v5845_v15 = vpop.trf.xlu1 }
  0xca   :  { %v5855_v20 = vpop.trf.xlu0 }
  0xcb   :  { %v5849_v17 = vpop.trf.xlu1 }
  0xce   :  { %v5859_v22 = vpop.trf.xlu0 }
  0xcf   :  { %v5853_v19 = vpop.trf.xlu1 }
  0xd2   :  { %v5863_v24 = vpop.trf.xlu0 }
  0xd3   :  { %v5857_v21 = vpop.trf.xlu1 }
  0xd6   :  { %v5867_v26 = vpop.trf.xlu0 }
  0xd7   :  { %v5861_v23 = vpop.trf.xlu1 }
  0xda   :  { %v5871_v29 = vpop.trf.xlu0 }
  0xdb   :  { %v5865_v25 = vpop.trf.xlu1 }
  0xde   :  { %v5875_v32 = vpop.trf.xlu0 }
  0xdf   :  { %v5869_v28 = vpop.trf.xlu1 }
  0xe0   :  { %4731 = vrot.lane.b32.xlu0 %v4730_v38, %s5706_s2 }
  0xe2   :  { %v5879_v34 = vpop.trf.xlu0 }
  0xe3   :  { %v5873_v30 = vpop.trf.xlu1 }
  0xe4   :  { %4736 = vrot.lane.b32.xlu0 %v4735_v42, %s5706_s2 }
  0xe6   :  { %v6037_v43 = vpop.trf.xlu0 }
  0xe7   :  { %v5877_v33 = vpop.trf.xlu1 }
  0xe8   :  { %4741 = vrot.lane.b32.xlu0 %v4740_v46, %s5707_s8 }
  0xea   :  { %v397_v50 = vpop.trf.xlu0 }
  0xeb   :  { %v6035_v41 = vpop.trf.xlu1 }
  0xec   :  { %4746 = vrot.lane.b32.xlu0 %v4745_v49, %s5707_s8 }
  0xee   :  { %v6046_v52 = vpop.trf.xlu0 }
  0xef   :  { %v6040_v48 = vpop.trf.xlu1 }
  0xf2   :  { %v6050_v54 = vpop.trf.xlu0 }
  0xf3   :  { %v6044_v51 = vpop.trf.xlu1 }
  0xf6   :  { %v400_v56 = vpop.trf.xlu0 }
  0xf7   :  { %v6048_v53 = vpop.trf.xlu1 }
  0xfa   :  { %v401_v58 = vpop.trf.xlu0 }
  0xfb   :  { %v6052_v55 = vpop.trf.xlu1 }
  0xfe   :  { %v6058_v60 = vpop.trf.xlu0 }
  0xff   :  { %v6054_v57 = vpop.trf.xlu1 }
 0x102   :  { %v6062_v62 = vpop.trf.xlu0 }
 0x103   :  { %v6056_v59 = vpop.trf.xlu1 }
 0x106   :  { %v6066_v0 = vpop.trf.xlu0 }
 0x107   :  { %v6060_v61 = vpop.trf.xlu1 }
 0x10a   :  { %v6070_v2 = vpop.trf.xlu0 }
 0x10b   :  { %v6064_v63 = vpop.trf.xlu1 }
 0x10e   :  { %v6074_v4 = vpop.trf.xlu0 }
 0x10f   :  { %v6068_v1 = vpop.trf.xlu1 }
 0x112   :  { %v6078_v6 = vpop.trf.xlu0 }
 0x113   :  { %v6072_v3 = vpop.trf.xlu1 }
 0x116   :  { %v6082_v8 = vpop.trf.xlu0 }
 0x117   :  { %v6076_v5 = vpop.trf.xlu1 }
 0x11b   :  { %v6080_v7 = vpop.trf.xlu1 }
 0x11f   :  { %v6084_v9 = vpop.trf.xlu1 }
 0x179   :  { %v198_v10 = vpop.f32.mrb[0].mxu0 }
 0x17a   :  { %v202_v11 = vmax.f32 %v198_v10, 0.0  ;;  %v4517_v12 = vpop.f32.mrb[1].mxu0  ;;  %v6086_v10 = vpop.trf.xlu0 }
 0x17b   :  { %v6088_v12 = vpop.trf.xlu1 }
 0x17c   :  { %4521 = vmatmul.mubr.msk.f32.vlgmr.msra.gmra.mrb[0].mxu1 %vm204_vm7, %v202_v11 }
 0x17e   :  { %v6090_v38 = vpop.trf.xlu0 }
 0x17f   :  { %v6092_v40 = vpop.trf.xlu1 }
 0x180   :  { %8758 = vst [vmem:[#allocation6_spill] sm:$0xff] %v6092_v40 }
 0x182   :  { %v6094_v42 = vpop.trf.xlu0 }
 0x183   :  { %8759 = vst [vmem:[#allocation7_spill] sm:$0xff] %v6094_v42  ;;  %v6096_v44 = vpop.trf.xlu1 }
 0x184   :  { %8760 = vst [vmem:[#allocation8_spill] sm:$0xff] %v6096_v44 }
 0x186   :  { %v6098_v45 = vpop.trf.xlu0 }
 0x187   :  { %8761 = vst [vmem:[#allocation9_spill] sm:$0xff] %v6098_v45  ;;  %v6100_v31 = vpop.trf.xlu1 }
 0x188   :  { %8762 = vst [vmem:[#allocation10_spill] sm:$0xff] %v6100_v31 }
 0x18a   :  { %v6102_v49 = vpop.trf.xlu0 }
 0x18b   :  { %8763 = vst [vmem:[#allocation11_spill] sm:$0xff] %v6102_v49 }
 0x24f   :  { %v278_v11 = vpop.f32.mrb[0].mxu1 }
 0x250   :  { %v282_v35 = vsub.f32 0.0, %v278_v11  ;;  %v4522_v36 = vpop.f32.mrb[1].mxu1  ;;  %v436_v11 = vsub.s32 0, %v5828_v37 }
 0x251   :  { %v6106_v36 = vpop.trf.xlu1 }
 0x252   :  { %v283_v39 = vmul.f32 1.442695, %v282_v35  ;;  %v569_v35 = vsub.s32 1, %v5828_v37 }
 0x254   :  { %5675 = vpow2.f32 %v283_v39  ;;  %v6108_v39 = vpop.trf.xlu0 }
 0x255   :  { %8764 = vst [vmem:[#allocation12_spill] sm:$0xff] %v6108_v39  ;;  %v6116_v31 = vpop.trf.xlu1 }
 0x258   :  { %v6118_v40 = vpop.trf.xlu0 }
 0x25e   :  { %v5676_v46 = vpop.eup %5675 }
 0x25f   :  { %v285_v47 = vadd.f32 1.0, %v5676_v46 }
 0x261   :  { %5677 = vrcp.f32 %v285_v47 }
 0x26b   :  { %v5678_v27 = vpop.eup %5677 }
 0x26c   :  { %v437_v42 = vrot.slane %v5678_v27, %v436_v11  ;;  %v6110_v44 = vrot.slane %v5678_v27, %v569_v35 }
 0x26e   :  { %v438_v45 = vmul.f32 %v437_v42, %v5843_v14  ;;  %v439_v46 = vmul.f32 %v437_v42, %v5847_v16  ;;  %v440_v47 = vmul.f32 %v437_v42, %v5851_v18  ;;  %v441_v49 = vmul.f32 %v437_v42, %v5855_v20 }
 0x26f   :  { %v442_v37 = vmul.f32 %v437_v42, %v5859_v22  ;;  %v443_v39 = vmul.f32 %v437_v42, %v5863_v24  ;;  %v444_v11 = vmul.f32 %v437_v42, %v5867_v26  ;;  %v445_v27 = vmul.f32 %v437_v42, %v5871_v29 }
 0x270   :  { %v446_v14 = vmul.f32 %v437_v42, %v5875_v32  ;;  %v447_v16 = vmul.f32 %v437_v42, %v5879_v34  ;;  %v448_v18 = vmul.f32 %v437_v42, %v6037_v43  ;;  %v449_v35 = vmul.f32 %v437_v42, %v397_v50  ;;  %471 = vst.msk [vmem:[#allocation2 + $0x28] sm:$0xff] %vm129_vm1, %v438_v45 }
 0x271   :  { %472 = vst.msk [vmem:[#allocation2 + $0x30] sm:$0xff] %vm129_vm1, %v439_v46  ;;  %473 = vst.msk [vmem:[#allocation2 + $0x48] sm:$0xff] %vm129_vm1, %v440_v47  ;;  %v450_v20 = vmul.f32 %v437_v42, %v6046_v52  ;;  %v451_v22 = vmul.f32 %v437_v42, %v6050_v54  ;;  %v452_v24 = vmul.f32 %v437_v42, %v400_v56  ;;  %v8769_v46 = vld [vmem:[#allocation10_spill] sm:$0xff] }
 0x272   :  { %474 = vst.msk [vmem:[#allocation2 + $0x50] sm:$0xff] %vm129_vm1, %v441_v49  ;;  %v453_v26 = vmul.f32 %v437_v42, %v401_v58  ;;  %475 = vst.msk [vmem:[#allocation2 + $0x68] sm:$0xff] %vm129_vm1, %v442_v37  ;;  %v454_v29 = vmul.f32 %v437_v42, %v5841_v13  ;;  %v455_v32 = vmul.f32 %v437_v42, %v5845_v15  ;;  %v8768_v49 = vld [vmem:[#allocation9_spill] sm:$0xff]  ;;  %v8770_v37 = vld [vmem:[#allocation11_spill] sm:$0xff] }
 0x273   :  { %476 = vst.msk [vmem:[#allocation2 + $0x70] sm:$0xff] %vm129_vm1, %v443_v39  ;;  %477 = vst.msk [vmem:[#allocation2 + $0x88] sm:$0xff] %vm129_vm1, %v444_v11  ;;  %v456_v34 = vmul.f32 %v437_v42, %v5849_v17  ;;  %v457_v43 = vmul.f32 %v437_v42, %v5853_v19  ;;  %v458_v50 = vmul.f32 %v437_v42, %v5857_v21 }
 0x274   :  { %478 = vst.msk [vmem:[#allocation2 + $0x90] sm:$0xff] %vm129_vm1, %v445_v27  ;;  %479 = vst.msk [vmem:[#allocation2 + $0xa8] sm:$0xff] %vm129_vm1, %v446_v14  ;;  %v459_v52 = vmul.f32 %v437_v42, %v5861_v23  ;;  %v460_v13 = vmul.f32 %v437_v42, %v5865_v25  ;;  %v461_v15 = vmul.f32 %v437_v42, %v5869_v28  ;;  %v6161_v25 = vpop.trf.xlu1  ;;  %v6163_v28 = vpop.trf.xlu0 }
 0x275   :  { %480 = vst.msk [vmem:[#allocation2 + $0xb0] sm:$0xff] %vm129_vm1, %v447_v16  ;;  %481 = vst.msk [vmem:[#allocation2 + $0xc8] sm:$0xff] %vm129_vm1, %v448_v18  ;;  %v462_v17 = vmul.f32 %v437_v42, %v5873_v30  ;;  %v463_v19 = vmul.f32 %v437_v42, %v5877_v33  ;;  %v464_v21 = vmul.f32 %v437_v42, %v6035_v41 }
 0x276   :  { %482 = vst.msk [vmem:[#allocation2 + $0xd0] sm:$0xff] %vm129_vm1, %v449_v35  ;;  %483 = vst.msk [vmem:[#allocation2 + $0xe8] sm:$0xff] %vm129_vm1, %v450_v20  ;;  %v465_v23 = vmul.f32 %v437_v42, %v6040_v48  ;;  %v466_v30 = vmul.f32 %v437_v42, %v6044_v51  ;;  %v467_v33 = vmul.f32 %v437_v42, %v6048_v53  ;;  %v8771_v35 = vld [vmem:[#allocation12_spill] sm:$0xff] }
 0x277   :  { %484 = vst.msk [vmem:[#allocation2 + $0xf0] sm:$0xff] %vm129_vm1, %v451_v22  ;;  %485 = vst.msk [vmem:[#allocation2 + $0x108] sm:$0xff] %vm129_vm1, %v452_v24  ;;  %v468_v41 = vmul.f32 %v437_v42, %v6052_v55  ;;  %v469_v48 = vmul.f32 %v437_v42, %v6054_v57  ;;  %v571_v54 = vmul.f32 %v6110_v44, %v6058_v60  ;;  %v702_v45 = vld [vmem:[#allocation2 + $0x28] sm:$0xff] }
 0x278   :  { %486 = vst.msk [vmem:[#allocation2 + $0x110] sm:$0xff] %vm129_vm1, %v453_v26  ;;  %487 = vst.msk [vmem:[#allocation2 + $0x128] sm:$0xff] %vm129_vm1, %v454_v29  ;;  %v572_v51 = vmul.f32 %v6110_v44, %v6062_v62  ;;  %v573_v53 = vmul.f32 %v6110_v44, %v6066_v0  ;;  %v574_v55 = vmul.f32 %v6110_v44, %v6070_v2  ;;  %v534_v42 = vpop.trf.xlu0  ;;  %v703_v27 = vld [vmem:[#allocation2 + $0x30] sm:$0xff] }
 0x279   :  { %488 = vst.msk [vmem:[#allocation2 + $0x130] sm:$0xff] %vm129_vm1, %v455_v32  ;;  %489 = vst.msk [vmem:[#allocation2 + $0x148] sm:$0xff] %vm129_vm1, %v456_v34  ;;  %v575_v56 = vmul.f32 %v6110_v44, %v6074_v4  ;;  %v576_v57 = vmul.f32 %v6110_v44, %v6078_v6  ;;  %v577_v58 = vmul.f32 %v6110_v44, %v6082_v8  ;;  %v8765_v6 = vld [vmem:[#allocation6_spill] sm:$0xff]  ;;  %v8766_v8 = vld [vmem:[#allocation7_spill] sm:$0xff] }
 0x27a   :  { %490 = vst.msk [vmem:[#allocation2 + $0x150] sm:$0xff] %vm129_vm1, %v457_v43  ;;  %491 = vst.msk [vmem:[#allocation2 + $0x168] sm:$0xff] %vm129_vm1, %v458_v50  ;;  %v578_v60 = vmul.f32 %v6110_v44, %v6086_v10  ;;  %v587_v62 = vmul.f32 %v6110_v44, %v6056_v59  ;;  %v588_v0 = vmul.f32 %v6110_v44, %v6060_v61  ;;  %v566_v10 = vpop.trf.xlu1  ;;  %v708_v14 = vld [vmem:[#allocation2 + $0x88] sm:$0xff] }
 0x27b   :  { %492 = vst.msk [vmem:[#allocation2 + $0x170] sm:$0xff] %vm129_vm1, %v459_v52  ;;  %493 = vst.msk [vmem:[#allocation2 + $0x188] sm:$0xff] %vm129_vm1, %v460_v13  ;;  %v589_v2 = vmul.f32 %v6110_v44, %v6064_v63  ;;  %v590_v4 = vmul.f32 %v6110_v44, %v6068_v1  ;;  %v591_v59 = vmul.f32 %v6110_v44, %v6072_v3  ;;  %v709_v16 = vld [vmem:[#allocation2 + $0x90] sm:$0xff]  ;;  %v6271_v34 = vld [vmem:[#allocation2 + $0x48] sm:$0xff] }
 0x27c   :  { %494 = vst.msk [vmem:[#allocation2 + $0x190] sm:$0xff] %vm129_vm1, %v461_v15  ;;  %495 = vst.msk [vmem:[#allocation2 + $0x1a8] sm:$0xff] %vm129_vm1, %v462_v17  ;;  %v592_v61 = vmul.f32 %v6110_v44, %v6076_v5  ;;  %v593_v63 = vmul.f32 %v6110_v44, %v6080_v7  ;;  %v594_v1 = vmul.f32 %v6110_v44, %v6084_v9  ;;  %v712_v43 = vld [vmem:[#allocation2 + $0xc8] sm:$0xff] }
 0x27d   :  { %496 = vst.msk [vmem:[#allocation2 + $0x1b0] sm:$0xff] %vm129_vm1, %v463_v19  ;;  %497 = vst.msk [vmem:[#allocation2 + $0x1c8] sm:$0xff] %vm129_vm1, %v464_v21  ;;  %v595_v3 = vmul.f32 %v6110_v44, %v6088_v12  ;;  %v579_v5 = vmul.f32 %v6110_v44, %v6090_v38  ;;  %v596_v7 = vmul.f32 %v6110_v44, %v8765_v6  ;;  %v8767_v12 = vld [vmem:[#allocation8_spill] sm:$0xff]  ;;  %v706_v19 = vld [vmem:[#allocation2 + $0x68] sm:$0xff] }
 0x27e   :  { %498 = vst.msk [vmem:[#allocation2 + $0x1d0] sm:$0xff] %vm129_vm1, %v465_v23  ;;  %499 = vst.msk [vmem:[#allocation2 + $0x1e8] sm:$0xff] %vm129_vm1, %v466_v30  ;;  %v580_v9 = vmul.f32 %v6110_v44, %v8766_v8  ;;  %v597_v38 = vmul.f32 %v6110_v44, %v8767_v12  ;;  %v581_v39 = vmul.f32 %v6110_v44, %v8768_v49  ;;  %v713_v50 = vld [vmem:[#allocation2 + $0xd0] sm:$0xff]  ;;  %v716_v23 = vld [vmem:[#allocation2 + $0x108] sm:$0xff] }
 0x27f   :  { %500 = vst.msk [vmem:[#allocation2 + $0x1f0] sm:$0xff] %vm129_vm1, %v467_v33  ;;  %501 = vst.msk [vmem:[#allocation2 + $0x208] sm:$0xff] %vm129_vm1, %v468_v41  ;;  %v598_v47 = vmul.f32 %v6110_v44, %v8769_v46  ;;  %v582_v11 = vmul.f32 %v6110_v44, %v8770_v37  ;;  %v599_v18 = vmul.f32 %v6110_v44, %v6106_v36  ;;  %v707_v21 = vld [vmem:[#allocation2 + $0x70] sm:$0xff]  ;;  %v6514_v37 = vld [vmem:[#allocation2 + $0x47] sm:$0xff] }
 0x280   :  { %502 = vst.msk [vmem:[#allocation2 + $0x210] sm:$0xff] %vm129_vm1, %v469_v48  ;;  %604 = vst.msk [vmem:[#allocation2 + $0x268] sm:$0xff] %vm129_vm1, %v571_v54  ;;  %v583_v20 = vmul.f32 %v6110_v44, %v8771_v35  ;;  %v600_v22 = vmul.f32 %v6110_v44, %v6116_v31  ;;  %v584_v24 = vmul.f32 %v6110_v44, %v6118_v40  ;;  %v710_v48 = vld [vmem:[#allocation2 + $0xa8] sm:$0xff]  ;;  %v711_v54 = vld [vmem:[#allocation2 + $0xb0] sm:$0xff] }
 0x281   :  { %605 = vst.msk [vmem:[#allocation2 + $0x270] sm:$0xff] %vm129_vm1, %v572_v51  ;;  %606 = vst.msk [vmem:[#allocation2 + $0x288] sm:$0xff] %vm129_vm1, %v573_v53  ;;  %v601_v36 = vmul.f32 %v6110_v44, %v6161_v25  ;;  %v585_v26 = vmul.f32 %v6110_v44, %v6163_v28  ;;  %v602_v29 = vmul.f32 %v6110_v44, %v566_v10  ;;  %v6281_v52 = vld [vmem:[#allocation2 + $0x150] sm:$0xff]  ;;  %v6283_v13 = vld [vmem:[#allocation2 + $0x168] sm:$0xff] }
 0x282   :  { %607 = vst.msk [vmem:[#allocation2 + $0x290] sm:$0xff] %vm129_vm1, %v574_v55  ;;  %608 = vst.msk [vmem:[#allocation2 + $0x2a8] sm:$0xff] %vm129_vm1, %v575_v56  ;;  %v586_v31 = vmul.f32 %v6110_v44, %v534_v42  ;;  %v4750_v40 = vpack.i.bf16 %v703_v27, %v702_v45  ;;  %v4765_v32 = vpack.i.bf16 %v709_v16, %v708_v14  ;;  %v6277_v44 = vld [vmem:[#allocation2 + $0x50] sm:$0xff]  ;;  %v720_v51 = vld [vmem:[#allocation2 + $0x148] sm:$0xff] }
 0x283   :  { %609 = vst.msk [vmem:[#allocation2 + $0x2b0] sm:$0xff] %vm129_vm1, %v576_v57  ;;  %610 = vst.msk [vmem:[#allocation2 + $0x2c8] sm:$0xff] %vm129_vm1, %v577_v58  ;;  %v4755_v15 = vpack.i.bf16 %v6277_v44, %v6271_v34  ;;  %v4775_v17 = vpack.i.bf16 %v713_v50, %v712_v43  ;;  %v717_v25 = vld [vmem:[#allocation2 + $0x110] sm:$0xff]  ;;  %v4760_v33 = vpack.i.bf16 %v707_v21, %v706_v19  ;;  %v714_v56 = vld [vmem:[#allocation2 + $0xe8] sm:$0xff] }
 0x284   :  { %611 = vst.msk [vmem:[#allocation2 + $0x2d0] sm:$0xff] %vm129_vm1, %v578_v60  ;;  %620 = vst.msk [vmem:[#allocation2 + $0x368] sm:$0xff] %vm129_vm1, %v587_v62  ;;  %4751 = vrot.lane.b32.xlu1 %v4750_v40, %s5706_s2  ;;  %4766 = vrot.lane.b32.xlu0 %v4765_v32, %s5706_s2  ;;  %v4785_v41 = vpack.i.bf16 %v717_v25, %v716_v23  ;;  %v4770_v53 = vpack.i.bf16 %v711_v54, %v710_v48  ;;  %v715_v57 = vld [vmem:[#allocation2 + $0xf0] sm:$0xff]  ;;  %v724_v58 = vld [vmem:[#allocation2 + $0x188] sm:$0xff] }
 0x285   :  { %621 = vst.msk [vmem:[#allocation2 + $0x370] sm:$0xff] %vm129_vm1, %v588_v0  ;;  %622 = vst.msk [vmem:[#allocation2 + $0x388] sm:$0xff] %vm129_vm1, %v589_v2  ;;  %v4795_v55 = vpack.i.bf16 %v6281_v52, %v720_v51  ;;  %v725_v60 = vld [vmem:[#allocation2 + $0x190] sm:$0xff]  ;;  %v4780_v62 = vpack.i.bf16 %v715_v57, %v714_v56  ;;  %v718_v2 = vld [vmem:[#allocation2 + $0x128] sm:$0xff] }
 0x286   :  { %623 = vst.msk [vmem:[#allocation2 + $0x390] sm:$0xff] %vm129_vm1, %v590_v4  ;;  %624 = vst.msk [vmem:[#allocation2 + $0x3a8] sm:$0xff] %vm129_vm1, %v591_v59  ;;  %v4805_v0 = vpack.i.bf16 %v725_v60, %v724_v58  ;;  %v719_v4 = vld [vmem:[#allocation2 + $0x130] sm:$0xff]  ;;  %v728_v59 = vld [vmem:[#allocation2 + $0x1c8] sm:$0xff] }
 0x287   :  { %625 = vst.msk [vmem:[#allocation2 + $0x3b0] sm:$0xff] %vm129_vm1, %v592_v61  ;;  %626 = vst.msk [vmem:[#allocation2 + $0x3c8] sm:$0xff] %vm129_vm1, %v593_v63  ;;  %v729_v61 = vld [vmem:[#allocation2 + $0x1d0] sm:$0xff]  ;;  %v4790_v8 = vpack.i.bf16 %v719_v4, %v718_v2  ;;  %v730_v40 = vld [vmem:[#allocation2 + $0x1e8] sm:$0xff] }
 0x288   :  { %627 = vst.msk [vmem:[#allocation2 + $0x3d0] sm:$0xff] %vm129_vm1, %v594_v1  ;;  %628 = vst.msk [vmem:[#allocation2 + $0x3e8] sm:$0xff] %vm129_vm1, %v595_v3  ;;  %4756 = vrot.lane.b32.xlu1 %v4755_v15, %s5706_s2  ;;  %4776 = vrot.lane.b32.xlu0 %v4775_v17, %s5706_s2  ;;  %v6300_v63 = vld [vmem:[#allocation2 + $0xb1] sm:$0xff]  ;;  %v736_v3 = vld [vmem:[#allocation2 + $0x288] sm:$0xff] }
 0x289   :  { %612 = vst.msk [vmem:[#allocation2 + $0x2e8] sm:$0xff] %vm129_vm1, %v579_v5  ;;  %629 = vst.msk [vmem:[#allocation2 + $0x3f0] sm:$0xff] %vm129_vm1, %v596_v7  ;;  %v723_v1 = vld [vmem:[#allocation2 + $0x170] sm:$0xff]  ;;  %v734_v19 = vld [vmem:[#allocation2 + $0x268] sm:$0xff] }
 0x28a   :  { %613 = vst.msk [vmem:[#allocation2 + $0x2f0] sm:$0xff] %vm129_vm1, %v580_v9  ;;  %630 = vst.msk [vmem:[#allocation2 + $0x408] sm:$0xff] %vm129_vm1, %v597_v38  ;;  %v6302_v5 = vld [vmem:[#allocation2 + $0x111] sm:$0xff]  ;;  %v6304_v6 = vld [vmem:[#allocation2 + $0x149] sm:$0xff]  ;;  %v4815_v9 = vpack.i.bf16 %v729_v61, %v728_v59 }
 0x28b   :  { %614 = vst.msk [vmem:[#allocation2 + $0x308] sm:$0xff] %vm129_vm1, %v581_v39  ;;  %631 = vst.msk [vmem:[#allocation2 + $0x410] sm:$0xff] %vm129_vm1, %v598_v47  ;;  %v6306_v7 = vld [vmem:[#allocation2 + $0x1c9] sm:$0xff]  ;;  %v6308_v42 = vld [vmem:[#allocation2 + $0x151] sm:$0xff] }
 0x28c   :  { %615 = vst.msk [vmem:[#allocation2 + $0x310] sm:$0xff] %vm129_vm1, %v582_v11  ;;  %632 = vst.msk [vmem:[#allocation2 + $0x428] sm:$0xff] %vm129_vm1, %v599_v18  ;;  %4761 = vrot.lane.b32.xlu1 %v4760_v33, %s5706_s2  ;;  %4786 = vrot.lane.b32.xlu0 %v4785_v41, %s5706_s2  ;;  %v737_v10 = vld [vmem:[#allocation2 + $0x290] sm:$0xff]  ;;  %v4800_v18 = vpack.i.bf16 %v723_v1, %v6283_v13  ;;  %v6345_v33 = vld [vmem:[#allocation2 + $0x67] sm:$0xff] }
 0x28d   :  { %616 = vst.msk [vmem:[#allocation2 + $0x328] sm:$0xff] %vm129_vm1, %v583_v20  ;;  %633 = vst.msk [vmem:[#allocation2 + $0x430] sm:$0xff] %vm129_vm1, %v600_v22  ;;  %v6310_v45 = vld [vmem:[#allocation2 + $0x189] sm:$0xff]  ;;  %v6314_v38 = vld [vmem:[#allocation2 + $0x91] sm:$0xff]  ;;  %v4830_v35 = vpack.i.bf16 %v737_v10, %v736_v3 }
 0x28e   :  { %617 = vst.msk [vmem:[#allocation2 + $0x330] sm:$0xff] %vm129_vm1, %v584_v24  ;;  %634 = vst.msk [vmem:[#allocation2 + $0x448] sm:$0xff] %vm129_vm1, %v601_v36  ;;  %v6316_v49 = vld [vmem:[#allocation2 + $0x129] sm:$0xff]  ;;  %v6318_v39 = vld [vmem:[#allocation2 + $0x131] sm:$0xff] }
 0x28f   :  { %618 = vst.msk [vmem:[#allocation2 + $0x348] sm:$0xff] %vm129_vm1, %v585_v26  ;;  %635 = vst.msk [vmem:[#allocation2 + $0x450] sm:$0xff] %vm129_vm1, %v602_v29  ;;  %v6322_v46 = vld [vmem:[#allocation2 + $0x169] sm:$0xff]  ;;  %v6324_v47 = vld [vmem:[#allocation2 + $0x171] sm:$0xff] }
 0x290   :  { %619 = vst.msk [vmem:[#allocation2 + $0x350] sm:$0xff] %vm129_vm1, %v586_v31  ;;  %4771 = vrot.lane.b32.xlu1 %v4770_v53, %s5706_s2  ;;  %4796 = vrot.lane.b32.xlu0 %v4795_v55, %s5706_s2  ;;  %v6330_v27 = vld [vmem:[#allocation2 + $0x1a9] sm:$0xff]  ;;  %v821_v22 = vld [vmem:[#allocation2 + $0x3d1] sm:$0xff] }
 0x291   :  { %v726_v20 = vld [vmem:[#allocation2 + $0x1a8] sm:$0xff]  ;;  %v727_v24 = vld [vmem:[#allocation2 + $0x1b0] sm:$0xff] }
 0x292   :  { %v740_v36 = vld [vmem:[#allocation2 + $0x2c8] sm:$0xff]  ;;  %v741_v26 = vld [vmem:[#allocation2 + $0x2d0] sm:$0xff]  ;;  %v4810_v29 = vpack.i.bf16 %v727_v24, %v726_v20 }
 0x293   :  { %v4840_v31 = vpack.i.bf16 %v741_v26, %v740_v36  ;;  %v731_v32 = vld [vmem:[#allocation2 + $0x1f0] sm:$0xff]  ;;  %v744_v43 = vld [vmem:[#allocation2 + $0x308] sm:$0xff] }
 0x294   :  { %4781 = vrot.lane.b32.xlu1 %v4780_v62, %s5706_s2  ;;  %4806 = vrot.lane.b32.xlu0 %v4805_v0, %s5706_s2  ;;  %v745_v50 = vld [vmem:[#allocation2 + $0x310] sm:$0xff]  ;;  %v4820_v15 = vpack.i.bf16 %v731_v32, %v730_v40  ;;  %v738_v41 = vld [vmem:[#allocation2 + $0x2a8] sm:$0xff] }
 0x295   :  { %v4850_v17 = vpack.i.bf16 %v745_v50, %v744_v43  ;;  %v735_v21 = vld [vmem:[#allocation2 + $0x270] sm:$0xff]  ;;  %v752_v54 = vld [vmem:[#allocation2 + $0x388] sm:$0xff] }
 0x296   :  { %v748_v23 = vld [vmem:[#allocation2 + $0x348] sm:$0xff]  ;;  %v739_v48 = vld [vmem:[#allocation2 + $0x2b0] sm:$0xff]  ;;  %v4825_v53 = vpack.i.bf16 %v735_v21, %v734_v19 }
 0x297   :  { %v749_v25 = vld [vmem:[#allocation2 + $0x350] sm:$0xff]  ;;  %v6347_v56 = vld [vmem:[#allocation2 + $0xa7] sm:$0xff]  ;;  %v4835_v10 = vpack.i.bf16 %v739_v48, %v738_v41 }
 0x298   :  { %4791 = vrot.lane.b32.xlu1 %v4790_v8, %s5706_s2  ;;  %4816 = vrot.lane.b32.xlu0 %v4815_v9, %s5706_s2  ;;  %v753_v51 = vld [vmem:[#allocation2 + $0x390] sm:$0xff]  ;;  %v4860_v55 = vpack.i.bf16 %v749_v25, %v748_v23  ;;  %v6349_v57 = vld [vmem:[#allocation2 + $0x167] sm:$0xff] }
 0x299   :  { %v6351_v58 = vld [vmem:[#allocation2 + $0x16f] sm:$0xff]  ;;  %v6353_v60 = vld [vmem:[#allocation2 + $0xe7] sm:$0xff] }
 0x29a   :  { %v6355_v62 = vld [vmem:[#allocation2 + $0x4f] sm:$0xff]  ;;  %v6357_v0 = vld [vmem:[#allocation2 + $0x1a7] sm:$0xff] }
 0x29b   :  { %v6363_v4 = vld [vmem:[#allocation2 + $0x1af] sm:$0xff]  ;;  %v6369_v1 = vld [vmem:[#allocation2 + $0x1e7] sm:$0xff] }
 0x29c   :  { %4801 = vrot.lane.b32.xlu1 %v4800_v18, %s5706_s2  ;;  %4831 = vrot.lane.b32.xlu0 %v4830_v35, %s5706_s2  ;;  %v6365_v59 = vld [vmem:[#allocation2 + $0x8f] sm:$0xff]  ;;  %v4870_v18 = vpack.i.bf16 %v753_v51, %v752_v54  ;;  %v6385_v40 = vld [vmem:[#allocation2 + $0x87] sm:$0xff] }
 0x29d   :  { %v6371_v3 = vld [vmem:[#allocation2 + $0x1ef] sm:$0xff]  ;;  %v6391_v23 = vld [vmem:[#allocation2 + $0x107] sm:$0xff] }
 0x29e   :  { %v742_v35 = vld [vmem:[#allocation2 + $0x2e8] sm:$0xff]  ;;  %v743_v36 = vld [vmem:[#allocation2 + $0x2f0] sm:$0xff] }
 0x29f   :  { %v6377_v20 = vld [vmem:[#allocation2 + $0xcf] sm:$0xff]  ;;  %v6395_v48 = vld [vmem:[#allocation2 + $0x1c7] sm:$0xff] }
 0x2a0   :  { %4811 = vrot.lane.b32.xlu1 %v4810_v29, %s5706_s2  ;;  %4841 = vrot.lane.b32.xlu0 %v4840_v31, %s5706_s2  ;;  %v756_v26 = vld [vmem:[#allocation2 + $0x3c8] sm:$0xff]  ;;  %v757_v29 = vld [vmem:[#allocation2 + $0x3d0] sm:$0xff] }
 0x2a1   :  { %v746_v32 = vld [vmem:[#allocation2 + $0x328] sm:$0xff]  ;;  %v747_v43 = vld [vmem:[#allocation2 + $0x330] sm:$0xff]  ;;  %v4880_v19 = vpack.i.bf16 %v757_v29, %v756_v26 }
 0x2a2   :  { %v6387_v50 = vld [vmem:[#allocation2 + $0xaf] sm:$0xff]  ;;  %v828_v14 = vld [vmem:[#allocation2 + $0x27] sm:$0xff] }
 0x2a3   :  { %v760_v21 = vld [vmem:[#allocation2 + $0x408] sm:$0xff]  ;;  %v761_v41 = vld [vmem:[#allocation2 + $0x410] sm:$0xff] }
 0x2a4   :  { %4821 = vrot.lane.b32.xlu1 %v4820_v15, %s5706_s2  ;;  %4851 = vrot.lane.b32.xlu0 %v4850_v17, %s5706_s2  ;;  %v6389_v15 = vld [vmem:[#allocation2 + $0xc7] sm:$0xff]  ;;  %v4845_v17 = vpack.i.bf16 %v743_v36, %v742_v35  ;;  %v6393_v25 = vld [vmem:[#allocation2 + $0x18f] sm:$0xff]  ;;  %v4855_v35 = vpack.i.bf16 %v747_v43, %v746_v32  ;;  %v4890_v36 = vpack.i.bf16 %v761_v41, %v760_v21 }
 0x2a5   :  { %v6397_v54 = vld [vmem:[#allocation2 + $0x1cf] sm:$0xff] }
 0x2a6   :  { %v750_v26 = vld [vmem:[#allocation2 + $0x368] sm:$0xff]  ;;  %v751_v29 = vld [vmem:[#allocation2 + $0x370] sm:$0xff] }
 0x2a7   :  { %v768_v31 = vld [vmem:[#allocation2 + $0x49] sm:$0xff]  ;;  %v769_v24 = vld [vmem:[#allocation2 + $0x51] sm:$0xff] }
 0x2a8   :  { %4826 = vrot.lane.b32.xlu1 %v4825_v53, %s5706_s2  ;;  %4861 = vrot.lane.b32.xlu0 %v4860_v55, %s5706_s2  ;;  %v6403_v53 = vld [vmem:[#allocation2 + $0x20f] sm:$0xff] }
 0x2a9   :  { %v754_v12 = vld [vmem:[#allocation2 + $0x3a8] sm:$0xff]  ;;  %v755_v9 = vld [vmem:[#allocation2 + $0x3b0] sm:$0xff] }
 0x2aa   :  { %v772_v55 = vld [vmem:[#allocation2 + $0x89] sm:$0xff]  ;;  %v4875_v32 = vpack.i.bf16 %v755_v9, %v754_v12  ;;  %v799_v51 = vld [vmem:[#allocation2 + $0x271] sm:$0xff] }
 0x2ab   :  { %v4915_v43 = vpack.i.bf16 %v6314_v38, %v772_v55  ;;  %v758_v21 = vld [vmem:[#allocation2 + $0x3e8] sm:$0xff]  ;;  %v759_v41 = vld [vmem:[#allocation2 + $0x3f0] sm:$0xff] }
 0x2ac   :  { %4836 = vrot.lane.b32.xlu1 %v4835_v10, %s5706_s2  ;;  %4871 = vrot.lane.b32.xlu0 %v4870_v18, %s5706_s2  ;;  %v776_v18 = vld [vmem:[#allocation2 + $0xc9] sm:$0xff]  ;;  %v809_v10 = vld [vmem:[#allocation2 + $0x311] sm:$0xff] }
 0x2ad   :  { %v766_v55 = vld [vmem:[#allocation2 + $0x29] sm:$0xff]  ;;  %v803_v16 = vld [vmem:[#allocation2 + $0x2b1] sm:$0xff] }
 0x2ae   :  { %v802_v8 = vld [vmem:[#allocation2 + $0x2a9] sm:$0xff]  ;;  %v825_v61 = vld [vmem:[#allocation2 + $0x411] sm:$0xff] }
 0x2af   :  { %v6471_v11 = vld [vmem:[#allocation2 + $0x6f] sm:$0xff] }
 0x2b0   :  { %4846 = vrot.lane.b32.xlu1 %v4845_v17, %s5706_s2  ;;  %4881 = vrot.lane.b32.xlu0 %v4880_v19, %s5706_s2  ;;  %v4865_v17 = vpack.i.bf16 %v751_v29, %v750_v26  ;;  %v6413_v19 = vpack.i.bf16 %v769_v24, %v768_v31  ;;  %v4885_v24 = vpack.i.bf16 %v759_v41, %v758_v21  ;;  %v763_v26 = vld [vmem:[#allocation2 + $0x430] sm:$0xff] }
 0x2b1   :  { %v780_v29 = vld [vmem:[#allocation2 + $0x109] sm:$0xff]  ;;  %v771_v21 = vld [vmem:[#allocation2 + $0x71] sm:$0xff] }
 0x2b2   :  { %v4935_v9 = vpack.i.bf16 %v6302_v5, %v780_v29  ;;  %v789_v41 = vld [vmem:[#allocation2 + $0x191] sm:$0xff] }
 0x2b4   :  { %4856 = vrot.lane.b32.xlu1 %v4855_v35, %s5706_s2  ;;  %4891 = vrot.lane.b32.xlu0 %v4890_v36, %s5706_s2  ;;  %v777_v35 = vld [vmem:[#allocation2 + $0xd1] sm:$0xff]  ;;  %v762_v36 = vld [vmem:[#allocation2 + $0x428] sm:$0xff] }
 0x2b5   :  { %v4925_v31 = vpack.i.bf16 %v777_v35, %v776_v18  ;;  %v4895_v12 = vpack.i.bf16 %v763_v26, %v762_v36  ;;  %v4945_v18 = vpack.i.bf16 %v6308_v42, %v6304_v6  ;;  %v793_v36 = vld [vmem:[#allocation2 + $0x1d1] sm:$0xff] }
 0x2b6   :  { %v4965_v29 = vpack.i.bf16 %v793_v36, %v6306_v7  ;;  %v808_v36 = vld [vmem:[#allocation2 + $0x309] sm:$0xff] }
 0x2b8   :  { %4866 = vrot.lane.b32.xlu1 %v4865_v17, %s5706_s2  ;;  %4906 = vrot.lane.b32.xlu0 %v6413_v19, %s5707_s8  ;;  %v767_v17 = vld [vmem:[#allocation2 + $0x31] sm:$0xff] }
 0x2bc   :  { %4876 = vrot.lane.b32.xlu1 %v4875_v32, %s5706_s2  ;;  %4916 = vrot.lane.b32.xlu0 %v4915_v43, %s5707_s8  ;;  %v6426_v32 = vpack.i.bf16 %v767_v17, %v766_v55  ;;  %v770_v43 = vld [vmem:[#allocation2 + $0x69] sm:$0xff]  ;;  %v801_v17 = vld [vmem:[#allocation2 + $0x291] sm:$0xff] }
 0x2bd   :  { %v6433_v35 = vpack.i.bf16 %v771_v21, %v770_v43  ;;  %v800_v55 = vld [vmem:[#allocation2 + $0x289] sm:$0xff] }
 0x2be   :  { %v4980_v43 = vpack.i.bf16 %v801_v17, %v800_v55  ;;  %v804_v21 = vld [vmem:[#allocation2 + $0x2c9] sm:$0xff]  ;;  %v813_v55 = vld [vmem:[#allocation2 + $0x351] sm:$0xff] }
 0x2c0   :  { %4886 = vrot.lane.b32.xlu1 %v4885_v24, %s5706_s2  ;;  %4926 = vrot.lane.b32.xlu0 %v4925_v31, %s5707_s8  ;;  %v4955_v24 = vpack.i.bf16 %v789_v41, %v6310_v45  ;;  %v774_v31 = vld [vmem:[#allocation2 + $0xa9] sm:$0xff]  ;;  %v805_v41 = vld [vmem:[#allocation2 + $0x2d1] sm:$0xff] }
 0x2c1   :  { %v4920_v26 = vpack.i.bf16 %v6300_v63, %v774_v31  ;;  %v4990_v31 = vpack.i.bf16 %v805_v41, %v804_v21  ;;  %v6456_v21 = vpop.permute.xlu0 %4731  ;;  %v795_v41 = vld [vmem:[#allocation2 + $0x1f1] sm:$0xff] }
 0x2c2   :  { %8772 = vst [vmem:[#allocation6_spill] sm:$0xff] %v6456_v21  ;;  %v884_v21 = vld [vmem:[#allocation2 + $0x3e7] sm:$0xff] }
 0x2c4   :  { %4896 = vrot.lane.b32.xlu1 %v4895_v12, %s5706_s2  ;;  %4936 = vrot.lane.b32.xlu0 %v4935_v9, %s5707_s8  ;;  %v778_v12 = vld [vmem:[#allocation2 + $0xe9] sm:$0xff]  ;;  %v779_v9 = vld [vmem:[#allocation2 + $0xf1] sm:$0xff] }
 0x2c8   :  { %4901 = vrot.lane.b32.xlu1 %v6426_v32, %s5707_s8  ;;  %4946 = vrot.lane.b32.xlu0 %v4945_v18, %s5707_s8  ;;  %v4930_v18 = vpack.i.bf16 %v779_v9, %v778_v12  ;;  %v791_v12 = vld [vmem:[#allocation2 + $0x1b1] sm:$0xff]  ;;  %v812_v9 = vld [vmem:[#allocation2 + $0x349] sm:$0xff] }
 0x2c9   :  { %v4960_v17 = vpack.i.bf16 %v791_v12, %v6330_v27  ;;  %v6463_v12 = vpop.permute.xlu0 %4736 }
 0x2ca   :  { %8773 = vst [vmem:[#allocation7_spill] sm:$0xff] %v6463_v12  ;;  %v5065_v12 = vpack.i.bf16 %v6365_v59, %v6385_v40 }
 0x2cc   :  { %4911 = vrot.lane.b32.xlu1 %v6433_v35, %s5707_s8  ;;  %4956 = vrot.lane.b32.xlu0 %v4955_v24, %s5707_s8  ;;  %v4940_v24 = vpack.i.bf16 %v6318_v39, %v6316_v49 }
 0x2d0   :  { %4921 = vrot.lane.b32.xlu1 %v4920_v26, %s5707_s8  ;;  %4966 = vrot.lane.b32.xlu0 %v4965_v29, %s5707_s8  ;;  %v4950_v26 = vpack.i.bf16 %v6324_v47, %v6322_v46  ;;  %v5000_v29 = vpack.i.bf16 %v809_v10, %v808_v36 }
 0x2d4   :  { %4931 = vrot.lane.b32.xlu1 %v4930_v18, %s5707_s8  ;;  %4981 = vrot.lane.b32.xlu0 %v4980_v43, %s5707_s8  ;;  %v5010_v18 = vpack.i.bf16 %v813_v55, %v812_v9  ;;  %v6454_v43 = vld [vmem:[#allocation2 + $0x1e9] sm:$0xff] }
 0x2d5   :  { %v4970_v10 = vpack.i.bf16 %v795_v41, %v6454_v43 }
 0x2d8   :  { %4941 = vrot.lane.b32.xlu1 %v4940_v24, %s5707_s8  ;;  %4991 = vrot.lane.b32.xlu0 %v4990_v31, %s5707_s8  ;;  %v816_v24 = vld [vmem:[#allocation2 + $0x389] sm:$0xff]  ;;  %v817_v31 = vld [vmem:[#allocation2 + $0x391] sm:$0xff] }
 0x2d9   :  { %v5020_v36 = vpack.i.bf16 %v817_v31, %v816_v24  ;;  %v6467_v24 = vpop.permute.xlu0 %4741  ;;  %v806_v31 = vld [vmem:[#allocation2 + $0x2e9] sm:$0xff] }
 0x2da   :  { %8774 = vst [vmem:[#allocation8_spill] sm:$0xff] %v6467_v24  ;;  %v881_v24 = vld [vmem:[#allocation2 + $0x3af] sm:$0xff] }
 0x2dc   :  { %4951 = vrot.lane.b32.xlu1 %v4950_v26, %s5707_s8  ;;  %5001 = vrot.lane.b32.xlu0 %v5000_v29, %s5707_s8  ;;  %v798_v26 = vld [vmem:[#allocation2 + $0x269] sm:$0xff] }
 0x2dd   :  { %v820_v29 = vld [vmem:[#allocation2 + $0x3c9] sm:$0xff]  ;;  %v4975_v9 = vpack.i.bf16 %v799_v51, %v798_v26 }
 0x2de   :  { %v5030_v55 = vpack.i.bf16 %v821_v22, %v820_v29  ;;  %v810_v26 = vld [vmem:[#allocation2 + $0x329] sm:$0xff]  ;;  %v811_v29 = vld [vmem:[#allocation2 + $0x331] sm:$0xff] }
 0x2e0   :  { %4961 = vrot.lane.b32.xlu1 %v4960_v17, %s5707_s8  ;;  %5011 = vrot.lane.b32.xlu0 %v5010_v18, %s5707_s8  ;;  %v824_v17 = vld [vmem:[#allocation2 + $0x409] sm:$0xff]  ;;  %v4985_v18 = vpack.i.bf16 %v803_v16, %v802_v8  ;;  %v6475_v16 = vpop.permute.xlu0 %4746  ;;  %v5060_v8 = vpack.i.bf16 %v6471_v11, %v6345_v33 }
 0x2e1   :  { %v5040_v41 = vpack.i.bf16 %v825_v61, %v824_v17  ;;  %8775 = vst [vmem:[#allocation9_spill] sm:$0xff] %v6475_v16  ;;  %v5005_v61 = vpack.i.bf16 %v811_v29, %v810_v26 }
 0x2e4   :  { %4971 = vrot.lane.b32.xlu1 %v4970_v10, %s5707_s8  ;;  %5021 = vrot.lane.b32.xlu0 %v5020_v36, %s5707_s8  ;;  %v807_v10 = vld [vmem:[#allocation2 + $0x2f1] sm:$0xff] }
 0x2e5   :  { %v829_v36 = vld [vmem:[#allocation2 + $0x2f] sm:$0xff]  ;;  %v4995_v22 = vpack.i.bf16 %v807_v10, %v806_v31 }
 0x2e6   :  { %v5050_v51 = vpack.i.bf16 %v829_v36, %v828_v14  ;;  %v818_v31 = vld [vmem:[#allocation2 + $0x3a9] sm:$0xff]  ;;  %v819_v10 = vld [vmem:[#allocation2 + $0x3b1] sm:$0xff] }
 0x2e7   :  { %v841_v36 = vld [vmem:[#allocation2 + $0xef] sm:$0xff]  ;;  %v5025_v26 = vpack.i.bf16 %v819_v10, %v818_v31 }
 0x2e8   :  { %4976 = vrot.lane.b32.xlu1 %v4975_v9, %s5707_s8  ;;  %5031 = vrot.lane.b32.xlu0 %v5030_v55, %s5707_s8  ;;  %v814_v9 = vld [vmem:[#allocation2 + $0x369] sm:$0xff]  ;;  %v815_v55 = vld [vmem:[#allocation2 + $0x371] sm:$0xff]  ;;  %v5080_v29 = vpack.i.bf16 %v841_v36, %v6353_v60 }
 0x2e9   :  { %v826_v10 = vld [vmem:[#allocation2 + $0x429] sm:$0xff]  ;;  %v827_v36 = vld [vmem:[#allocation2 + $0x431] sm:$0xff] }
 0x2ec   :  { %4986 = vrot.lane.b32.xlu1 %v4985_v18, %s5707_s8  ;;  %5041 = vrot.lane.b32.xlu0 %v5040_v41, %s5707_s8  ;;  %v5015_v18 = vpack.i.bf16 %v815_v55, %v814_v9  ;;  %v5070_v41 = vpack.i.bf16 %v6387_v50, %v6347_v56  ;;  %v6494_v9 = vld [vmem:[#allocation2 + $0x127] sm:$0xff]  ;;  %v6496_v55 = vld [vmem:[#allocation2 + $0x12f] sm:$0xff] }
 0x2ed   :  { %8780 = vst [vmem:[#allocation14_spill] sm:$0xff] %v6494_v9  ;;  %v5090_v31 = vpack.i.bf16 %v6496_v55, %v6494_v9  ;;  %v889_v9 = vld [vmem:[#allocation2 + $0x42f] sm:$0xff] }
 0x2f0   :  { %4996 = vrot.lane.b32.xlu1 %v4995_v22, %s5707_s8  ;;  %5051 = vrot.lane.b32.xlu0 %v5050_v51, %s5708_s9 }
 0x2f4   :  { %5006 = vrot.lane.b32.xlu1 %v5005_v61, %s5707_s8  ;;  %5061 = vrot.lane.b32.xlu0 %v5060_v8, %s5708_s9  ;;  %v822_v61 = vld [vmem:[#allocation2 + $0x3e9] sm:$0xff]  ;;  %v823_v8 = vld [vmem:[#allocation2 + $0x3f1] sm:$0xff] }
 0x2f5   :  { %v5035_v2 = vpack.i.bf16 %v823_v8, %v822_v61 }
 0x2f6   :  { %v6481_v14 = vpop.permute.xlu1 %4751  ;;  %v6483_v17 = vpop.permute.xlu0 %4766 }
 0x2f7   :  { %8776 = vst [vmem:[#allocation10_spill] sm:$0xff] %v6481_v14  ;;  %8777 = vst [vmem:[#allocation11_spill] sm:$0xff] %v6483_v17  ;;  %v877_v14 = vld [vmem:[#allocation2 + $0x36f] sm:$0xff] }
 0x2f8   :  { %5016 = vrot.lane.b32.xlu1 %v5015_v18, %s5707_s8  ;;  %5071 = vrot.lane.b32.xlu0 %v5070_v41, %s5708_s9 }
 0x2fa   :  { %v6489_v22 = vpop.permute.xlu1 %4756  ;;  %v6491_v51 = vpop.permute.xlu0 %4776 }
 0x2fb   :  { %8778 = vst [vmem:[#allocation12_spill] sm:$0xff] %v6489_v22  ;;  %8779 = vst [vmem:[#allocation13_spill] sm:$0xff] %v6491_v51  ;;  %v5120_v51 = vpack.i.bf16 %v6371_v3, %v6369_v1  ;;  %v869_v22 = vld [vmem:[#allocation2 + $0x2ef] sm:$0xff] }
 0x2fc   :  { %5026 = vrot.lane.b32.xlu1 %v5025_v26, %s5707_s8  ;;  %5081 = vrot.lane.b32.xlu0 %v5080_v29, %s5708_s9  ;;  %v5045_v26 = vpack.i.bf16 %v827_v36, %v826_v10  ;;  %v5100_v29 = vpack.i.bf16 %v6351_v58, %v6349_v57  ;;  %v3135_v10 = vld [vmem:[%s8620_s3] sm:$0xff]  ;;  %v3136_v36 = vld [vmem:[%s8620_s3 + $0x8] sm:$0xff] }
 0x2fe   :  { %v6500_v18 = vpop.permute.xlu1 %4761  ;;  %v6502_v41 = vpop.permute.xlu0 %4786 }
 0x2ff   :  { %8781 = vst [vmem:[#allocation15_spill] sm:$0xff] %v6500_v18  ;;  %8782 = vst [vmem:[#allocation16_spill] sm:$0xff] %v6502_v41  ;;  %v8789_v18 = vmov 0.0|0.0   ;;  %v868_v41 = vld [vmem:[#allocation2 + $0x2e7] sm:$0xff] }
 0x300   :  { %5036 = vrot.lane.b32.xlu1 %v5035_v2, %s5707_s8  ;;  %5091 = vrot.lane.b32.xlu0 %v5090_v31, %s5708_s9  ;;  %v5055_v2 = vpack.i.bf16 %v6355_v62, %v6514_v37  ;;  %v5110_v31 = vpack.i.bf16 %v6363_v4, %v6357_v0 }
 0x302   :  { %v6508_v30 = vpop.permute.xlu1 %4771  ;;  %v6510_v28 = vpop.permute.xlu0 %4796 }
 0x303   :  { %8783 = vst [vmem:[#allocation17_spill] sm:$0xff] %v6508_v30  ;;  %8784 = vst [vmem:[#allocation18_spill] sm:$0xff] %v6510_v28  ;;  %v860_v30 = vld [vmem:[#allocation2 + $0x267] sm:$0xff]  ;;  %v865_v28 = vld [vmem:[#allocation2 + $0x2af] sm:$0xff] }
 0x304   :  { %5046 = vrot.lane.b32.xlu1 %v5045_v26, %s5707_s8  ;;  %5101 = vrot.lane.b32.xlu0 %v5100_v29, %s5708_s9  ;;  %v4634_v26 = vpack.c.bf16 %v3136_v36, %v3135_v10 }
 0x306   :  { %v6518_v61 = vpop.permute.xlu1 %4781  ;;  %v6520_v8 = vpop.permute.xlu0 %4806  ;;  %4705 = vmatpush1.bf16.msra.mxu1 %v4634_v26  ;;  %4635 = vmatpush1.bf16.msra.mxu0 %v4634_v26 }
 0x307   :  { %8785 = vst [vmem:[#allocation19_spill] sm:$0xff] %v6518_v61  ;;  %8786 = vst [vmem:[#allocation20_spill] sm:$0xff] %v6520_v8  ;;  %v861_v8 = vld [vmem:[#allocation2 + $0x26f] sm:$0xff]  ;;  %4690 = vmatprep.subr.bf16.mxu1 %v8789_v18  ;;  %4636 = vmatprep.subr.bf16.mxu0 %v8789_v18  ;;  %v864_v61 = vld [vmem:[#allocation2 + $0x2a7] sm:$0xff] }
 0x308   :  { %5056 = vrot.lane.b32.xlu1 %v5055_v2, %s5708_s9  ;;  %5111 = vrot.lane.b32.xlu0 %v5110_v31, %s5708_s9  ;;  %v3137_v2 = vld [vmem:[%s8620_s3 + $0x10] sm:$0xff]  ;;  %v3138_v31 = vld [vmem:[%s8620_s3 + $0x18] sm:$0xff]  ;;  %v5130_v17 = vpack.i.bf16 %v861_v8, %v860_v30 }
 0x309   :  { %v4637_v10 = vpack.c.bf16 %v3138_v31, %v3137_v2 }
 0x30a   :  { %v6534_v29 = vpop.permute.xlu1 %4791  ;;  %v6536_v16 = vpop.permute.xlu0 %4816 }
 0x30b   :  { %8787 = vst [vmem:[#allocation21_spill] sm:$0xff] %v6534_v29  ;;  %8788 = vst [vmem:[#allocation22_spill] sm:$0xff] %v6536_v16  ;;  %v5075_v16 = vpack.i.bf16 %v6377_v20, %v6389_v15  ;;  %v843_v29 = vld [vmem:[#allocation2 + $0x10f] sm:$0xff]  ;;  %4706 = vmatpush1.bf16.msra.mxu1 %v4637_v10  ;;  %4638 = vmatpush1.bf16.msra.mxu0 %v4637_v10  ;;  %v6573_v10 = vpack.i.bf16 %v865_v28, %v864_v61 }
 0x30c   :  { %5066 = vrot.lane.b32.xlu1 %v5065_v12, %s5708_s9  ;;  %5121 = vrot.lane.b32.xlu0 %v5120_v51, %s5708_s9  ;;  %v3139_v12 = vld [vmem:[%s8620_s3 + $0x20] sm:$0xff]  ;;  %v3140_v51 = vld [vmem:[%s8620_s3 + $0x28] sm:$0xff]  ;;  %v5085_v31 = vpack.i.bf16 %v843_v29, %v6391_v23 }
 0x30d   :  { %4691 = vmatprep.subr.bf16.mxu1 %v8789_v18  ;;  %4639 = vmatprep.subr.bf16.mxu0 %v8789_v18  ;;  %v4640_v30 = vpack.c.bf16 %v3140_v51, %v3139_v12  ;;  %8794 = vst [vmem:[#allocation27_spill] sm:$0xff] %v6573_v10  ;;  %v5150_v51 = vpack.i.bf16 %v869_v22, %v868_v41 }
 0x30e   :  { %v6552_v36 = vpop.permute.xlu1 %4801  ;;  %v6554_v26 = vpop.permute.xlu0 %4831 }
 0x30f   :  { %8790 = vst [vmem:[#allocation23_spill] sm:$0xff] %v6552_v36  ;;  %8791 = vst [vmem:[#allocation24_spill] sm:$0xff] %v6554_v26  ;;  %v6575_v26 = vld [vmem:[#allocation2 + $0x147] sm:$0xff]  ;;  %v6577_v36 = vld [vmem:[#allocation2 + $0x14f] sm:$0xff]  ;;  %4707 = vmatpush1.bf16.msra.mxu1 %v4640_v30  ;;  %4641 = vmatpush1.bf16.msra.mxu0 %v4640_v30 }
 0x310   :  { %5076 = vrot.lane.b32.xlu1 %v5075_v16, %s5708_s9  ;;  %5131 = vrot.lane.b32.xlu0 %v5130_v17, %s5708_s9  ;;  %v3141_v16 = vld [vmem:[%s8620_s3 + $0x30] sm:$0xff]  ;;  %v3142_v17 = vld [vmem:[%s8620_s3 + $0x38] sm:$0xff]  ;;  %v5095_v12 = vpack.i.bf16 %v6577_v36, %v6575_v26  ;;  %v6596_v30 = vld [vmem:[#allocation2 + $0x187] sm:$0xff] }
 0x311   :  { %4692 = vmatprep.subr.bf16.mxu1 %v8789_v18  ;;  %4642 = vmatprep.subr.bf16.mxu0 %v8789_v18  ;;  %v4643_v28 = vpack.c.bf16 %v3142_v17, %v3141_v16  ;;  %v3144_v16 = vld [vmem:[%s8620_s3 + $0x48] sm:$0xff] }
 0x312   :  { %v6568_v8 = vpop.permute.xlu1 %4811  ;;  %v6570_v2 = vpop.permute.xlu0 %4841 }
 0x313   :  { %8792 = vst [vmem:[#allocation25_spill] sm:$0xff] %v6568_v8  ;;  %8793 = vst [vmem:[#allocation26_spill] sm:$0xff] %v6570_v2  ;;  %v872_v2 = vld [vmem:[#allocation2 + $0x327] sm:$0xff]  ;;  %4708 = vmatpush1.bf16.msra.mxu1 %v4643_v28  ;;  %4644 = vmatpush1.bf16.msra.mxu0 %v4643_v28  ;;  %v873_v8 = vld [vmem:[#allocation2 + $0x32f] sm:$0xff]  ;;  %v5105_v28 = vpack.i.bf16 %v6393_v25, %v6596_v30 }
 0x314   :  { %5086 = vrot.lane.b32.xlu1 %v5085_v31, %s5708_s9  ;;  %5141 = vrot.lane.b32.xlu0 %v6573_v10, %s5708_s9  ;;  %v3143_v31 = vld [vmem:[%s8620_s3 + $0x40] sm:$0xff]  ;;  %v885_v10 = vld [vmem:[#allocation2 + $0x3ef] sm:$0xff] }
 0x315   :  { %4693 = vmatprep.subr.bf16.mxu1 %v8789_v18  ;;  %4645 = vmatprep.subr.bf16.mxu0 %v8789_v18  ;;  %v4646_v22 = vpack.c.bf16 %v3144_v16, %v3143_v31  ;;  %v5115_v16 = vpack.i.bf16 %v6397_v54, %v6395_v48 }
 0x316   :  { %v6590_v61 = vpop.permute.xlu1 %4821  ;;  %v6592_v29 = vpop.permute.xlu0 %4851 }
 0x317   :  { %8795 = vst [vmem:[#allocation28_spill] sm:$0xff] %v6590_v61  ;;  %8796 = vst [vmem:[#allocation29_spill] sm:$0xff] %v6592_v29  ;;  %v5160_v29 = vpack.i.bf16 %v873_v8, %v872_v2  ;;  %v876_v61 = vld [vmem:[#allocation2 + $0x367] sm:$0xff]  ;;  %4709 = vmatpush1.bf16.msra.mxu1 %v4646_v22  ;;  %4647 = vmatpush1.bf16.msra.mxu0 %v4646_v22 }
 0x318   :  { %5096 = vrot.lane.b32.xlu1 %v5095_v12, %s5708_s9  ;;  %5151 = vrot.lane.b32.xlu0 %v5150_v51, %s5708_s9  ;;  %v3145_v12 = vld [vmem:[%s8620_s3 + $0x50] sm:$0xff]  ;;  %v3146_v51 = vld [vmem:[%s8620_s3 + $0x58] sm:$0xff]  ;;  %v5170_v22 = vpack.i.bf16 %v877_v14, %v876_v61 }
 0x319   :  { %4694 = vmatprep.subr.bf16.mxu1 %v8789_v18  ;;  %4648 = vmatprep.subr.bf16.mxu0 %v8789_v18  ;;  %v4649_v8 = vpack.c.bf16 %v3146_v51, %v3145_v12 }
 0x31a   :  { %v6608_v41 = vpop.permute.xlu1 %4826  ;;  %v6610_v17 = vpop.permute.xlu0 %4861 }
 0x31b   :  { %8797 = vst [vmem:[#allocation30_spill] sm:$0xff] %v6608_v41  ;;  %8798 = vst [vmem:[#allocation31_spill] sm:$0xff] %v6610_v17  ;;  %v6630_v17 = vld [vmem:[#allocation2 + $0x207] sm:$0xff]  ;;  %4710 = vmatpush1.bf16.msra.mxu1 %v4649_v8  ;;  %4650 = vmatpush1.bf16.msra.mxu0 %v4649_v8 }
 0x31c   :  { %5106 = vrot.lane.b32.xlu1 %v5105_v28, %s5708_s9  ;;  %5161 = vrot.lane.b32.xlu0 %v5160_v29, %s5708_s9  ;;  %8801 = vst [vmem:[#allocation34_spill] sm:$0xff] %v6630_v17  ;;  %v880_v41 = vld [vmem:[#allocation2 + $0x3a7] sm:$0xff]  ;;  %v5125_v51 = vpack.i.bf16 %v6403_v53, %v6630_v17 }
 0x31d   :  { %4695 = vmatprep.subr.bf16.mxu1 %v8789_v18  ;;  %v3147_v29 = vld [vmem:[%s8620_s3 + $0x60] sm:$0xff]  ;;  %v3148_v28 = vld [vmem:[%s8620_s3 + $0x68] sm:$0xff]  ;;  %4651 = vmatprep.subr.bf16.mxu0 %v8789_v18  ;;  %v5180_v8 = vpack.i.bf16 %v881_v24, %v880_v41 }
 0x31e   :  { %v6624_v2 = vpop.permute.xlu1 %4836  ;;  %v6626_v31 = vpop.permute.xlu0 %4871  ;;  %v4652_v14 = vpack.c.bf16 %v3148_v28, %v3147_v29  ;;  %v888_v17 = vld [vmem:[#allocation2 + $0x427] sm:$0xff] }
 0x31f   :  { %8799 = vst [vmem:[#allocation32_spill] sm:$0xff] %v6624_v2  ;;  %8800 = vst [vmem:[#allocation33_spill] sm:$0xff] %v6626_v31  ;;  %v862_v31 = vld [vmem:[#allocation2 + $0x287] sm:$0xff]  ;;  %v863_v2 = vld [vmem:[#allocation2 + $0x28f] sm:$0xff] }
 0x320   :  { %5116 = vrot.lane.b32.xlu1 %v5115_v16, %s5708_s9  ;;  %5171 = vrot.lane.b32.xlu0 %v5170_v22, %s5708_s9  ;;  %v3149_v16 = vld [vmem:[%s8620_s3 + $0x70] sm:$0xff]  ;;  %v3150_v22 = vld [vmem:[%s8620_s3 + $0x78] sm:$0xff]  ;;  %v6662_v28 = vpack.i.bf16 %v863_v2, %v862_v31 }
 0x321   :  { %4711 = vmatpush1.bf16.msra.mxu1 %v4652_v14  ;;  %4653 = vmatpush1.bf16.msra.mxu0 %v4652_v14  ;;  %v4655_v24 = vpack.c.bf16 %v3150_v22, %v3149_v16  ;;  %v5190_v14 = vpack.i.bf16 %v885_v10, %v884_v21  ;;  %v5200_v16 = vpack.i.bf16 %v889_v9, %v888_v17  ;;  %v870_v22 = vld [vmem:[#allocation2 + $0x307] sm:$0xff] }
 0x322   :  { %v6642_v61 = vpop.permute.xlu1 %4846  ;;  %v6644_v12 = vpop.permute.xlu0 %4881  ;;  %4696 = vmatprep.subr.bf16.mxu1 %v8789_v18  ;;  %4654 = vmatprep.subr.bf16.mxu0 %v8789_v18 }
 0x323   :  { %8802 = vst [vmem:[#allocation35_spill] sm:$0xff] %v6642_v61  ;;  %8803 = vst [vmem:[#allocation36_spill] sm:$0xff] %v6644_v12  ;;  %v866_v12 = vld [vmem:[#allocation2 + $0x2c7] sm:$0xff]  ;;  %v867_v61 = vld [vmem:[#allocation2 + $0x2cf] sm:$0xff] }
 0x324   :  { %5126 = vrot.lane.b32.xlu1 %v5125_v51, %s5708_s9  ;;  %5181 = vrot.lane.b32.xlu0 %v5180_v8, %s5708_s9  ;;  %v3151_v51 = vld [vmem:[%s8620_s3 + $0x80] sm:$0xff]  ;;  %v3152_v8 = vld [vmem:[%s8620_s3 + $0x88] sm:$0xff]  ;;  %v5145_v31 = vpack.i.bf16 %v867_v61, %v866_v12 }
 0x325   :  { %4712 = vmatpush1.bf16.msra.mxu1 %v4655_v24  ;;  %4656 = vmatpush1.bf16.msra.mxu0 %v4655_v24  ;;  %v4658_v21 = vpack.c.bf16 %v3152_v8, %v3151_v51  ;;  %v871_v24 = vld [vmem:[#allocation2 + $0x30f] sm:$0xff]  ;;  %v874_v51 = vld [vmem:[#allocation2 + $0x347] sm:$0xff] }
 0x326   :  { %v6658_v41 = vpop.permute.xlu1 %4856  ;;  %v6660_v29 = vpop.permute.xlu0 %4891  ;;  %4697 = vmatprep.subr.bf16.mxu1 %v8789_v18  ;;  %4657 = vmatprep.subr.bf16.mxu0 %v8789_v18  ;;  %v5155_v12 = vpack.i.bf16 %v871_v24, %v870_v22  ;;  %v875_v8 = vld [vmem:[#allocation2 + $0x34f] sm:$0xff] }
 0x327   :  { %8804 = vst [vmem:[#allocation37_spill] sm:$0xff] %v6658_v41  ;;  %8805 = vst [vmem:[#allocation38_spill] sm:$0xff] %v6660_v29  ;;  %v3153_v29 = vld [vmem:[%s8620_s3 + $0x90] sm:$0xff]  ;;  %v5165_v24 = vpack.i.bf16 %v875_v8, %v874_v51 }
 0x328   :  { %5136 = vrot.lane.b32.xlu1 %v6662_v28, %s5708_s9  ;;  %5191 = vrot.lane.b32.xlu0 %v5190_v14, %s5708_s9  ;;  %v3154_v14 = vld [vmem:[%s8620_s3 + $0x98] sm:$0xff]  ;;  %v996_v41 = vld [vmem:[#allocation2 + $0x2e9] sm:$0xff] }
 0x329   :  { %4713 = vmatpush1.bf16.msra.mxu1 %v4658_v21  ;;  %4659 = vmatpush1.bf16.msra.mxu0 %v4658_v21  ;;  %v4661_v9 = vpack.c.bf16 %v3154_v14, %v3153_v29  ;;  %v3155_v21 = vld [vmem:[%s8620_s3 + $0xa0] sm:$0xff] }
 0x32a   :  { %v6675_v10 = vpop.permute.xlu1 %4866  ;;  %v6677_v2 = vpop.permute.xlu0 %4906  ;;  %4698 = vmatprep.subr.bf16.mxu1 %v8789_v18  ;;  %4660 = vmatprep.subr.bf16.mxu0 %v8789_v18  ;;  %v878_v14 = vld [vmem:[#allocation2 + $0x387] sm:$0xff] }
 0x32b   :  { %8806 = vst [vmem:[#allocation39_spill] sm:$0xff] %v6675_v10 }
 0x32c   :  { %5146 = vrot.lane.b32.xlu1 %v5145_v31, %s5708_s9  ;;  %5201 = vrot.lane.b32.xlu0 %v5200_v16, %s5708_s9  ;;  %v3156_v31 = vld [vmem:[%s8620_s3 + $0xa8] sm:$0xff] }
 0x32d   :  { %4714 = vmatpush1.bf16.msra.mxu1 %v4661_v9  ;;  %4662 = vmatpush1.bf16.msra.mxu0 %v4661_v9  ;;  %v4664_v29 = vpack.c.bf16 %v3156_v31, %v3155_v21  ;;  %v879_v9 = vld [vmem:[#allocation2 + $0x38f] sm:$0xff]  ;;  %v5230_v31 = vpack.i.bf16 %v6575_v26, %v6496_v55 }
 0x32e   :  { %v6689_v17 = vpop.permute.xlu1 %4876  ;;  %v6691_v61 = vpop.permute.xlu0 %4916  ;;  %4699 = vmatprep.subr.bf16.mxu1 %v8789_v18  ;;  %4663 = vmatprep.subr.bf16.mxu0 %v8789_v18  ;;  %v5175_v21 = vpack.i.bf16 %v879_v9, %v878_v14  ;;  %v886_v9 = vld [vmem:[#allocation2 + $0x407] sm:$0xff] }
 0x32f   :  { %8807 = vst [vmem:[#allocation40_spill] sm:$0xff] %v6689_v17  ;;  %8808 = vst [vmem:[#allocation41_spill] sm:$0xff] %v6691_v61  ;;  %v3157_v17 = vld [vmem:[%s8620_s3 + $0xb0] sm:$0xff] }
 0x330   :  { %5156 = vrot.lane.b32.xlu1 %v5155_v12, %s5708_s9  ;;  %5211 = vrot.lane.b32.xlu0 %v6426_v32, %s5706_s2  ;;  %v3158_v32 = vld [vmem:[%s8620_s3 + $0xb8] sm:$0xff] }
 0x331   :  { %4715 = vmatpush1.bf16.msra.mxu1 %v4664_v29  ;;  %4665 = vmatpush1.bf16.msra.mxu0 %v4664_v29  ;;  %v4667_v12 = vpack.c.bf16 %v3158_v32, %v3157_v17  ;;  %v882_v29 = vld [vmem:[#allocation2 + $0x3c7] sm:$0xff]  ;;  %v887_v32 = vld [vmem:[#allocation2 + $0x40f] sm:$0xff] }
 0x332   :  { %v6704_v16 = vpop.permute.xlu1 %4886  ;;  %v6706_v22 = vpop.permute.xlu0 %4926  ;;  %4700 = vmatprep.subr.bf16.mxu1 %v8789_v18  ;;  %4666 = vmatprep.subr.bf16.mxu0 %v8789_v18 }
 0x333   :  { %8809 = vst [vmem:[#allocation42_spill] sm:$0xff] %v6704_v16  ;;  %8810 = vst [vmem:[#allocation43_spill] sm:$0xff] %v6706_v22  ;;  %v883_v16 = vld [vmem:[#allocation2 + $0x3cf] sm:$0xff] }
 0x334   :  { %5166 = vrot.lane.b32.xlu1 %v5165_v24, %s5708_s9  ;;  %5221 = vrot.lane.b32.xlu0 %v6433_v35, %s5706_s2  ;;  %v3159_v24 = vld [vmem:[%s8620_s3 + $0xc0] sm:$0xff]  ;;  %v3160_v35 = vld [vmem:[%s8620_s3 + $0xc8] sm:$0xff]  ;;  %v5185_v14 = vpack.i.bf16 %v883_v16, %v882_v29  ;;  %v8814_v16 = vpack.i.bf16 %v6304_v6, %v6318_v39  ;;  %v8817_v39 = vpack.i.bf16 %v6281_v52, %v6271_v34  ;;  %v7058_v22 = vld [vmem:[#allocation2 + $0x311] sm:$0xff] }
 0x335   :  { %4716 = vmatpush1.bf16.msra.mxu1 %v4667_v12  ;;  %4668 = vmatpush1.bf16.msra.mxu0 %v4667_v12  ;;  %v4670_v55 = vpack.c.bf16 %v3160_v35, %v3159_v24  ;;  %v3161_v12 = vld [vmem:[%s8620_s3 + $0xd0] sm:$0xff]  ;;  %v5195_v35 = vpack.i.bf16 %v887_v32, %v886_v9  ;;  %v3164_v6 = vld [vmem:[%s8620_s3 + $0xe8] sm:$0xff]  ;;  %v8820_v34 = vpack.i.bf16 %v6283_v13, %v6277_v44 }
 0x336   :  { %v6719_v51 = vpop.permute.xlu1 %4896  ;;  %v6721_v8 = vpop.permute.xlu0 %4936  ;;  %4701 = vmatprep.subr.bf16.mxu1 %v8789_v18  ;;  %4669 = vmatprep.subr.bf16.mxu0 %v8789_v18  ;;  %v5280_v44 = vpack.i.bf16 %v6596_v30, %v6471_v11  ;;  %v1100_v13 = vld [vmem:[#allocation2 + $0x130] sm:$0xff]  ;;  %v8829_v11 = vpack.i.bf16 %v6310_v45, %v6324_v47  ;;  %v8834_v47 = vpack.i.bf16 %v6349_v57, %v6355_v62 }
 0x337   :  { %8811 = vst [vmem:[#allocation44_spill] sm:$0xff] %v6719_v51  ;;  %v891_v51 = vld [vmem:[#allocation2 + $0x44f] sm:$0xff] }
 0x338   :  { %5176 = vrot.lane.b32.xlu1 %v5175_v21, %s5708_s9  ;;  %5231 = vrot.lane.b32.xlu0 %v5230_v31, %s5707_s8  ;;  %v3162_v21 = vld [vmem:[%s8620_s3 + $0xd8] sm:$0xff] }
 0x339   :  { %4717 = vmatpush1.bf16.msra.mxu1 %v4670_v55  ;;  %4671 = vmatpush1.bf16.msra.mxu0 %v4670_v55  ;;  %v4673_v31 = vpack.c.bf16 %v3162_v21, %v3161_v12  ;;  %v890_v55 = vld [vmem:[#allocation2 + $0x447] sm:$0xff] }
 0x33a   :  { %v6735_v26 = vpop.permute.xlu1 %4901  ;;  %v6737_v17 = vpop.permute.xlu0 %4946  ;;  %4702 = vmatprep.subr.bf16.mxu1 %v8789_v18  ;;  %4672 = vmatprep.subr.bf16.mxu0 %v8789_v18  ;;  %v5205_v21 = vpack.i.bf16 %v891_v51, %v890_v55 }
 0x33b   :  { %8812 = vst [vmem:[#allocation45_spill] sm:$0xff] %v6735_v26  ;;  %8813 = vst [vmem:[#allocation46_spill] sm:$0xff] %v6737_v17  ;;  %v7128_v26 = vld [vmem:[#allocation2 + $0x389] sm:$0xff] }
 0x33c   :  { %5186 = vrot.lane.b32.xlu1 %v5185_v14, %s5708_s9  ;;  %5241 = vrot.lane.b32.xlu0 %v8814_v16, %s5706_s2  ;;  %v3163_v14 = vld [vmem:[%s8620_s3 + $0xe0] sm:$0xff]  ;;  %v3165_v16 = vld [vmem:[%s8620_s3 + $0xf0] sm:$0xff]  ;;  %8903 = vst [vmem:[#allocation108_spill] sm:$0xff] %v7128_v26 }
 0x33d   :  { %4718 = vmatpush1.bf16.msra.mxu1 %v4673_v31  ;;  %4674 = vmatpush1.bf16.msra.mxu0 %v4673_v31  ;;  %v4676_v9 = vpack.c.bf16 %v3164_v6, %v3163_v14  ;;  %v3166_v31 = vld [vmem:[%s8620_s3 + $0xf8] sm:$0xff]  ;;  %v1101_v6 = vld [vmem:[#allocation2 + $0x148] sm:$0xff] }
 0x33e   :  { %v6752_v29 = vpop.permute.xlu1 %4911  ;;  %v6754_v24 = vpop.permute.xlu0 %4956  ;;  %4703 = vmatprep.subr.bf16.mxu1 %v8789_v18  ;;  %4675 = vmatprep.subr.bf16.mxu0 %v8789_v18  ;;  %v4679_v52 = vpack.c.bf16 %v3166_v31, %v3165_v16  ;;  %v1090_v31 = vld [vmem:[#allocation2 + $0x90] sm:$0xff] }
 0x33f   :  { %8815 = vst [vmem:[#allocation47_spill] sm:$0xff] %v6752_v29  ;;  %8816 = vst [vmem:[#allocation48_spill] sm:$0xff] %v6754_v24  ;;  %v7088_v29 = vld [vmem:[#allocation2 + $0x349] sm:$0xff] }
 0x340   :  { %5196 = vrot.lane.b32.xlu1 %v5195_v35, %s5708_s9  ;;  %5251 = vrot.lane.b32.xlu0 %v8817_v39, %s5708_s9  ;;  %v8826_v39 = vpack.i.bf16 %v6316_v49, %v6302_v5  ;;  %v5245_v49 = vpack.i.bf16 %v6577_v36, %v6514_v37 }
 0x341   :  { %4719 = vmatpush1.bf16.msra.mxu1 %v4676_v9  ;;  %4677 = vmatpush1.bf16.msra.mxu0 %v4676_v9  ;;  %v1089_v9 = vld [vmem:[#allocation2 + $0x88] sm:$0xff] }
 0x342   :  { %v6769_v32 = vpop.permute.xlu1 %4921  ;;  %v6771_v12 = vpop.permute.xlu0 %4966  ;;  %4704 = vmatprep.subr.bf16.mxu1 %v8789_v18  ;;  %4678 = vmatprep.subr.bf16.mxu0 %v8789_v18  ;;  %v8823_v18 = vpack.i.bf16 %v6351_v58, %v6345_v33  ;;  %v5235_v58 = vpack.i.bf16 %v1101_v6, %v1100_v13  ;;  %v1104_v13 = vld [vmem:[#allocation2 + $0x170] sm:$0xff]  ;;  %v8837_v6 = vpack.i.bf16 %v6322_v46, %v6308_v42  ;;  %v3167_v46 = vld [vmem:[%s8620_s3 + $0x100] sm:$0xff] }
 0x343   :  { %8818 = vst [vmem:[#allocation49_spill] sm:$0xff] %v6769_v32  ;;  %8819 = vst [vmem:[#allocation50_spill] sm:$0xff] %v6771_v12  ;;  %v8841_v42 = vpack.i.bf16 %v6330_v27, %v6314_v38  ;;  %v7062_v12 = vld [vmem:[#allocation2 + $0x390] sm:$0xff] }
 0x344   :  { %5206 = vrot.lane.b32.xlu1 %v5205_v21, %s5708_s9  ;;  %5261 = vrot.lane.b32.xlu0 %v8820_v34, %s5708_s9  ;;  %v1106_v21 = vld [vmem:[#allocation2 + $0x190] sm:$0xff]  ;;  %v1107_v34 = vld [vmem:[#allocation2 + $0x1a8] sm:$0xff] }
 0x345   :  { %4720 = vmatpush1.bf16.msra.mxu1 %v4679_v52  ;;  %4680 = vmatpush1.bf16.msra.mxu0 %v4679_v52  ;;  %v5300_v16 = vpack.i.bf16 %v1106_v21, %v1089_v9  ;;  %v5310_v45 = vpack.i.bf16 %v1107_v34, %v1090_v31  ;;  %v1088_v9 = vld [vmem:[#allocation2 + $0x70] sm:$0xff]  ;;  %v1105_v21 = vld [vmem:[#allocation2 + $0x188] sm:$0xff] }
 0x346   :  { %v6786_v51 = vpop.permute.xlu1 %4931  ;;  %v6788_v35 = vpop.permute.xlu0 %4981  ;;  %v5285_v31 = vpack.i.bf16 %v1105_v21, %v1088_v9  ;;  %v1094_v9 = vld [vmem:[#allocation2 + $0xd0] sm:$0xff]  ;;  %v1111_v21 = vld [vmem:[#allocation2 + $0x1e8] sm:$0xff] }
 0x347   :  { %8821 = vst [vmem:[#allocation51_spill] sm:$0xff] %v6786_v51  ;;  %8822 = vst [vmem:[#allocation52_spill] sm:$0xff] %v6788_v35  ;;  %v7078_v32 = vld [vmem:[#allocation2 + $0x3b1] sm:$0xff] }
 0x348   :  { %5216 = vrot.lane.b32.xlu1 %v6413_v19, %s5706_s2  ;;  %5271 = vrot.lane.b32.xlu0 %v8823_v18, %s5707_s8  ;;  %8897 = vst [vmem:[#allocation104_spill] sm:$0xff] %v7078_v32 }
 0x34a   :  { %v6796_v55 = vpop.permute.xlu1 %4941  ;;  %v6798_v14 = vpop.permute.xlu0 %4991 }
 0x34b   :  { %8824 = vst [vmem:[#allocation53_spill] sm:$0xff] %v6796_v55  ;;  %8825 = vst [vmem:[#allocation54_spill] sm:$0xff] %v6798_v14  ;;  %v7040_v14 = vld [vmem:[#allocation2 + $0x36f] sm:$0xff] }
 0x34c   :  { %5226 = vrot.lane.b32.xlu1 %v8826_v39, %s5706_s2  ;;  %5281 = vrot.lane.b32.xlu0 %v5280_v44, %s5707_s8  ;;  %v1087_v44 = vld [vmem:[#allocation2 + $0x68] sm:$0xff]  ;;  %v8838_v39 = vpack.i.bf16 %v6363_v4, %v6347_v56  ;;  %v7134_v55 = vld [vmem:[#allocation2 + $0x410] sm:$0xff] }
 0x34d   :  { %v3168_v56 = vld [vmem:[%s8620_s3 + $0x108] sm:$0xff]  ;;  %8906 = vst [vmem:[#allocation111_spill] sm:$0xff] %v7134_v55 }
 0x34e   :  { %v6807_v19 = vpop.permute.xlu1 %4951  ;;  %v6809_v33 = vpop.permute.xlu0 %5001 }
 0x34f   :  { %8827 = vst [vmem:[#allocation55_spill] sm:$0xff] %v6807_v19  ;;  %8828 = vst [vmem:[#allocation56_spill] sm:$0xff] %v6809_v33  ;;  %v1063_v33 = vld [vmem:[#allocation2 + $0x327] sm:$0xff] }
 0x350   :  { %5236 = vrot.lane.b32.xlu1 %v5235_v58, %s5708_s9  ;;  %5291 = vrot.lane.b32.xlu0 %v8829_v11, %s5706_s2  ;;  %v5275_v58 = vpack.i.bf16 %v1104_v13, %v1087_v44  ;;  %v1092_v11 = vld [vmem:[#allocation2 + $0xb0] sm:$0xff]  ;;  %v8848_v44 = vpack.i.bf16 %v6397_v54, %v6389_v15  ;;  %v7092_v19 = vld [vmem:[#allocation2 + $0x3c8] sm:$0xff] }
 0x352   :  { %v6816_v30 = vpop.permute.xlu1 %4961  ;;  %v6818_v5 = vpop.permute.xlu0 %5011 }
 0x353   :  { %8830 = vst [vmem:[#allocation57_spill] sm:$0xff] %v6816_v30  ;;  %8831 = vst [vmem:[#allocation58_spill] sm:$0xff] %v6818_v5  ;;  %v1116_v5 = vld [vmem:[#allocation2 + $0x230] sm:$0xff] }
 0x354   :  { %5246 = vrot.lane.b32.xlu1 %v5245_v49, %s5707_s8  ;;  %5301 = vrot.lane.b32.xlu0 %v5300_v16, %s5708_s9  ;;  %v1109_v49 = vld [vmem:[#allocation2 + $0x1c8] sm:$0xff] }
 0x355   :  { %v5340_v34 = vpack.i.bf16 %v1109_v49, %v1092_v11  ;;  %v8851_v11 = vpack.i.bf16 %v6357_v0, %v6365_v59  ;;  %v5370_v49 = vpack.i.bf16 %v1111_v21, %v1094_v9  ;;  %v1113_v9 = vld [vmem:[#allocation2 + $0x208] sm:$0xff]  ;;  %v8860_v21 = vpack.i.bf16 %v6395_v48, %v6387_v50  ;;  %v969_v48 = vld [vmem:[#allocation2 + $0xf1] sm:$0xff] }
 0x356   :  { %v6824_v52 = vpop.permute.xlu1 %4971  ;;  %v6826_v18 = vpop.permute.xlu0 %5021  ;;  %v637_v30 = vld [vmem:[#allocation2 + $0xf] sm:$0xff] }
 0x357   :  { %8832 = vst [vmem:[#allocation59_spill] sm:$0xff] %v6824_v52  ;;  %8833 = vst [vmem:[#allocation60_spill] sm:$0xff] %v6826_v18  ;;  %v6978_v18 = vld [vmem:[#allocation2 + $0x10f] sm:$0xff] }
 0x358   :  { %5256 = vrot.lane.b32.xlu1 %v8834_v47, %s5707_s8  ;;  %5311 = vrot.lane.b32.xlu0 %v5310_v45, %s5708_s9  ;;  %v6864_v45 = vpack.c.bf16 %v3168_v56, %v3167_v46  ;;  %v8847_v47 = vpack.i.bf16 %v6393_v25, %v6385_v40  ;;  %v8852_v40 = vpack.i.bf16 %v6306_v7, %v6300_v63  ;;  %v1108_v46 = vld [vmem:[#allocation2 + $0x1b0] sm:$0xff] }
 0x359   :  { %v8857_v63 = vpack.i.bf16 %v6371_v3, %v6353_v60  ;;  %v7054_v52 = vld [vmem:[#allocation2 + $0x371] sm:$0xff] }
 0x35a   :  { %v6833_v37 = vpop.permute.xlu1 %4976  ;;  %v6835_v36 = vpop.permute.xlu0 %5031  ;;  %8844 = vst [vmem:[#allocation67_spill] sm:$0xff] %v6864_v45  ;;  %4682 = vmatprep.subr.bf16.mxu0 %v6864_v45  ;;  %v7130_v45 = vld [vmem:[#allocation2 + $0x391] sm:$0xff] }
 0x35b   :  { %8835 = vst [vmem:[#allocation61_spill] sm:$0xff] %v6833_v37  ;;  %8836 = vst [vmem:[#allocation62_spill] sm:$0xff] %v6835_v36  ;;  %v1097_v36 = vld [vmem:[#allocation2 + $0x108] sm:$0xff] }
 0x35c   :  { %5266 = vrot.lane.b32.xlu1 %v8837_v6, %s5706_s2  ;;  %5321 = vrot.lane.b32.xlu0 %v8838_v39, %s5707_s8  ;;  %v962_v39 = vld [vmem:[#allocation2 + $0x89] sm:$0xff]  ;;  %8904 = vst [vmem:[#allocation109_spill] sm:$0xff] %v7130_v45 }
 0x35e   :  { %v6845_v57 = vpop.permute.xlu1 %4986  ;;  %v6847_v62 = vpop.permute.xlu0 %5041 }
 0x35f   :  { %8839 = vst [vmem:[#allocation63_spill] sm:$0xff] %v6845_v57  ;;  %8840 = vst [vmem:[#allocation64_spill] sm:$0xff] %v6847_v62  ;;  %v968_v62 = vld [vmem:[#allocation2 + $0xe9] sm:$0xff] }
 0x360   :  { %5276 = vrot.lane.b32.xlu1 %v5275_v58, %s5708_s9  ;;  %5331 = vrot.lane.b32.xlu0 %v8841_v42, %s5706_s2  ;;  %v979_v58 = vld [vmem:[#allocation2 + $0x191] sm:$0xff]  ;;  %v1091_v42 = vld [vmem:[#allocation2 + $0xa8] sm:$0xff] }
 0x361   :  { %v5315_v54 = vpack.i.bf16 %v979_v58, %v962_v39  ;;  %v5325_v59 = vpack.i.bf16 %v1108_v46, %v1091_v42  ;;  %v981_v39 = vld [vmem:[#allocation2 + $0x1b1] sm:$0xff]  ;;  %v986_v46 = vld [vmem:[#allocation2 + $0x209] sm:$0xff] }
 0x362   :  { %v6860_v4 = vpop.permute.xlu1 %4996  ;;  %v6862_v16 = vpop.permute.xlu0 %5051  ;;  %v1096_v58 = vld [vmem:[#allocation2 + $0xf0] sm:$0xff] }
 0x363   :  { %8842 = vst [vmem:[#allocation65_spill] sm:$0xff] %v6860_v4  ;;  %8843 = vst [vmem:[#allocation66_spill] sm:$0xff] %v6862_v16  ;;  %v7020_v4 = vld [vmem:[#allocation2 + $0x329] sm:$0xff] }
 0x364   :  { %5286 = vrot.lane.b32.xlu1 %v5285_v31, %s5708_s9  ;;  %5341 = vrot.lane.b32.xlu0 %v5340_v34, %s5708_s9  ;;  %v967_v31 = vld [vmem:[#allocation2 + $0xd1] sm:$0xff]  ;;  %v7152_v16 = vld [vmem:[#allocation2 + $0x3c7] sm:$0xff] }
 0x365   :  { %8911 = vst [vmem:[#allocation116_spill] sm:$0xff] %v7152_v16 }
 0x366   :  { %v6869_v38 = vpop.permute.xlu1 %5006  ;;  %v6871_v27 = vpop.permute.xlu0 %5061 }
 0x367   :  { %8845 = vst [vmem:[#allocation68_spill] sm:$0xff] %v6869_v38  ;;  %8846 = vst [vmem:[#allocation69_spill] sm:$0xff] %v6871_v27  ;;  %v6994_v38 = vld [vmem:[#allocation2 + $0x128] sm:$0xff]  ;;  %v7094_v27 = vld [vmem:[#allocation2 + $0x3d0] sm:$0xff] }
 0x368   :  { %5296 = vrot.lane.b32.xlu1 %v8847_v47, %s5707_s8  ;;  %5351 = vrot.lane.b32.xlu0 %v8848_v44, %s5707_s8  ;;  %v5390_v47 = vpack.i.bf16 %v6454_v43, %v967_v31  ;;  %v964_v44 = vld [vmem:[#allocation2 + $0xa9] sm:$0xff]  ;;  %8886 = vst [vmem:[#allocation95_spill] sm:$0xff] %v6994_v38 }
 0x369   :  { %v5345_v3 = vpack.i.bf16 %v981_v39, %v964_v44  ;;  %v1115_v44 = vld [vmem:[#allocation2 + $0x228] sm:$0xff] }
 0x36a   :  { %v6881_v13 = vpop.permute.xlu1 %5016  ;;  %v6883_v6 = vpop.permute.xlu0 %5071  ;;  %v966_v39 = vld [vmem:[#allocation2 + $0xc9] sm:$0xff] }
 0x36b   :  { %8849 = vst [vmem:[#allocation70_spill] sm:$0xff] %v6881_v13  ;;  %8850 = vst [vmem:[#allocation71_spill] sm:$0xff] %v6883_v6  ;;  %v993_v13 = vld [vmem:[#allocation2 + $0x2b1] sm:$0xff] }
 0x36c   :  { %5306 = vrot.lane.b32.xlu1 %v8851_v11, %s5707_s8  ;;  %5361 = vrot.lane.b32.xlu0 %v8852_v40, %s5706_s2  ;;  %v5400_v40 = vpack.i.bf16 %v1113_v9, %v1096_v58  ;;  %v983_v58 = vld [vmem:[#allocation2 + $0x1d1] sm:$0xff] }
 0x36d   :  { %v6937_v9 = vld [vmem:[#allocation2 + $0x110] sm:$0xff] }
 0x36e   :  { %v6893_v15 = vpop.permute.xlu1 %5026  ;;  %v6895_v25 = vpop.permute.xlu0 %5081  ;;  %v8898_v6 = vld [vmem:[#allocation8_spill] sm:$0xff] }
 0x36f   :  { %8853 = vst [vmem:[#allocation72_spill] sm:$0xff] %v6893_v15  ;;  %8854 = vst [vmem:[#allocation73_spill] sm:$0xff] %v6895_v25  ;;  %v1114_v15 = vld [vmem:[#allocation2 + $0x210] sm:$0xff]  ;;  %v4744_v61 = vunpack.i.h.bf16 %v8898_v6 }
 0x370   :  { %5316 = vrot.lane.b32.xlu1 %v5315_v54, %s5706_s2  ;;  %5371 = vrot.lane.b32.xlu0 %v5370_v49, %s5708_s9  ;;  %v1093_v54 = vld [vmem:[#allocation2 + $0xc8] sm:$0xff]  ;;  %v1110_v49 = vld [vmem:[#allocation2 + $0x1d0] sm:$0xff] }
 0x371   :  { %v5355_v50 = vpack.i.bf16 %v1110_v49, %v1093_v54  ;;  %v1095_v54 = vld [vmem:[#allocation2 + $0xe8] sm:$0xff]  ;;  %v1112_v49 = vld [vmem:[#allocation2 + $0x1f0] sm:$0xff] }
 0x372   :  { %v6899_v56 = vpop.permute.xlu1 %5036  ;;  %v6901_v0 = vpop.permute.xlu0 %5091  ;;  %v7056_v25 = vld [vmem:[#allocation2 + $0x309] sm:$0xff] }
 0x373   :  { %8855 = vst [vmem:[#allocation74_spill] sm:$0xff] %v6899_v56  ;;  %8856 = vst [vmem:[#allocation75_spill] sm:$0xff] %v6901_v0  ;;  %v7136_v0 = vld [vmem:[#allocation2 + $0x3a8] sm:$0xff] }
 0x374   :  { %5326 = vrot.lane.b32.xlu1 %v5325_v59, %s5708_s9  ;;  %5381 = vrot.lane.b32.xlu0 %v8857_v63, %s5707_s8  ;;  %v8865_v59 = vpack.i.bf16 %v6403_v53, %v6391_v23  ;;  %v5375_v53 = vpack.i.bf16 %v983_v58, %v966_v39  ;;  %v989_v39 = vld [vmem:[#allocation2 + $0x271] sm:$0xff]  ;;  %8907 = vst [vmem:[#allocation112_spill] sm:$0xff] %v7136_v0  ;;  %v8928_v0 = vld [vmem:[#allocation10_spill] sm:$0xff] }
 0x376   :  { %v6908_v7 = vpop.permute.xlu1 %5046  ;;  %v6910_v34 = vpop.permute.xlu0 %5101 }
 0x377   :  { %8858 = vst [vmem:[#allocation76_spill] sm:$0xff] %v6908_v7  ;;  %8859 = vst [vmem:[#allocation77_spill] sm:$0xff] %v6910_v34  ;;  %v7112_v34 = vld [vmem:[#allocation2 + $0x387] sm:$0xff] }
 0x378   :  { %5336 = vrot.lane.b32.xlu1 %v8860_v21, %s5707_s8  ;;  %5391 = vrot.lane.b32.xlu0 %v5390_v47, %s5706_s2  ;;  %v5420_v47 = vpack.i.bf16 %v986_v46, %v969_v48  ;;  %v8868_v21 = vpack.i.bf16 %v6369_v1, %v6377_v20  ;;  %v5385_v20 = vpack.i.bf16 %v1112_v49, %v1095_v54  ;;  %v8873_v46 = vld [vmem:[#allocation14_spill] sm:$0xff]  ;;  %v985_v54 = vld [vmem:[#allocation2 + $0x1f1] sm:$0xff]  ;;  %v1117_v49 = vld [vmem:[#allocation2 + $0x288] sm:$0xff] }
 0x379   :  { %8899 = vst [vmem:[#allocation8_spill] sm:$0xff] %v7112_v34  ;;  %v7210_v34 = vld [vmem:[#allocation2 + $0x407] sm:$0xff] }
 0x37a   :  { %v6918_v11 = vpop.permute.xlu1 %5056  ;;  %v6920_v60 = vpop.permute.xlu0 %5111  ;;  %8923 = vst [vmem:[#allocation128_spill] sm:$0xff] %v7210_v34 }
 0x37b   :  { %8861 = vst [vmem:[#allocation78_spill] sm:$0xff] %v6918_v11  ;;  %8862 = vst [vmem:[#allocation79_spill] sm:$0xff] %v6920_v60  ;;  %v4743_v60 = vunpack.i.l.bf16 %v8898_v6 }
 0x37c   :  { %5346 = vrot.lane.b32.xlu1 %v5345_v3, %s5706_s2  ;;  %5401 = vrot.lane.b32.xlu0 %v5400_v40, %s5708_s9  ;;  %v5430_v40 = vpack.i.bf16 %v1115_v44, %v6937_v9 }
 0x37e   :  { %v6924_v43 = vpop.permute.xlu1 %5066  ;;  %v6926_v42 = vpop.permute.xlu0 %5121 }
 0x37f   :  { %8863 = vst [vmem:[#allocation80_spill] sm:$0xff] %v6924_v43  ;;  %8864 = vst [vmem:[#allocation81_spill] sm:$0xff] %v6926_v42  ;;  %v7060_v42 = vld [vmem:[#allocation2 + $0x388] sm:$0xff] }
 0x380   :  { %5356 = vrot.lane.b32.xlu1 %v5355_v50, %s5708_s9  ;;  %5411 = vrot.lane.b32.xlu0 %v8865_v59, %s5707_s8  ;;  %v1052_v50 = vld [vmem:[#allocation2 + $0x22f] sm:$0xff] }
 0x381   :  { %v5440_v59 = vpack.i.bf16 %v1052_v50, %v8873_v46  ;;  %v1118_v50 = vld [vmem:[#allocation2 + $0x290] sm:$0xff] }
 0x382   :  { %v6933_v31 = vpop.permute.xlu1 %5076  ;;  %v6935_v63 = vpop.permute.xlu0 %5131  ;;  %v5460_v56 = vpack.i.bf16 %v1118_v50, %v1117_v49 }
 0x383   :  { %8866 = vst [vmem:[#allocation82_spill] sm:$0xff] %v6933_v31  ;;  %8867 = vst [vmem:[#allocation83_spill] sm:$0xff] %v6935_v63  ;;  %v7064_v31 = vld [vmem:[#allocation2 + $0x328] sm:$0xff] }
 0x384   :  { %5366 = vrot.lane.b32.xlu1 %v8868_v21, %s5707_s8  ;;  %5421 = vrot.lane.b32.xlu0 %v5420_v47, %s5706_s2  ;;  %v6956_v47 = vld [vmem:[#allocation2 + $0xef] sm:$0xff]  ;;  %8893 = vst [vmem:[#allocation100_spill] sm:$0xff] %v7064_v31 }
 0x385   :  { %v988_v21 = vld [vmem:[#allocation2 + $0x269] sm:$0xff] }
 0x386   :  { %v6944_v3 = vpop.permute.xlu1 %5086  ;;  %v6946_v23 = vpop.permute.xlu0 %5141  ;;  %v5450_v7 = vpack.i.bf16 %v989_v39, %v988_v21  ;;  %v7164_v31 = vld [vmem:[#allocation2 + $0x429] sm:$0xff] }
 0x387   :  { %8869 = vst [vmem:[#allocation84_spill] sm:$0xff] %v6944_v3  ;;  %8870 = vst [vmem:[#allocation85_spill] sm:$0xff] %v6946_v23 }
 0x388   :  { %5376 = vrot.lane.b32.xlu1 %v5375_v53, %s5706_s2  ;;  %5431 = vrot.lane.b32.xlu0 %v5430_v40, %s5708_s9  ;;  %v8876_v53 = vld [vmem:[#allocation34_spill] sm:$0xff]  ;;  %8913 = vst [vmem:[#allocation118_spill] sm:$0xff] %v7164_v31  ;;  %v7238_v31 = vld [vmem:[#allocation2 + $0x44f] sm:$0xff] }
 0x389   :  { %v5395_v40 = vpack.i.bf16 %v8876_v53, %v6956_v47  ;;  %v5415_v53 = vpack.i.bf16 %v1114_v15, %v1097_v36  ;;  %v1121_v36 = vld [vmem:[#allocation2 + $0x2c8] sm:$0xff]  ;;  %v1122_v15 = vld [vmem:[#allocation2 + $0x2d0] sm:$0xff]  ;;  %8930 = vst [vmem:[#allocation133_spill] sm:$0xff] %v7238_v31 }
 0x38a   :  { %v6951_v48 = vpop.permute.xlu1 %5096  ;;  %v6953_v1 = vpop.permute.xlu0 %5151 }
 0x38b   :  { %8871 = vst [vmem:[#allocation86_spill] sm:$0xff] %v6951_v48  ;;  %8872 = vst [vmem:[#allocation87_spill] sm:$0xff] %v6953_v1  ;;  %v7022_v1 = vld [vmem:[#allocation2 + $0x331] sm:$0xff]  ;;  %v7132_v48 = vld [vmem:[#allocation2 + $0x408] sm:$0xff] }
 0x38c   :  { %5386 = vrot.lane.b32.xlu1 %v5385_v20, %s5708_s9  ;;  %5441 = vrot.lane.b32.xlu0 %v5440_v59, %s5707_s8  ;;  %v5405_v59 = vpack.i.bf16 %v985_v54, %v968_v62  ;;  %v8881_v62 = vld [vmem:[#allocation27_spill] sm:$0xff]  ;;  %v5540_v43 = vpack.i.bf16 %v7022_v1, %v7020_v4  ;;  %8905 = vst [vmem:[#allocation110_spill] sm:$0xff] %v7132_v48 }
 0x38d   :  { %v7104_v1 = vld [vmem:[#allocation2 + $0x368] sm:$0xff] }
 0x38e   :  { %v6960_v44 = vpop.permute.xlu1 %5106  ;;  %v6962_v58 = vpop.permute.xlu0 %5161  ;;  %v7178_v4 = vld [vmem:[#allocation2 + $0x3c9] sm:$0xff] }
 0x38f   :  { %8874 = vst [vmem:[#allocation14_spill] sm:$0xff] %v6960_v44  ;;  %8875 = vst [vmem:[#allocation88_spill] sm:$0xff] %v6962_v58  ;;  %v1126_v58 = vld [vmem:[#allocation2 + $0x310] sm:$0xff] }
 0x390   :  { %5396 = vrot.lane.b32.xlu1 %v5395_v40, %s5707_s8  ;;  %5451 = vrot.lane.b32.xlu0 %v5450_v7, %s5706_s2  ;;  %v1051_v40 = vld [vmem:[#allocation2 + $0x227] sm:$0xff]  ;;  %v7090_v44 = vld [vmem:[#allocation2 + $0x351] sm:$0xff]  ;;  %8916 = vst [vmem:[#allocation121_spill] sm:$0xff] %v7178_v4 }
 0x391   :  { %v992_v7 = vld [vmem:[#allocation2 + $0x2a9] sm:$0xff] }
 0x392   :  { %v6968_v46 = vpop.permute.xlu1 %5116  ;;  %v6970_v20 = vpop.permute.xlu0 %5171  ;;  %v5480_v50 = vpack.i.bf16 %v993_v13, %v992_v7 }
 0x393   :  { %8877 = vst [vmem:[#allocation34_spill] sm:$0xff] %v6968_v46  ;;  %8878 = vst [vmem:[#allocation89_spill] sm:$0xff] %v6970_v20  ;;  %v5490_v20 = vpack.i.bf16 %v1122_v15, %v1121_v36  ;;  %v990_v15 = vld [vmem:[#allocation2 + $0x289] sm:$0xff] }
 0x394   :  { %5406 = vrot.lane.b32.xlu1 %v5405_v59, %s5706_s2  ;;  %5461 = vrot.lane.b32.xlu0 %v5460_v56, %s5708_s9  ;;  %v5425_v56 = vpack.i.bf16 %v1051_v40, %v6978_v18  ;;  %v970_v59 = vld [vmem:[#allocation2 + $0x109] sm:$0xff] }
 0x395   :  { %v1060_v40 = vld [vmem:[#allocation2 + $0x2ef] sm:$0xff]  ;;  %v636_v46 = vld [vmem:[#allocation2 + $0x7] sm:$0xff] }
 0x396   :  { %v6974_v21 = vpop.permute.xlu1 %5126  ;;  %v6976_v39 = vpop.permute.xlu0 %5181 }
 0x397   :  { %8879 = vst [vmem:[#allocation90_spill] sm:$0xff] %v6974_v21  ;;  %8880 = vst [vmem:[#allocation91_spill] sm:$0xff] %v6976_v39  ;;  %v987_v39 = vld [vmem:[#allocation2 + $0x211] sm:$0xff]  ;;  %v7052_v21 = vld [vmem:[#allocation2 + $0x369] sm:$0xff] }
 0x398   :  { %5416 = vrot.lane.b32.xlu1 %v5415_v53, %s5708_s9  ;;  %5471 = vrot.lane.b32.xlu0 %v8881_v62, %s5707_s8  ;;  %v5435_v62 = vpack.i.bf16 %v987_v39, %v970_v59 }
 0x39a   :  { %v6983_v54 = vpop.permute.xlu1 %5136  ;;  %v6985_v49 = vpop.permute.xlu0 %5191 }
 0x39b   :  { %8882 = vst [vmem:[#allocation27_spill] sm:$0xff] %v6983_v54  ;;  %8883 = vst [vmem:[#allocation92_spill] sm:$0xff] %v6985_v49  ;;  %v1059_v49 = vld [vmem:[#allocation2 + $0x2e7] sm:$0xff] }
 0x39c   :  { %5426 = vrot.lane.b32.xlu1 %v5425_v56, %s5707_s8  ;;  %5481 = vrot.lane.b32.xlu0 %v5480_v50, %s5706_s2  ;;  %v5445_v56 = vpack.i.bf16 %v1116_v5, %v6994_v38  ;;  %v5500_v50 = vpack.i.bf16 %v1060_v40, %v1059_v49  ;;  %v1119_v5 = vld [vmem:[#allocation2 + $0x2a8] sm:$0xff] }
 0x39e   :  { %v6990_v10 = vpop.permute.xlu1 %5146  ;;  %v6992_v53 = vpop.permute.xlu0 %5201 }
 0x39f   :  { %8884 = vst [vmem:[#allocation93_spill] sm:$0xff] %v6990_v10  ;;  %8885 = vst [vmem:[#allocation94_spill] sm:$0xff] %v6992_v53  ;;  %v997_v53 = vld [vmem:[#allocation2 + $0x2f1] sm:$0xff]  ;;  %v7042_v10 = vld [vmem:[#allocation2 + $0x307] sm:$0xff] }
 0x3a0   :  { %5436 = vrot.lane.b32.xlu1 %v5435_v62, %s5706_s2  ;;  %5491 = vrot.lane.b32.xlu0 %v5490_v20, %s5708_s9  ;;  %v5510_v36 = vpack.i.bf16 %v997_v53, %v996_v41  ;;  %v991_v20 = vld [vmem:[#allocation2 + $0x291] sm:$0xff]  ;;  %v1125_v62 = vld [vmem:[#allocation2 + $0x308] sm:$0xff] }
 0x3a1   :  { %v7016_v41 = vld [vmem:[#allocation2 + $0x2c7] sm:$0xff]  ;;  %v7018_v53 = vld [vmem:[#allocation2 + $0x2cf] sm:$0xff] }
 0x3a2   :  { %v6998_v13 = vpop.permute.xlu1 %5156  ;;  %v7000_v7 = vpop.permute.xlu0 %5211  ;;  %v5485_v24 = vpack.i.bf16 %v7018_v53, %v7016_v41  ;;  %v7106_v41 = vld [vmem:[#allocation2 + $0x370] sm:$0xff]  ;;  %v7108_v53 = vld [vmem:[#allocation2 + $0x3e7] sm:$0xff] }
 0x3a3   :  { %8887 = vst [vmem:[#allocation96_spill] sm:$0xff] %v6998_v13  ;;  %v1064_v13 = vld [vmem:[#allocation2 + $0x32f] sm:$0xff] }
 0x3a4   :  { %5446 = vrot.lane.b32.xlu1 %v5445_v56, %s5708_s9  ;;  %5501 = vrot.lane.b32.xlu0 %v5500_v50, %s5707_s8  ;;  %v5465_v56 = vpack.i.bf16 %v991_v20, %v990_v15  ;;  %v5520_v50 = vpack.i.bf16 %v1126_v58, %v1125_v62  ;;  %v7030_v58 = vld [vmem:[#allocation2 + $0x348] sm:$0xff]  ;;  %v7032_v15 = vld [vmem:[#allocation2 + $0x350] sm:$0xff]  ;;  %v5530_v63 = vpack.i.bf16 %v1064_v13, %v1063_v33 }
 0x3a5   :  { %v7034_v20 = vld [vmem:[#allocation2 + $0x2e8] sm:$0xff]  ;;  %v7036_v62 = vld [vmem:[#allocation2 + $0x2f0] sm:$0xff] }
 0x3a6   :  { %v7005_v39 = vpop.permute.xlu1 %5166  ;;  %v7007_v59 = vpop.permute.xlu0 %5221  ;;  %v7072_v33 = vld [vmem:[#allocation2 + $0x347] sm:$0xff]  ;;  %v7074_v13 = vld [vmem:[#allocation2 + $0x34f] sm:$0xff] }
 0x3a7   :  { %8888 = vst [vmem:[#allocation97_spill] sm:$0xff] %v7005_v39  ;;  %8889 = vst [vmem:[#allocation98_spill] sm:$0xff] %v7007_v59  ;;  %v1120_v39 = vld [vmem:[#allocation2 + $0x2b0] sm:$0xff] }
 0x3a8   :  { %5456 = vrot.lane.b32.xlu1 %v6662_v28, %s5707_s8  ;;  %5511 = vrot.lane.b32.xlu0 %v5510_v36, %s5706_s2  ;;  %v7026_v28 = vld [vmem:[#allocation2 + $0x2c9] sm:$0xff]  ;;  %v7028_v36 = vld [vmem:[#allocation2 + $0x2d1] sm:$0xff]  ;;  %v5475_v37 = vpack.i.bf16 %v1120_v39, %v1119_v5  ;;  %8895 = vst [vmem:[#allocation102_spill] sm:$0xff] %v7072_v33 }
 0x3a9   :  { %v7070_v39 = vld [vmem:[#allocation2 + $0x3af] sm:$0xff]  ;;  %v5495_v6 = vpack.i.bf16 %v7028_v36, %v7026_v28 }
 0x3aa   :  { %v7012_v49 = vpop.permute.xlu1 %5176  ;;  %v7014_v40 = vpop.permute.xlu0 %5231  ;;  %v7076_v5 = vld [vmem:[#allocation2 + $0x3a9] sm:$0xff] }
 0x3ab   :  { %8890 = vst [vmem:[#allocation99_spill] sm:$0xff] %v7012_v49  ;;  %v7038_v49 = vld [vmem:[#allocation2 + $0x367] sm:$0xff]  ;;  %8896 = vst [vmem:[#allocation103_spill] sm:$0xff] %v7076_v5  ;;  %v7110_v59 = vld [vmem:[#allocation2 + $0x3ef] sm:$0xff] }
 0x3ac   :  { %5466 = vrot.lane.b32.xlu1 %v5465_v56, %s5706_s2  ;;  %5521 = vrot.lane.b32.xlu0 %v5520_v50, %s5708_s9  ;;  %v7044_v56 = vld [vmem:[#allocation2 + $0x30f] sm:$0xff]  ;;  %v8891_v50 = vld [vmem:[#allocation6_spill] sm:$0xff] }
 0x3ad   :  { %v4734_v57 = vunpack.i.h.bf16 %v8891_v50  ;;  %v4733_v23 = vunpack.i.l.bf16 %v8891_v50  ;;  %v7066_v50 = vld [vmem:[#allocation2 + $0x330] sm:$0xff]  ;;  %v7182_v5 = vld [vmem:[#allocation2 + $0x448] sm:$0xff] }
 0x3ae   :  { %v7048_v35 = vpop.permute.xlu1 %5186  ;;  %v7050_v54 = vpop.permute.xlu0 %5241  ;;  %8894 = vst [vmem:[#allocation101_spill] sm:$0xff] %v7066_v50  ;;  %v7114_v28 = vld [vmem:[#allocation2 + $0x38f] sm:$0xff]  ;;  %8918 = vst [vmem:[#allocation123_spill] sm:$0xff] %v7182_v5 }
 0x3af   :  { %8892 = vst [vmem:[#allocation6_spill] sm:$0xff] %v7048_v35  ;;  %v7068_v35 = vld [vmem:[#allocation2 + $0x3a7] sm:$0xff]  ;;  %v2749_v11 = vsel %vm129_vm1, %v636_v46, %v4733_v23  ;;  %v2750_v17 = vsel %vm129_vm1, %v637_v30, %v4734_v57  ;;  %v7162_v57 = vld [vmem:[#allocation2 + $0x3cf] sm:$0xff] }
 0x3b0   :  { %5476 = vrot.lane.b32.xlu1 %v5475_v37, %s5708_s9  ;;  %5531 = vrot.lane.b32.xlu0 %v5530_v63, %s5707_s8  ;;  %v5550_v37 = vpack.i.bf16 %v7032_v15, %v7030_v58  ;;  %v7116_v36 = vld [vmem:[#allocation2 + $0x3e9] sm:$0xff]  ;;  %v7118_v58 = vld [vmem:[#allocation2 + $0x3f1] sm:$0xff]  ;;  %8912 = vst [vmem:[#allocation117_spill] sm:$0xff] %v7162_v57  ;;  %v7169_v38 = vsel %vm2813_vm9, %v2749_v11, %v4743_v60 }
 0x3b1   :  { %8900 = vst [vmem:[#allocation105_spill] sm:$0xff] %v7116_v36  ;;  %v7148_v46 = vld [vmem:[#allocation2 + $0x427] sm:$0xff]  ;;  %v7166_v50 = vld [vmem:[#allocation2 + $0x431] sm:$0xff]  ;;  %v7176_v23 = vsel %vm2813_vm9, %v2750_v17, %v4744_v61 }
 0x3b2   :  { %v7120_v15 = vpop.permute.xlu1 %5196  ;;  %v7122_v63 = vpop.permute.xlu0 %5251  ;;  %8909 = vst [vmem:[#allocation114_spill] sm:$0xff] %v7148_v46  ;;  %8914 = vst [vmem:[#allocation119_spill] sm:$0xff] %v7166_v50  ;;  %v7180_v30 = vld [vmem:[#allocation2 + $0x3d1] sm:$0xff]  ;;  %v7214_v36 = vld [vmem:[#allocation2 + $0x409] sm:$0xff] }
 0x3b3   :  { %8901 = vst [vmem:[#allocation106_spill] sm:$0xff] %v7120_v15  ;;  %8902 = vst [vmem:[#allocation107_spill] sm:$0xff] %v7122_v63  ;;  %v7138_v15 = vld [vmem:[#allocation2 + $0x3b0] sm:$0xff]  ;;  %v7226_v46 = vld [vmem:[#allocation2 + $0x428] sm:$0xff] }
 0x3b4   :  { %8908 = vst [vmem:[#allocation113_spill] sm:$0xff] %v7138_v15  ;;  %v7150_v63 = vld [vmem:[#allocation2 + $0x42f] sm:$0xff]  ;;  %5486 = vrot.lane.b32.xlu1 %v5485_v24, %s5707_s8  ;;  %5541 = vrot.lane.b32.xlu0 %v5540_v43, %s5706_s2  ;;  %8915 = vst [vmem:[#allocation120_spill] sm:$0xff] %v7176_v23  ;;  %v4754_v15 = vunpack.i.h.bf16 %v8928_v0  ;;  %v7236_v11 = vld [vmem:[#allocation2 + $0x447] sm:$0xff] }
 0x3b5   :  { %8910 = vst [vmem:[#allocation115_spill] sm:$0xff] %v7150_v63  ;;  %8917 = vst [vmem:[#allocation122_spill] sm:$0xff] %v7180_v30  ;;  %v7196_v43 = vld [vmem:[#allocation2 + $0x450] sm:$0xff]  ;;  %v7198_v24 = vld [vmem:[#allocation2 + $0x3e8] sm:$0xff] }
 0x3b6   :  { %v7184_v32 = vpop.permute.xlu1 %5206  ;;  %v7186_v33 = vpop.permute.xlu0 %5261  ;;  %8920 = vst [vmem:[#allocation125_spill] sm:$0xff] %v7196_v43  ;;  %8921 = vst [vmem:[#allocation126_spill] sm:$0xff] %v7198_v24  ;;  %v7200_v23 = vld [vmem:[#allocation2 + $0x3f0] sm:$0xff]  ;;  %v8934_v43 = vld [vmem:[#allocation19_spill] sm:$0xff] }
 0x3b7   :  { %8919 = vst [vmem:[#allocation124_spill] sm:$0xff] %v7184_v32  ;;  %8922 = vst [vmem:[#allocation127_spill] sm:$0xff] %v7200_v23  ;;  %v7212_v17 = vld [vmem:[#allocation2 + $0x40f] sm:$0xff]  ;;  %v4784_v55 = vunpack.i.h.bf16 %v8934_v43  ;;  %v638_v24 = vld [vmem:[#allocation2 + $0x27] sm:$0xff] }
 0x3b8   :  { %8924 = vst [vmem:[#allocation129_spill] sm:$0xff] %v7214_v36  ;;  %5496 = vrot.lane.b32.xlu1 %v5495_v6, %s5706_s2  ;;  %5551 = vrot.lane.b32.xlu0 %v5550_v37, %s5708_s9  ;;  %v7224_v61 = vld [vmem:[#allocation2 + $0x411] sm:$0xff]  ;;  %8926 = vst [vmem:[#allocation131_spill] sm:$0xff] %v7226_v46  ;;  %v4753_v6 = vunpack.i.l.bf16 %v8928_v0  ;;  %v8933_v37 = vld [vmem:[#allocation18_spill] sm:$0xff]  ;;  %v8936_v0 = vpack.i.bf16 %v7036_v62, %v7034_v20 }
 0x3b9   :  { %8925 = vst [vmem:[#allocation130_spill] sm:$0xff] %v7224_v61  ;;  %v7228_v63 = vld [vmem:[#allocation2 + $0x430] sm:$0xff]  ;;  %8929 = vst [vmem:[#allocation10_spill] sm:$0xff] %v7236_v11  ;;  %v4799_v5 = vunpack.i.h.bf16 %v8933_v37  ;;  %v4798_v32 = vunpack.i.l.bf16 %v8933_v37  ;;  %v8937_v37 = vpack.i.bf16 %v7040_v14, %v7038_v49  ;;  %v8938_v43 = vld [vmem:[#allocation11_spill] sm:$0xff] }
 0x3ba   :  { %8927 = vst [vmem:[#allocation132_spill] sm:$0xff] %v7228_v63  ;;  %v8931_v60 = vld [vmem:[#allocation12_spill] sm:$0xff]  ;;  %v7243_v57 = vpop.permute.xlu1 %5216  ;;  %v7245_v48 = vpop.permute.xlu0 %5271  ;;  %v7271_v61 = vsel %vm129_vm1, %v638_v24, %v4753_v6  ;;  %v640_v62 = vld [vmem:[#allocation2 + $0x47] sm:$0xff] }
 0x3bb   :  { %v4758_v4 = vunpack.i.l.bf16 %v8931_v60  ;;  %v8932_v30 = vld [vmem:[#allocation16_spill] sm:$0xff]  ;;  %v656_v46 = vld [vmem:[#allocation2 + $0x147] sm:$0xff] }
 0x3bc   :  { %v4789_v50 = vunpack.i.h.bf16 %v8932_v30  ;;  %v4788_v16 = vunpack.i.l.bf16 %v8932_v30  ;;  %v8935_v30 = vld [vmem:[#allocation21_spill] sm:$0xff]  ;;  %5506 = vrot.lane.b32.xlu1 %v8936_v0, %s5708_s9  ;;  %5561 = vrot.lane.b32.xlu0 %v8937_v37, %s5707_s8  ;;  %v639_v36 = vld [vmem:[#allocation2 + $0x2f] sm:$0xff]  ;;  %v654_v6 = vld [vmem:[#allocation2 + $0x127] sm:$0xff]  ;;  %v7289_v14 = vsel %vm129_vm1, %v656_v46, %v4798_v32 }
 0x3bd   :  { %v4794_v26 = vunpack.i.h.bf16 %v8935_v30  ;;  %v4793_v45 = vunpack.i.l.bf16 %v8935_v30  ;;  %v652_v30 = vld [vmem:[#allocation2 + $0x107] sm:$0xff]  ;;  %v7274_v20 = vsel %vm129_vm1, %v639_v36, %v4754_v15  ;;  %v7285_v63 = vsel %vm129_vm1, %v640_v62, %v4758_v4  ;;  %v657_v24 = vld [vmem:[#allocation2 + $0x14f] sm:$0xff] }
 0x3be   :  { %v8939_v0 = vld [vmem:[#allocation15_spill] sm:$0xff]  ;;  %v5227_v49 = vpop.permute.xlu1 %5226  ;;  %v7277_v37 = vpop.permute.xlu0 %5281  ;;  %v2765_v34 = vsel %vm129_vm1, %v652_v30, %v4788_v16  ;;  %v7282_v23 = vsel %vm129_vm1, %v6978_v18, %v4789_v50  ;;  %v4938_v36 = vunpack.i.l.bf16 %v6721_v8  ;;  %v7292_v31 = vsel %vm129_vm1, %v657_v24, %v4799_v5  ;;  %v8946_v30 = vld [vmem:[#allocation66_spill] sm:$0xff] }
 0x3bf   :  { %v5228_v15 = vunpack.i.l.bf16 %v5227_v49  ;;  %v655_v11 = vld [vmem:[#allocation2 + $0x12f] sm:$0xff]  ;;  %v5229_v16 = vunpack.i.h.bf16 %v5227_v49  ;;  %v8940_v18 = vpack.i.bf16 %v7044_v56, %v7042_v10  ;;  %v8941_v50 = vpack.i.bf16 %v7054_v52, %v7052_v21 }
 0x3c0   :  { %v2764_v4 = vsel %vm129_vm1, %v6956_v47, %v4784_v55  ;;  %v7305_v32 = vsel %vm129_vm1, %v654_v6, %v4793_v45  ;;  %v7308_v5 = vsel %vm129_vm1, %v655_v11, %v4794_v26  ;;  %v8942_v46 = vld [vmem:[#allocation23_spill] sm:$0xff]  ;;  %v4934_v10 = vunpack.i.h.bf16 %v6786_v51  ;;  %v8950_v51 = vld [vmem:[#allocation100_spill] sm:$0xff] }
 0x3c1   :  { %5516 = vrot.lane.b32.xlu1 %v8940_v18, %s5707_s8  ;;  %5571 = vrot.lane.b32.xlu0 %v8941_v50, %s5706_s2  ;;  %v2958_v56 = vsel %vm129_vm1, %v6937_v9, %v5228_v15  ;;  %v5089_v21 = vunpack.i.h.bf16 %v6944_v3  ;;  %v5213_v55 = vunpack.i.l.bf16 %v7000_v7  ;;  %v5233_v45 = vunpack.i.l.bf16 %v7014_v40 }
 0x3c2   :  { %v5237_v47 = vpop.permute.xlu1 %5236  ;;  %v7319_v26 = vpop.permute.xlu0 %5291  ;;  %v4939_v11 = vunpack.i.h.bf16 %v6721_v8  ;;  %v2830_v24 = vsel %vm2813_vm9, %v2765_v34, %v4938_v36  ;;  %v5243_v6 = vunpack.i.l.bf16 %v7050_v54  ;;  %v8943_v15 = vpack.i.bf16 %v7058_v22, %v7056_v25  ;;  %v8945_v8 = vld [vmem:[#allocation95_spill] sm:$0xff] }
 0x3c3   :  { %v5238_v49 = vunpack.i.l.bf16 %v5237_v47  ;;  %v5239_v9 = vunpack.i.h.bf16 %v5237_v47  ;;  %v8944_v18 = vpack.i.bf16 %v7062_v12, %v7060_v42  ;;  %v3022_v50 = vsel %vm2813_vm9, %v2958_v56, %v5233_v45  ;;  %v892_v22 = vld [vmem:[#allocation2 + $0x28] sm:$0xff] }
 0x3c4   :  { %v2959_v62 = vsel %vm129_vm1, %v8945_v8, %v5229_v16  ;;  %v5053_v34 = vunpack.i.l.bf16 %v8946_v30  ;;  %v5234_v36 = vunpack.i.h.bf16 %v7014_v40  ;;  %v2829_v52 = vsel %vm2813_vm9, %v2764_v4, %v4934_v10  ;;  %v8947_v25 = vld [vmem:[#allocation75_spill] sm:$0xff]  ;;  %v909_v10 = vld [vmem:[#allocation2 + $0x130] sm:$0xff]  ;;  %v8949_v8 = vld [vmem:[#allocation101_spill] sm:$0xff] }
 0x3c5   :  { %5526 = vrot.lane.b32.xlu1 %v8943_v15, %s5706_s2  ;;  %5581 = vrot.lane.b32.xlu0 %v8944_v18, %s5708_s9  ;;  %v3086_v47 = vsel %vm2878_vm10, %v3022_v50, %v5238_v49  ;;  %v5093_v15 = vunpack.i.l.bf16 %v8947_v25  ;;  %v5214_v3 = vunpack.i.h.bf16 %v7000_v7  ;;  %v2894_v56 = vsel %vm2878_vm10, %v2829_v52, %v5089_v21  ;;  %v8948_v49 = vld [vmem:[#allocation107_spill] sm:$0xff] }
 0x3c6   :  { %v5247_v12 = vpop.permute.xlu1 %5246  ;;  %v7341_v42 = vpop.permute.xlu0 %5301  ;;  %3509 = vmatprep.mubr.f32.mxu1 %v3086_v47  ;;  %v2943_v16 = vsel %vm129_vm1, %v892_v22, %v5213_v55  ;;  %v5244_v45 = vunpack.i.h.bf16 %v7050_v54  ;;  %v3023_v4 = vsel %vm2813_vm9, %v2959_v62, %v5234_v36  ;;  %v5254_v50 = vunpack.i.h.bf16 %v8948_v49  ;;  %v8953_v22 = vld [vmem:[#allocation53_spill] sm:$0xff] }
 0x3c7   :  { %v5249_v40 = vunpack.i.h.bf16 %v5247_v12  ;;  %v5248_v18 = vunpack.i.l.bf16 %v5247_v12  ;;  %3510 = vmatmul.mubr.f32.vlgmr.msra.gmra.mrb[2].mxu1 %v2894_v56  ;;  %v5253_v7 = vunpack.i.l.bf16 %v8948_v49  ;;  %v8951_v47 = vpack.i.bf16 %v8949_v8, %v8950_v51 }
 0x3c8   :  { %v8952_v52 = vpack.i.bf16 %v7070_v39, %v7068_v35  ;;  %v3087_v54 = vsel %vm2878_vm10, %v3023_v4, %v5239_v9  ;;  %v2960_v21 = vsel %vm129_vm1, %v909_v10, %v5243_v6  ;;  %v5094_v62 = vunpack.i.h.bf16 %v8947_v25  ;;  %v893_v9 = vld [vmem:[#allocation2 + $0x30] sm:$0xff]  ;;  %v8954_v4 = vld [vmem:[#allocation102_spill] sm:$0xff] }
 0x3c9   :  { %5536 = vrot.lane.b32.xlu1 %v8951_v47, %s5708_s9  ;;  %3514 = vmatprep.mubr.f32.mxu1 %v3087_v54  ;;  %v3007_v55 = vsel %vm2813_vm9, %v2943_v16, %v5248_v18  ;;  %v3024_v36 = vsel %vm2813_vm9, %v2960_v21, %v5249_v40  ;;  %v2831_v51 = vsel %vm2813_vm9, %v7282_v23, %v4939_v11  ;;  %v4943_v12 = vunpack.i.l.bf16 %v8953_v22  ;;  %v910_v11 = vld [vmem:[#allocation2 + $0x148] sm:$0xff]  ;;  %v3169_v40 = vld [vmem:[%s8620_s3 + $0x110] sm:$0xff]  ;;  %v8959_v54 = vld [vmem:[#allocation86_spill] sm:$0xff] }
 0x3ca   :  { %5591 = vrot.lane.b32.xlu0 %v8952_v52, %s5707_s8  ;;  %v5257_v56 = vpop.permute.xlu1 %5256  ;;  %v7365_v49 = vpop.permute.xlu0 %5311  ;;  %v3071_v35 = vsel %vm2878_vm10, %v3007_v55, %v5253_v7  ;;  %v2895_v39 = vsel %vm2878_vm10, %v2830_v24, %v5093_v15  ;;  %v3088_v6 = vsel %vm2878_vm10, %v3024_v36, %v5254_v50  ;;  %v5054_v25 = vunpack.i.h.bf16 %v8946_v30  ;;  %v3170_v24 = vld [vmem:[%s8620_s3 + $0x118] sm:$0xff] }
 0x3cb   :  { %v5259_v16 = vunpack.i.h.bf16 %v5257_v56  ;;  %v5258_v18 = vunpack.i.l.bf16 %v5257_v56  ;;  %3434 = vmatprep.mubr.f32.mxu0 %v3071_v35  ;;  %3515 = vmatmul.mubr.f32.gmra.mrb[4].mxu1 %v2895_v39  ;;  %v2879_v23 = vsel %vm2878_vm10, %v7169_v38, %v5053_v34  ;;  %v5264_v15 = vunpack.i.h.bf16 %v7186_v33  ;;  %v8956_v38 = vld [vmem:[#allocation104_spill] sm:$0xff]  ;;  %v8957_v34 = vld [vmem:[#allocation103_spill] sm:$0xff]  ;;  %v8961_v39 = vld [vmem:[#allocation45_spill] sm:$0xff] }
 0x3cc   :  { %v5263_v30 = vunpack.i.l.bf16 %v7186_v33  ;;  %v8955_v10 = vpack.i.bf16 %v7074_v13, %v8954_v4  ;;  %v8958_v50 = vpack.i.bf16 %v8956_v38, %v8957_v34  ;;  %v2944_v7 = vsel %vm129_vm1, %v893_v9, %v5214_v3  ;;  %3435 = vmatmul.mubr.f32.vlgmr.msra.gmra.mrb[2].mxu0 %v2879_v23  ;;  %3519 = vmatprep.mubr.f32.mxu1 %v3088_v6  ;;  %v894_v4 = vld [vmem:[#allocation2 + $0x48] sm:$0xff] }
 0x3cd   :  { %v2961_v8 = vsel %vm129_vm1, %v910_v11, %v5244_v45  ;;  %v5218_v47 = vunpack.i.l.bf16 %v7243_v57  ;;  %v3008_v33 = vsel %vm2813_vm9, %v2944_v7, %v5258_v18  ;;  %v2896_v52 = vsel %vm2878_vm10, %v2831_v51, %v5094_v62  ;;  %v8960_v45 = vld [vmem:[#allocation67_spill] sm:$0xff] }
 0x3ce   :  { %5546 = vrot.lane.b32.xlu1 %v8955_v10, %s5707_s8  ;;  %5601 = vrot.lane.b32.xlu0 %v8958_v50, %s5706_s2  ;;  %v3025_v13 = vsel %vm2813_vm9, %v2961_v8, %v5259_v16  ;;  %v5098_v21 = vunpack.i.l.bf16 %v8959_v54  ;;  %v5267_v55 = vpop.permute.xlu1 %5266  ;;  %v7396_v36 = vpop.permute.xlu0 %5321  ;;  %v3072_v56 = vsel %vm2878_vm10, %v3008_v33, %v5263_v30  ;;  %v4685_v35 = vpack.c.bf16 %v3170_v24, %v3169_v40  ;;  %v8963_v16 = vld [vmem:[#allocation46_spill] sm:$0xff]  ;;  %v8966_v30 = vld [vmem:[#allocation120_spill] sm:$0xff] }
 0x3cf   :  { %v3089_v3 = vsel %vm2878_vm10, %v3025_v13, %v5264_v15  ;;  %4684 = vmatpush3.bf16.msra.mxu0 %v8960_v45  ;;  %v4904_v6 = vunpack.i.h.bf16 %v8961_v39  ;;  %v4903_v9 = vunpack.i.l.bf16 %v8961_v39  ;;  %v5268_v18 = vunpack.i.l.bf16 %v5267_v55  ;;  %3439 = vmatprep.mubr.f32.mxu0 %v3072_v56  ;;  %v911_v10 = vld [vmem:[#allocation2 + $0x150] sm:$0xff] }
 0x3d0   :  { %3520 = vmatmul.mubr.f32.gmra.mrb[6].mxu1 %v2896_v52  ;;  %v8962_v62 = vunpack.i.l.bf16 %v6677_v2  ;;  %v4948_v23 = vunpack.i.l.bf16 %v8963_v16  ;;  %v4944_v11 = vunpack.i.h.bf16 %v8953_v22  ;;  %v5273_v15 = vunpack.i.l.bf16 %v7245_v48  ;;  %4686 = vmatprep.subr.bf16.mxu0 %v4685_v35 }
 0x3d1   :  { %v8964_v40 = vpack.i.bf16 %v7090_v44, %v7088_v29  ;;  %v8965_v24 = vpack.i.bf16 %v7094_v27, %v7092_v19  ;;  %v5269_v38 = vunpack.i.h.bf16 %v5267_v55  ;;  %3524 = vmatprep.mubr.f32.mxu1 %v3089_v3  ;;  %v2832_v22 = vsel %vm2813_vm9, %v7305_v32, %v4943_v12  ;;  %v8967_v44 = vld [vmem:[#allocation78_spill] sm:$0xff]  ;;  %v8970_v55 = vld [vmem:[#allocation77_spill] sm:$0xff] }
 0x3d2   :  { %v7407_v51 = vsel %vm2813_vm9, %v7285_v63, %v8962_v62  ;;  %v2880_v63 = vsel %vm2878_vm10, %v8966_v30, %v5054_v25  ;;  %v2945_v34 = vsel %vm129_vm1, %v894_v4, %v5218_v47  ;;  %v2962_v29 = vsel %vm129_vm1, %v911_v10, %v5268_v18  ;;  %v5277_v7 = vpop.permute.xlu1 %5276  ;;  %v7429_v25 = vpop.permute.xlu0 %5331  ;;  %v895_v18 = vld [vmem:[#allocation2 + $0x50] sm:$0xff]  ;;  %v8971_v62 = vld [vmem:[#allocation98_spill] sm:$0xff]  ;;  %v8974_v10 = vld [vmem:[#allocation105_spill] sm:$0xff] }
 0x3d3   :  { %5556 = vrot.lane.b32.xlu1 %v8964_v40, %s5706_s2  ;;  %5611 = vrot.lane.b32.xlu0 %v8965_v24, %s5708_s9  ;;  %v5058_v50 = vunpack.i.l.bf16 %v8967_v44  ;;  %v5099_v19 = vunpack.i.h.bf16 %v8959_v54  ;;  %v5274_v27 = vunpack.i.h.bf16 %v7245_v48  ;;  %v2897_v8 = vsel %vm2878_vm10, %v2832_v22, %v5098_v21  ;;  %v912_v21 = vld [vmem:[#allocation2 + $0x168] sm:$0xff] }
 0x3d4   :  { %3440 = vmatmul.mubr.f32.gmra.mrb[4].mxu0 %v2880_v63  ;;  %v5219_v33 = vunpack.i.h.bf16 %v7243_v57  ;;  %v5279_v52 = vunpack.i.h.bf16 %v5277_v7  ;;  %v5278_v32 = vunpack.i.l.bf16 %v5277_v7  ;;  %3525 = vmatmul.mubr.f32.gmra.mrb[8].mxu1 %v2897_v8  ;;  %v2816_v12 = vsel %vm2813_vm9, %v7271_v61, %v4903_v9  ;;  %v8972_v63 = vld [vmem:[#allocation8_spill] sm:$0xff] }
 0x3d5   :  { %4688 = vmatpush3.bf16.msra.mxu0 %v4685_v35  ;;  %v5283_v47 = vunpack.i.l.bf16 %v7277_v37  ;;  %v8968_v48 = vpack.i.bf16 %v7106_v41, %v7104_v1  ;;  %v8969_v13 = vpack.i.bf16 %v7110_v59, %v7108_v53  ;;  %v3009_v57 = vsel %vm2813_vm9, %v2945_v34, %v5273_v15 }
 0x3d6   :  { %v3026_v54 = vsel %vm2813_vm9, %v2962_v29, %v5274_v27  ;;  %v2833_v61 = vsel %vm2813_vm9, %v7308_v5, %v4944_v11  ;;  %v5103_v56 = vunpack.i.l.bf16 %v8970_v55  ;;  %v3073_v3 = vsel %vm2878_vm10, %v3009_v57, %v5278_v32  ;;  %v5287_v53 = vpop.permute.xlu1 %5286  ;;  %v7454_v35 = vpop.permute.xlu0 %5341 }
 0x3d7   :  { %5566 = vrot.lane.b32.xlu1 %v8968_v48, %s5708_s9  ;;  %5621 = vrot.lane.b32.xlu0 %v8969_v13, %s5707_s8  ;;  %v3090_v1 = vsel %vm2878_vm10, %v3026_v54, %v5279_v52  ;;  %v2963_v41 = vsel %vm129_vm1, %v912_v21, %v5269_v38  ;;  %v5059_v45 = vunpack.i.h.bf16 %v8967_v44  ;;  %v5284_v59 = vunpack.i.h.bf16 %v7277_v37  ;;  %v896_v52 = vld [vmem:[#allocation2 + $0x68] sm:$0xff]  ;;  %v8977_v48 = vld [vmem:[#allocation109_spill] sm:$0xff]  ;;  %v8978_v13 = vld [vmem:[#allocation108_spill] sm:$0xff] }
 0x3d8   :  { %3444 = vmatprep.mubr.f32.mxu0 %v3073_v3  ;;  %3529 = vmatprep.mubr.f32.mxu1 %v3090_v1  ;;  %v2881_v5 = vsel %vm2878_vm10, %v2816_v12, %v5058_v50  ;;  %v2898_v9 = vsel %vm2878_vm10, %v2833_v61, %v5099_v19  ;;  %v5223_v11 = vunpack.i.l.bf16 %v8971_v62  ;;  %v5289_v15 = vunpack.i.h.bf16 %v5287_v53  ;;  %v8980_v54 = vld [vmem:[#allocation111_spill] sm:$0xff]  ;;  %v8981_v61 = vld [vmem:[#allocation110_spill] sm:$0xff] }
 0x3d9   :  { %v5288_v40 = vunpack.i.l.bf16 %v5287_v53  ;;  %3445 = vmatmul.mubr.f32.gmra.mrb[6].mxu0 %v2881_v5  ;;  %3530 = vmatmul.mubr.f32.gmra.mrb[10].mxu1 %v2898_v9  ;;  %v2946_v24 = vsel %vm129_vm1, %v895_v18, %v5219_v33  ;;  %v4949_v37 = vunpack.i.h.bf16 %v8963_v16  ;;  %v5293_v30 = vunpack.i.l.bf16 %v7319_v26  ;;  %v8984_v18 = vld [vmem:[#allocation14_spill] sm:$0xff] }
 0x3da   :  { %v8973_v4 = vpack.i.bf16 %v7114_v28, %v8972_v63  ;;  %v8975_v38 = vpack.i.bf16 %v7118_v58, %v8974_v10  ;;  %v3010_v22 = vsel %vm2813_vm9, %v2946_v24, %v5283_v47  ;;  %v3027_v34 = vsel %vm2813_vm9, %v2963_v41, %v5284_v59  ;;  %v8976_v58 = vld [vmem:[#allocation69_spill] sm:$0xff]  ;;  %v5297_v7 = vpop.permute.xlu1 %5296  ;;  %v7484_v8 = vpop.permute.xlu0 %5351  ;;  %v914_v24 = vld [vmem:[#allocation2 + $0x188] sm:$0xff] }
 0x3db   :  { %v3074_v29 = vsel %vm2878_vm10, %v3010_v22, %v5288_v40  ;;  %v3091_v44 = vsel %vm2878_vm10, %v3027_v34, %v5289_v15  ;;  %v2817_v50 = vsel %vm2813_vm9, %v7274_v20, %v4904_v6  ;;  %v2834_v28 = vsel %vm2813_vm9, %v7289_v14, %v4948_v23  ;;  %v913_v23 = vld [vmem:[#allocation2 + $0x170] sm:$0xff]  ;;  %v8985_v63 = vld [vmem:[#allocation113_spill] sm:$0xff] }
 0x3dc   :  { %5576 = vrot.lane.b32.xlu1 %v8973_v4, %s5707_s8  ;;  %5631 = vrot.lane.b32.xlu0 %v8975_v38, %s5706_s2  ;;  %v5063_v19 = vunpack.i.l.bf16 %v8976_v58  ;;  %v5104_v27 = vunpack.i.h.bf16 %v8970_v55  ;;  %v2882_v33 = vsel %vm2878_vm10, %v2817_v50, %v5059_v45  ;;  %v2899_v39 = vsel %vm2878_vm10, %v2834_v28, %v5103_v56  ;;  %v8983_v56 = vld [vmem:[#allocation55_spill] sm:$0xff]  ;;  %v897_v40 = vld [vmem:[#allocation2 + $0x70] sm:$0xff]  ;;  %v8989_v38 = vld [vmem:[#allocation114_spill] sm:$0xff] }
 0x3dd   :  { %3449 = vmatprep.mubr.f32.mxu0 %v3074_v29  ;;  %3534 = vmatprep.mubr.f32.mxu1 %v3091_v44  ;;  %v5224_v20 = vunpack.i.h.bf16 %v8971_v62  ;;  %v5299_v6 = vunpack.i.h.bf16 %v5297_v7  ;;  %v5298_v16 = vunpack.i.l.bf16 %v5297_v7  ;;  %v2947_v14 = vsel %vm129_vm1, %v896_v52, %v5223_v11  ;;  %v8986_v4 = vld [vmem:[#allocation112_spill] sm:$0xff] }
 0x3de   :  { %3450 = vmatmul.mubr.f32.gmra.mrb[8].mxu0 %v2882_v33  ;;  %3535 = vmatmul.mubr.f32.gmra.mrb[12].mxu1 %v2899_v39  ;;  %v5294_v32 = vunpack.i.h.bf16 %v7319_v26  ;;  %v5304_v12 = vunpack.i.h.bf16 %v7341_v42  ;;  %v5303_v47 = vunpack.i.l.bf16 %v7341_v42  ;;  %v8979_v57 = vpack.i.bf16 %v8977_v48, %v8978_v13  ;;  %v5307_v45 = vpop.permute.xlu1 %5306  ;;  %v7508_v59 = vpop.permute.xlu0 %5361  ;;  %v641_v44 = vld [vmem:[#allocation2 + $0x4f] sm:$0xff]  ;;  %v8994_v13 = vld [vmem:[#allocation117_spill] sm:$0xff] }
 0x3df   :  { %v8982_v21 = vpack.i.bf16 %v8980_v54, %v8981_v61  ;;  %v2964_v55 = vsel %vm129_vm1, %v913_v23, %v5293_v30  ;;  %v4953_v3 = vunpack.i.l.bf16 %v8983_v56  ;;  %v3011_v26 = vsel %vm2813_vm9, %v2947_v14, %v5298_v16  ;;  %v8998_v61 = vld [vmem:[#allocation118_spill] sm:$0xff] }
 0x3e0   :  { %5586 = vrot.lane.b32.xlu1 %v8979_v57, %s5706_s2  ;;  %v3028_v1 = vsel %vm2813_vm9, %v2964_v55, %v5299_v6  ;;  %v2835_v42 = vsel %vm2813_vm9, %v7292_v31, %v4949_v37  ;;  %v5064_v41 = vunpack.i.h.bf16 %v8976_v58  ;;  %v3075_v53 = vsel %vm2878_vm10, %v3011_v26, %v5303_v47  ;;  %v642_v47 = vld [vmem:[#allocation2 + $0x67] sm:$0xff]  ;;  %v8995_v57 = vld [vmem:[#allocation116_spill] sm:$0xff] }
 0x3e1   :  { %5641 = vrot.lane.b32.xlu0 %v8982_v21, %s5708_s9  ;;  %v3092_v5 = vsel %vm2878_vm10, %v3028_v1, %v5304_v12  ;;  %v2883_v9 = vsel %vm2878_vm10, %v7407_v51, %v5063_v19  ;;  %v5108_v62 = vunpack.i.l.bf16 %v8984_v18  ;;  %v5309_v11 = vunpack.i.h.bf16 %v5307_v45  ;;  %3454 = vmatprep.mubr.f32.mxu0 %v3075_v53  ;;  %v8988_v51 = vld [vmem:[#allocation115_spill] sm:$0xff]  ;;  %v915_v1 = vld [vmem:[#allocation2 + $0x190] sm:$0xff] }
 0x3e2   :  { %v5308_v15 = vunpack.i.l.bf16 %v5307_v45  ;;  %3539 = vmatprep.mubr.f32.mxu1 %v3092_v5  ;;  %v2900_v31 = vsel %vm2878_vm10, %v2835_v42, %v5104_v27  ;;  %v5314_v37 = vunpack.i.h.bf16 %v7365_v49  ;;  %v5313_v30 = vunpack.i.l.bf16 %v7365_v49  ;;  %3455 = vmatmul.mubr.f32.gmra.mrb[10].mxu0 %v2883_v9  ;;  %v658_v27 = vld [vmem:[#allocation2 + $0x167] sm:$0xff]  ;;  %v5317_v33 = vpop.permute.xlu1 %5316  ;;  %v7535_v39 = vpop.permute.xlu0 %5371 }
 0x3e3   :  { %v8987_v10 = vpack.i.bf16 %v8985_v63, %v8986_v4  ;;  %v8990_v22 = vpack.i.bf16 %v8988_v51, %v8989_v38  ;;  %v2948_v34 = vsel %vm129_vm1, %v897_v40, %v5224_v20  ;;  %v2965_v29 = vsel %vm129_vm1, %v914_v24, %v5294_v32  ;;  %3540 = vmatmul.mubr.f32.gmra.mrb[14].mxu1 %v2900_v31  ;;  %v898_v26 = vld [vmem:[#allocation2 + $0x88] sm:$0xff]  ;;  %v9003_v63 = vld [vmem:[#allocation20_spill] sm:$0xff] }
 0x3e4   :  { %v4768_v50 = vunpack.i.l.bf16 %v8938_v43  ;;  %v3012_v49 = vsel %vm2813_vm9, %v2948_v34, %v5308_v15  ;;  %v3029_v28 = vsel %vm2813_vm9, %v2965_v29, %v5309_v11  ;;  %v8991_v58 = vunpack.i.h.bf16 %v8931_v60  ;;  %v9001_v45 = vld [vmem:[#allocation47_spill] sm:$0xff]  ;;  %v9002_v15 = vld [vmem:[#allocation80_spill] sm:$0xff]  ;;  %v9005_v34 = vld [vmem:[#allocation121_spill] sm:$0xff] }
 0x3e5   :  { %5596 = vrot.lane.b32.xlu1 %v8987_v10, %s5708_s9  ;;  %5651 = vrot.lane.b32.xlu0 %v8990_v22, %s5707_s8  ;;  %v4804_v7 = vunpack.i.h.bf16 %v8942_v46  ;;  %v3076_v52 = vsel %vm2878_vm10, %v3012_v49, %v5313_v30  ;;  %v3093_v20 = vsel %vm2878_vm10, %v3029_v28, %v5314_v37  ;;  %v8992_v6 = vunpack.i.l.bf16 %v8942_v46  ;;  %v8997_v46 = vld [vmem:[#allocation119_spill] sm:$0xff] }
 0x3e6   :  { %v2754_v19 = vsel %vm129_vm1, %v641_v44, %v8991_v58  ;;  %v5319_v14 = vunpack.i.h.bf16 %v5317_v33  ;;  %v5318_v23 = vunpack.i.l.bf16 %v5317_v33  ;;  %3459 = vmatprep.mubr.f32.mxu0 %v3076_v52  ;;  %3544 = vmatprep.mubr.f32.mxu1 %v3093_v20  ;;  %v8993_v60 = vunpack.i.h.bf16 %v6677_v2  ;;  %v5327_v24 = vpop.permute.xlu1 %5326  ;;  %v7568_v37 = vpop.permute.xlu0 %5381  ;;  %v659_v30 = vld [vmem:[#allocation2 + $0x16f] sm:$0xff]  ;;  %v1083_v33 = vld [vmem:[#allocation2 + $0x467] sm:$0xff] }
 0x3e7   :  { %v2771_v16 = vsel %vm129_vm1, %v658_v27, %v8992_v6  ;;  %v4764_v48 = vunpack.i.h.bf16 %v8939_v0  ;;  %v8996_v54 = vpack.i.bf16 %v8994_v13, %v8995_v57  ;;  %v8999_v21 = vpack.i.bf16 %v8997_v46, %v8998_v61  ;;  %v9008_v44 = vld [vmem:[#allocation123_spill] sm:$0xff]  ;;  %v9010_v20 = vld [vmem:[#allocation48_spill] sm:$0xff] }
 0x3e8   :  { %v2819_v32 = vsel %vm2813_vm9, %v2754_v19, %v8993_v60  ;;  %v2836_v12 = vsel %vm2813_vm9, %v2771_v16, %v4953_v3  ;;  %v9000_v3 = vunpack.i.l.bf16 %v8939_v0  ;;  %v4913_v53 = vunpack.i.l.bf16 %v9001_v45  ;;  %v916_v46 = vld [vmem:[#allocation2 + $0x1a8] sm:$0xff] }
 0x3e9   :  { %5606 = vrot.lane.b32.xlu1 %v8996_v54, %s5707_s8  ;;  %5661 = vrot.lane.b32.xlu0 %v8999_v21, %s5706_s2  ;;  %v2884_v55 = vsel %vm2878_vm10, %v2819_v32, %v5064_v41  ;;  %v2901_v2 = vsel %vm2878_vm10, %v2836_v12, %v5108_v62  ;;  %v4954_v5 = vunpack.i.h.bf16 %v8983_v56  ;;  %v2949_v9 = vsel %vm129_vm1, %v898_v26, %v5318_v23  ;;  %v9011_v32 = vld [vmem:[#allocation79_spill] sm:$0xff]  ;;  %v899_v54 = vld [vmem:[#allocation2 + $0x90] sm:$0xff] }
 0x3ea   :  { %v2755_v42 = vsel %vm129_vm1, %v642_v47, %v9000_v3  ;;  %3460 = vmatmul.mubr.f32.gmra.mrb[12].mxu0 %v2884_v55  ;;  %3545 = vmatmul.mubr.f32.gmra.mrb[16].mxu1 %v2901_v2  ;;  %v2966_v11 = vsel %vm129_vm1, %v915_v1, %v5319_v14  ;;  %v5068_v41 = vunpack.i.l.bf16 %v9002_v15  ;;  %v5109_v62 = vunpack.i.h.bf16 %v8984_v18  ;;  %v9004_v18 = vld [vmem:[#allocation122_spill] sm:$0xff]  ;;  %v5337_v16 = vpop.permute.xlu1 %5336  ;;  %v7590_v14 = vpop.permute.xlu0 %5391  ;;  %v9012_v55 = vld [vmem:[#allocation127_spill] sm:$0xff] }
 0x3eb   :  { %v5324_v31 = vunpack.i.h.bf16 %v7396_v36  ;;  %v5323_v40 = vunpack.i.l.bf16 %v7396_v36  ;;  %v4808_v56 = vunpack.i.l.bf16 %v9003_v63  ;;  %v5329_v4 = vunpack.i.h.bf16 %v5327_v24  ;;  %v9007_v36 = vld [vmem:[#allocation125_spill] sm:$0xff]  ;;  %v9013_v2 = vld [vmem:[#allocation126_spill] sm:$0xff] }
 0x3ec   :  { %v5328_v10 = vunpack.i.l.bf16 %v5327_v24  ;;  %v2772_v51 = vsel %vm129_vm1, %v659_v30, %v4804_v7  ;;  %v5334_v38 = vunpack.i.h.bf16 %v7429_v25  ;;  %v5333_v22 = vunpack.i.l.bf16 %v7429_v25 }
 0x3ed   :  { %v9006_v29 = vpack.i.bf16 %v9004_v18, %v9005_v34  ;;  %v9009_v49 = vpack.i.bf16 %v9007_v36, %v9008_v44  ;;  %v3013_v28 = vsel %vm2813_vm9, %v2949_v9, %v5323_v40  ;;  %v3030_v58 = vsel %vm2813_vm9, %v2966_v11, %v5324_v31  ;;  %v660_v9 = vld [vmem:[#allocation2 + $0x187] sm:$0xff] }
 0x3ee   :  { %v3077_v19 = vsel %vm2878_vm10, %v3013_v28, %v5328_v10  ;;  %v3094_v27 = vsel %vm2878_vm10, %v3030_v58, %v5329_v4  ;;  %v2820_v25 = vsel %vm2813_vm9, %v2755_v42, %v4913_v53  ;;  %v2837_v7 = vsel %vm2813_vm9, %v2772_v51, %v4954_v5  ;;  %v643_v42 = vld [vmem:[#allocation2 + $0x6f] sm:$0xff] }
 0x3ef   :  { %5616 = vrot.lane.b32.xlu1 %v9006_v29, %s5706_s2  ;;  %5671 = vrot.lane.b32.xlu0 %v9009_v49, %s5708_s9  ;;  %v4914_v52 = vunpack.i.h.bf16 %v9001_v45  ;;  %v4958_v6 = vunpack.i.l.bf16 %v9010_v20  ;;  %v2885_v23 = vsel %vm2878_vm10, %v2820_v25, %v5068_v41  ;;  %v2902_v60 = vsel %vm2878_vm10, %v2837_v7, %v5109_v62  ;;  %v644_v45 = vld [vmem:[#allocation2 + $0x87] sm:$0xff]  ;;  %v5347_v41 = vpop.permute.xlu1 %5346  ;;  %v7614_v62 = vpop.permute.xlu0 %5401  ;;  %v645_v10 = vld [vmem:[#allocation2 + $0x8f] sm:$0xff]  ;;  %v9019_v49 = vld [vmem:[#allocation41_spill] sm:$0xff] }
 0x3f0   :  { %3464 = vmatprep.mubr.f32.mxu0 %v3077_v19  ;;  %3549 = vmatprep.mubr.f32.mxu1 %v3094_v27  ;;  %v5113_v12 = vunpack.i.l.bf16 %v9011_v32  ;;  %v5069_v47 = vunpack.i.h.bf16 %v9002_v15  ;;  %v5339_v13 = vunpack.i.h.bf16 %v5337_v16  ;;  %v5338_v57 = vunpack.i.l.bf16 %v5337_v16  ;;  %v900_v34 = vld [vmem:[#allocation2 + $0xa8] sm:$0xff]  ;;  %v917_v29 = vld [vmem:[#allocation2 + $0x1b0] sm:$0xff] }
 0x3f1   :  { %3465 = vmatmul.mubr.f32.gmra.mrb[14].mxu0 %v2885_v23  ;;  %3550 = vmatmul.mubr.f32.gmra.mrb[18].mxu1 %v2902_v60  ;;  %v5344_v61 = vunpack.i.h.bf16 %v7454_v35  ;;  %v5343_v21 = vunpack.i.l.bf16 %v7454_v35  ;;  %v9014_v26 = vpack.i.bf16 %v9012_v55, %v9013_v2  ;;  %v2950_v1 = vsel %vm129_vm1, %v899_v54, %v5333_v22  ;;  %v1148_v27 = vld [vmem:[#allocation2 + $0x470] sm:$0xff]  ;;  %v9020_v25 = vld [vmem:[#allocation71_spill] sm:$0xff] }
 0x3f2   :  { %v2967_v3 = vsel %vm129_vm1, %v916_v46, %v5334_v38  ;;  %v3014_v53 = vsel %vm2813_vm9, %v2950_v1, %v5338_v57  ;;  %v2756_v35 = vsel %vm129_vm1, %v643_v42, %v4764_v48  ;;  %v2757_v11 = vsel %vm129_vm1, %v644_v45, %v4768_v50  ;;  %v1019_v48 = vld [vmem:[#allocation2 + $0x451] sm:$0xff] }
 0x3f3   :  { %5626 = vrot.lane.b32.xlu1 %v9014_v26, %s5708_s9  ;;  %2425 = vrot.lane.b32.xlu0 %v1083_v33, %s5707_s8  ;;  %v3031_v5 = vsel %vm2813_vm9, %v2967_v3, %v5339_v13  ;;  %v4809_v15 = vunpack.i.h.bf16 %v9003_v63  ;;  %v3078_v31 = vsel %vm2878_vm10, %v3014_v53, %v5343_v21  ;;  %v2773_v24 = vsel %vm129_vm1, %v660_v9, %v4808_v56  ;;  %v9015_v63 = vld [vmem:[#allocation17_spill] sm:$0xff]  ;;  %v9016_v38 = vld [vmem:[#allocation128_spill] sm:$0xff]  ;;  %v7640_v16 = vpop.permute.xlu0 %5411 }
 0x3f4   :  { %v3095_v40 = vsel %vm2878_vm10, %v3031_v5, %v5344_v61  ;;  %v5349_v30 = vunpack.i.h.bf16 %v5347_v41  ;;  %v5348_v0 = vunpack.i.l.bf16 %v5347_v41  ;;  %3469 = vmatprep.mubr.f32.mxu0 %v3078_v31  ;;  %v2821_v4 = vsel %vm2813_vm9, %v2756_v35, %v4914_v52  ;;  %v661_v23 = vld [vmem:[#allocation2 + $0x18f] sm:$0xff]  ;;  %v9023_v46 = vld [vmem:[#allocation129_spill] sm:$0xff] }
 0x3f5   :  { %3554 = vmatprep.mubr.f32.mxu1 %v3095_v40  ;;  %v2838_v50 = vsel %vm2813_vm9, %v2773_v24, %v4958_v6  ;;  %v4773_v51 = vunpack.i.l.bf16 %v9015_v63  ;;  %v9017_v22 = vpack.i.bf16 %v7212_v17, %v9016_v38  ;;  %v2886_v56 = vsel %vm2878_vm10, %v2821_v4, %v5069_v47  ;;  %v5357_v6 = vpop.permute.xlu1 %5356  ;;  %v9025_v3 = vld [vmem:[#allocation57_spill] sm:$0xff]  ;;  %v901_v40 = vld [vmem:[#allocation2 + $0xb0] sm:$0xff]  ;;  %v918_v24 = vld [vmem:[#allocation2 + $0x1c8] sm:$0xff] }
 0x3f6   :  { %v2903_v18 = vsel %vm2878_vm10, %v2838_v50, %v5113_v12  ;;  %v9018_v36 = vunpack.i.h.bf16 %v8938_v43  ;;  %v4918_v28 = vunpack.i.l.bf16 %v9019_v49  ;;  %v4959_v58 = vunpack.i.h.bf16 %v9010_v20  ;;  %3470 = vmatmul.mubr.f32.gmra.mrb[16].mxu0 %v2886_v56  ;;  %v9021_v20 = vld [vmem:[#allocation25_spill] sm:$0xff]  ;;  %v9028_v4 = vld [vmem:[#allocation131_spill] sm:$0xff] }
 0x3f7   :  { %5636 = vrot.lane.b32.xlu1 %v9017_v22, %s5707_s8  ;;  %2171 = vrot.lane.b32.xlu0 %v1019_v48, %s5706_s2  ;;  %v2951_v17 = vsel %vm129_vm1, %v900_v34, %v5348_v0  ;;  %v2968_v19 = vsel %vm129_vm1, %v917_v29, %v5349_v30  ;;  %v5073_v7 = vunpack.i.l.bf16 %v9020_v25  ;;  %v5114_v33 = vunpack.i.h.bf16 %v9011_v32  ;;  %v9022_v32 = vld [vmem:[#allocation130_spill] sm:$0xff]  ;;  %v7659_v53 = vpop.permute.xlu0 %5421  ;;  %v9027_v48 = vld [vmem:[#allocation132_spill] sm:$0xff]  ;;  %v9030_v22 = vld [vmem:[#allocation13_spill] sm:$0xff] }
 0x3f8   :  { %v2758_v44 = vsel %vm129_vm1, %v645_v10, %v9018_v36  ;;  %3555 = vmatmul.mubr.f32.gmra.mrb[20].mxu1 %v2903_v18  ;;  %v5354_v52 = vunpack.i.h.bf16 %v7484_v8  ;;  %v5353_v43 = vunpack.i.l.bf16 %v7484_v8  ;;  %v4813_v60 = vunpack.i.l.bf16 %v9021_v20  ;;  %v662_v36 = vld [vmem:[#allocation2 + $0x1a7] sm:$0xff] }
 0x3f9   :  { %v5359_v12 = vunpack.i.h.bf16 %v5357_v6  ;;  %v5358_v47 = vunpack.i.l.bf16 %v5357_v6  ;;  %v2774_v13 = vsel %vm129_vm1, %v661_v23, %v4809_v15  ;;  %v5364_v57 = vunpack.i.h.bf16 %v7508_v59  ;;  %v5367_v45 = vpop.permute.xlu1 %5366  ;;  %v9026_v15 = vld [vmem:[#allocation34_spill] sm:$0xff]  ;;  %v9031_v23 = vld [vmem:[#allocation133_spill] sm:$0xff] }
 0x3fa   :  { %v5363_v54 = vunpack.i.l.bf16 %v7508_v59  ;;  %v9024_v61 = vpack.i.bf16 %v9022_v32, %v9023_v46  ;;  %v3015_v8 = vsel %vm2813_vm9, %v2951_v17, %v5353_v43  ;;  %v3032_v21 = vsel %vm2813_vm9, %v2968_v19, %v5354_v52  ;;  %v646_v52 = vld [vmem:[#allocation2 + $0xa7] sm:$0xff] }
 0x3fb   :  { %2683 = vrot.lane.b32.xlu0 %v1148_v27, %s5708_s9  ;;  %v3079_v55 = vsel %vm2878_vm10, %v3015_v8, %v5358_v47  ;;  %v3096_v2 = vsel %vm2878_vm10, %v3032_v21, %v5359_v12  ;;  %v2822_v26 = vsel %vm2813_vm9, %v2757_v11, %v4918_v28  ;;  %v2839_v1 = vsel %vm2813_vm9, %v2774_v13, %v4959_v58  ;;  %v919_v47 = vld [vmem:[#allocation2 + $0x1d0] sm:$0xff]  ;;  %v9035_v8 = vld [vmem:[#allocation82_spill] sm:$0xff] }
 0x3fc   :  { %5646 = vrot.lane.b32.xlu1 %v9024_v61, %s5706_s2  ;;  %v4919_v59 = vunpack.i.h.bf16 %v9019_v49  ;;  %v4963_v42 = vunpack.i.l.bf16 %v9025_v3  ;;  %3474 = vmatprep.mubr.f32.mxu0 %v3079_v55  ;;  %v2887_v5 = vsel %vm2878_vm10, %v2822_v26, %v5073_v7  ;;  %v2904_v35 = vsel %vm2878_vm10, %v2839_v1, %v5114_v33 }
 0x3fd   :  { %3559 = vmatprep.mubr.f32.mxu1 %v3096_v2  ;;  %v5074_v9 = vunpack.i.h.bf16 %v9020_v25  ;;  %v5118_v41 = vunpack.i.l.bf16 %v9026_v15  ;;  %v5369_v11 = vunpack.i.h.bf16 %v5367_v45  ;;  %v5368_v31 = vunpack.i.l.bf16 %v5367_v45  ;;  %3475 = vmatmul.mubr.f32.gmra.mrb[18].mxu0 %v2887_v5  ;;  %v5377_v49 = vpop.permute.xlu1 %5376  ;;  %v1018_v5 = vld [vmem:[#allocation2 + $0x449] sm:$0xff] }
 0x3fe   :  { %3560 = vmatmul.mubr.f32.gmra.mrb[22].mxu1 %v2904_v35  ;;  %v5374_v30 = vunpack.i.h.bf16 %v7535_v39  ;;  %v5373_v0 = vunpack.i.l.bf16 %v7535_v39  ;;  %v9029_v50 = vpack.i.bf16 %v9027_v48, %v9028_v4  ;;  %v2952_v10 = vsel %vm129_vm1, %v901_v40, %v5363_v54  ;;  %v7677_v39 = vpop.permute.xlu0 %5431  ;;  %v9037_v48 = vld [vmem:[#allocation50_spill] sm:$0xff] }
 0x3ff   :  { %v2969_v38 = vsel %vm129_vm1, %v918_v24, %v5364_v57  ;;  %v4779_v56 = vunpack.i.h.bf16 %v9030_v22  ;;  %v4814_v18 = vunpack.i.h.bf16 %v9021_v20  ;;  %v3016_v34 = vsel %vm2813_vm9, %v2952_v10, %v5368_v31  ;;  %v9032_v20 = vld [vmem:[#allocation10_spill] sm:$0xff]  ;;  %v9034_v57 = vld [vmem:[#allocation49_spill] sm:$0xff] }
 0x400   :  { %5656 = vrot.lane.b32.xlu1 %v9029_v50, %s5708_s9  ;;  %v3033_v29 = vsel %vm2813_vm9, %v2969_v38, %v5369_v11  ;;  %v3080_v28 = vsel %vm2878_vm10, %v3016_v34, %v5373_v0  ;;  %v2823_v17 = vsel %vm2813_vm9, %v2758_v44, %v4919_v59  ;;  %v2775_v19 = vsel %vm129_vm1, %v662_v36, %v4813_v60  ;;  %v902_v60 = vld [vmem:[#allocation2 + $0xc8] sm:$0xff]  ;;  %v9036_v59 = vld [vmem:[#allocation22_spill] sm:$0xff] }
 0x401   :  { %v3097_v58 = vsel %vm2878_vm10, %v3033_v29, %v5374_v30  ;;  %v5379_v27 = vunpack.i.h.bf16 %v5377_v49  ;;  %v5378_v25 = vunpack.i.l.bf16 %v5377_v49  ;;  %3479 = vmatprep.mubr.f32.mxu0 %v3080_v28  ;;  %v2888_v7 = vsel %vm2878_vm10, %v2823_v17, %v5074_v9  ;;  %v1147_v30 = vld [vmem:[#allocation2 + $0x468] sm:$0xff]  ;;  %v903_v28 = vld [vmem:[#allocation2 + $0xd0] sm:$0xff] }
 0x402   :  { %3564 = vmatprep.mubr.f32.mxu1 %v3097_v58  ;;  %v2840_v33 = vsel %vm2813_vm9, %v2775_v19, %v4963_v42  ;;  %v4778_v43 = vunpack.i.l.bf16 %v9030_v22  ;;  %v4774_v6 = vunpack.i.h.bf16 %v9015_v63  ;;  %v9033_v12 = vpack.i.bf16 %v9031_v23, %v9032_v20  ;;  %3480 = vmatmul.mubr.f32.gmra.mrb[20].mxu0 %v2888_v7  ;;  %v5387_v63 = vpop.permute.xlu1 %5386  ;;  %v7703_v1 = vpop.permute.xlu0 %5441  ;;  %v920_v58 = vld [vmem:[#allocation2 + $0x1e8] sm:$0xff] }
 0x403   :  { %v2905_v44 = vsel %vm2878_vm10, %v2840_v33, %v5118_v41  ;;  %v2759_v13 = vsel %vm129_vm1, %v646_v52, %v4773_v51  ;;  %v4923_v54 = vunpack.i.l.bf16 %v9034_v57  ;;  %v4964_v32 = vunpack.i.h.bf16 %v9025_v3  ;;  %v663_v51 = vld [vmem:[#allocation2 + $0x1af] sm:$0xff] }
 0x404   :  { %5666 = vrot.lane.b32.xlu1 %v9033_v12, %s5707_s8  ;;  %3565 = vmatmul.mubr.f32.gmra.mrb[24].mxu1 %v2905_v44  ;;  %v2953_v46 = vsel %vm129_vm1, %v902_v60, %v5378_v25  ;;  %v2970_v61 = vsel %vm129_vm1, %v919_v47, %v5379_v27  ;;  %v5078_v21 = vunpack.i.l.bf16 %v9035_v8  ;;  %v5119_v55 = vunpack.i.h.bf16 %v9026_v15  ;;  %v647_v7 = vld [vmem:[#allocation2 + $0xaf] sm:$0xff]  ;;  %v664_v44 = vld [vmem:[#allocation2 + $0x1c7] sm:$0xff] }
 0x405   :  { %v5384_v2 = vunpack.i.h.bf16 %v7568_v37  ;;  %v5383_v26 = vunpack.i.l.bf16 %v7568_v37  ;;  %v4818_v42 = vunpack.i.l.bf16 %v9036_v59  ;;  %v5389_v3 = vunpack.i.h.bf16 %v5387_v63  ;;  %v1084_v20 = vld [vmem:[#allocation2 + $0x46f] sm:$0xff] }
 0x406   :  { %v5388_v45 = vunpack.i.l.bf16 %v5387_v63  ;;  %v2776_v35 = vsel %vm129_vm1, %v663_v51, %v4814_v18  ;;  %v5394_v9 = vunpack.i.h.bf16 %v7590_v14  ;;  %v5393_v41 = vunpack.i.l.bf16 %v7590_v14  ;;  %v5397_v14 = vpop.permute.xlu1 %5396  ;;  %v7718_v50 = vpop.permute.xlu0 %5451  ;;  %v9038_v18 = vld [vmem:[#allocation81_spill] sm:$0xff]  ;;  %v904_v63 = vld [vmem:[#allocation2 + $0xe8] sm:$0xff]  ;;  %v921_v51 = vld [vmem:[#allocation2 + $0x1f0] sm:$0xff] }
 0x407   :  { %v3017_v15 = vsel %vm2813_vm9, %v2953_v46, %v5383_v26  ;;  %v3034_v37 = vsel %vm2813_vm9, %v2970_v61, %v5384_v2  ;;  %v2824_v40 = vsel %vm2813_vm9, %v2759_v13, %v4923_v54  ;;  %v2841_v24 = vsel %vm2813_vm9, %v2776_v35, %v4964_v32 }
 0x408   :  { %2169 = vrot.lane.b32.xlu1 %v1018_v5, %s5706_s2  ;;  %v3081_v11 = vsel %vm2878_vm10, %v3017_v15, %v5388_v45  ;;  %v3098_v31 = vsel %vm2878_vm10, %v3034_v37, %v5389_v3  ;;  %v4924_v0 = vunpack.i.h.bf16 %v9034_v57  ;;  %v4968_v4 = vunpack.i.l.bf16 %v9037_v48  ;;  %v9040_v3 = vld [vmem:[#allocation43_spill] sm:$0xff] }
 0x409   :  { %3484 = vmatprep.mubr.f32.mxu0 %v3081_v11  ;;  %3569 = vmatprep.mubr.f32.mxu1 %v3098_v31  ;;  %v2889_v10 = vsel %vm2878_vm10, %v2824_v40, %v5078_v21  ;;  %v2906_v38 = vsel %vm2878_vm10, %v2841_v24, %v5119_v55  ;;  %v5123_v34 = vunpack.i.l.bf16 %v9038_v18  ;;  %v5079_v29 = vunpack.i.h.bf16 %v9035_v8  ;;  %v648_v8 = vld [vmem:[#allocation2 + $0xc7] sm:$0xff]  ;;  %v649_v21 = vld [vmem:[#allocation2 + $0xcf] sm:$0xff] }
 0x40a   :  { %v5399_v36 = vunpack.i.h.bf16 %v5397_v14  ;;  %v5398_v49 = vunpack.i.l.bf16 %v5397_v14  ;;  %3485 = vmatmul.mubr.f32.gmra.mrb[22].mxu0 %v2889_v10  ;;  %3570 = vmatmul.mubr.f32.gmra.mrb[26].mxu1 %v2906_v38  ;;  %v5404_v17 = vunpack.i.h.bf16 %v7614_v62  ;;  %v5403_v19 = vunpack.i.l.bf16 %v7614_v62  ;;  %v5407_v60 = vpop.permute.xlu1 %5406  ;;  %v7737_v46 = vpop.permute.xlu0 %5461  ;;  %v9039_v55 = vld [vmem:[#allocation19_spill] sm:$0xff] }
 0x40b   :  { %v2954_v27 = vsel %vm129_vm1, %v903_v28, %v5393_v41  ;;  %v2971_v25 = vsel %vm129_vm1, %v920_v58, %v5394_v9  ;;  %v4819_v33 = vunpack.i.h.bf16 %v9036_v59  ;;  %v2760_v12 = vsel %vm129_vm1, %v647_v7, %v4774_v6  ;;  %v9041_v41 = vld [vmem:[#allocation73_spill] sm:$0xff]  ;;  %v665_v31 = vld [vmem:[#allocation2 + $0x1cf] sm:$0xff] }
 0x40c   :  { %2681 = vrot.lane.b32.xlu1 %v1147_v30, %s5708_s9  ;;  %v3018_v52 = vsel %vm2813_vm9, %v2954_v27, %v5398_v49  ;;  %v3035_v23 = vsel %vm2813_vm9, %v2971_v25, %v5399_v36  ;;  %v2825_v13 = vsel %vm2813_vm9, %v2760_v12, %v4924_v0  ;;  %v2777_v57 = vsel %vm129_vm1, %v664_v44, %v4818_v42  ;;  %v9043_v49 = vld [vmem:[#allocation59_spill] sm:$0xff]  ;;  %v9044_v27 = vld [vmem:[#allocation90_spill] sm:$0xff] }
 0x40d   :  { %v3082_v62 = vsel %vm2878_vm10, %v3018_v52, %v5403_v19  ;;  %v3099_v47 = vsel %vm2878_vm10, %v3035_v23, %v5404_v17  ;;  %v5409_v54 = vunpack.i.h.bf16 %v5407_v60  ;;  %v5408_v32 = vunpack.i.l.bf16 %v5407_v60  ;;  %v905_v52 = vld [vmem:[#allocation2 + $0xf0] sm:$0xff]  ;;  %v922_v23 = vld [vmem:[#allocation2 + $0x208] sm:$0xff] }
 0x40e   :  { %3489 = vmatprep.mubr.f32.mxu0 %v3082_v62  ;;  %3574 = vmatprep.mubr.f32.mxu1 %v3099_v47  ;;  %v2890_v61 = vsel %vm2878_vm10, %v2825_v13, %v5079_v29  ;;  %v2842_v6 = vsel %vm2813_vm9, %v2777_v57, %v4968_v4  ;;  %v4783_v2 = vunpack.i.l.bf16 %v9039_v55  ;;  %v2761_v59 = vsel %vm129_vm1, %v648_v8, %v4778_v43  ;;  %v5417_v22 = vpop.permute.xlu1 %5416  ;;  %v7764_v38 = vpop.permute.xlu0 %5471  ;;  %v666_v62 = vld [vmem:[#allocation2 + $0x1e7] sm:$0xff] }
 0x40f   :  { %3490 = vmatmul.mubr.f32.gmra.mrb[24].mxu0 %v2890_v61  ;;  %v2907_v26 = vsel %vm2878_vm10, %v2842_v6, %v5123_v34  ;;  %v2762_v42 = vsel %vm129_vm1, %v649_v21, %v4779_v56  ;;  %v4928_v45 = vunpack.i.l.bf16 %v9040_v3  ;;  %v4969_v5 = vunpack.i.h.bf16 %v9037_v48  ;;  %v9042_v56 = vld [vmem:[#allocation28_spill] sm:$0xff] }
 0x410   :  { %2427 = vrot.lane.b32.xlu1 %v1084_v20, %s5707_s8  ;;  %3575 = vmatmul.mubr.f32.gmra.mrb[28].mxu1 %v2907_v26  ;;  %v2955_v35 = vsel %vm129_vm1, %v904_v63, %v5408_v32  ;;  %v2972_v9 = vsel %vm129_vm1, %v921_v51, %v5409_v54  ;;  %v5083_v15 = vunpack.i.l.bf16 %v9041_v41  ;;  %v5124_v37 = vunpack.i.h.bf16 %v9038_v18 }
 0x411   :  { %v5414_v11 = vunpack.i.h.bf16 %v7640_v16  ;;  %v5413_v43 = vunpack.i.l.bf16 %v7640_v16  ;;  %v4823_v40 = vunpack.i.l.bf16 %v9042_v56  ;;  %v5419_v24 = vunpack.i.h.bf16 %v5417_v22 }
 0x412   :  { %v5418_v30 = vunpack.i.l.bf16 %v5417_v22  ;;  %v2778_v0 = vsel %vm129_vm1, %v665_v31, %v4819_v33  ;;  %v5424_v48 = vunpack.i.h.bf16 %v7659_v53  ;;  %v5423_v4 = vunpack.i.l.bf16 %v7659_v53  ;;  %v5427_v58 = vpop.permute.xlu1 %5426  ;;  %v7788_v21 = vpop.permute.xlu0 %5481 }
 0x413   :  { %v3019_v14 = vsel %vm2813_vm9, %v2955_v35, %v5413_v43  ;;  %v3036_v10 = vsel %vm2813_vm9, %v2972_v9, %v5414_v11  ;;  %v2826_v34 = vsel %vm2813_vm9, %v2761_v59, %v4928_v45  ;;  %v2843_v29 = vsel %vm2813_vm9, %v2778_v0, %v4969_v5  ;;  %v906_v5 = vld [vmem:[#allocation2 + $0x108] sm:$0xff]  ;;  %v923_v35 = vld [vmem:[#allocation2 + $0x210] sm:$0xff] }
 0x414   :  { %v3083_v16 = vsel %vm2878_vm10, %v3019_v14, %v5418_v30  ;;  %v3100_v18 = vsel %vm2878_vm10, %v3036_v10, %v5419_v24  ;;  %v4929_v36 = vunpack.i.h.bf16 %v9040_v3  ;;  %v4973_v28 = vunpack.i.l.bf16 %v9043_v49  ;;  %v9045_v3 = vld [vmem:[#allocation7_spill] sm:$0xff]  ;;  %v9047_v11 = vld [vmem:[#allocation84_spill] sm:$0xff] }
 0x415   :  { %3494 = vmatprep.mubr.f32.mxu0 %v3083_v16  ;;  %3579 = vmatprep.mubr.f32.mxu1 %v3100_v18  ;;  %v2891_v53 = vsel %vm2878_vm10, %v2826_v34, %v5083_v15  ;;  %v2908_v17 = vsel %vm2878_vm10, %v2843_v29, %v5124_v37  ;;  %v5084_v19 = vunpack.i.h.bf16 %v9041_v41  ;;  %v5128_v25 = vunpack.i.l.bf16 %v9044_v27  ;;  %v9046_v9 = vld [vmem:[#allocation51_spill] sm:$0xff] }
 0x416   :  { %v5429_v7 = vunpack.i.h.bf16 %v5427_v58  ;;  %v5428_v33 = vunpack.i.l.bf16 %v5427_v58  ;;  %3495 = vmatmul.mubr.f32.gmra.mrb[26].mxu0 %v2891_v53  ;;  %3580 = vmatmul.mubr.f32.gmra.mrb[30].mxu1 %v2908_v17  ;;  %v5434_v20 = vunpack.i.h.bf16 %v7677_v39  ;;  %v5433_v12 = vunpack.i.l.bf16 %v7677_v39  ;;  %v5437_v32 = vpop.permute.xlu1 %5436  ;;  %v650_v24 = vld [vmem:[#allocation2 + $0xe7] sm:$0xff]  ;;  %v667_v30 = vld [vmem:[#allocation2 + $0x1ef] sm:$0xff]  ;;  %v7809_v29 = vpop.permute.xlu0 %5491  ;;  %v9048_v58 = vld [vmem:[#allocation9_spill] sm:$0xff] }
 0x417   :  { %v2956_v44 = vsel %vm129_vm1, %v905_v52, %v5423_v4  ;;  %v2973_v60 = vsel %vm129_vm1, %v922_v23, %v5424_v48  ;;  %v4824_v47 = vunpack.i.h.bf16 %v9042_v56  ;;  %v2779_v54 = vsel %vm129_vm1, %v666_v62, %v4823_v40  ;;  %v1149_v52 = vld [vmem:[#allocation2 + $0x49] sm:$0xff] }
 0x418   :  { %v3020_v13 = vsel %vm2813_vm9, %v2956_v44, %v5428_v33  ;;  %v3037_v57 = vsel %vm2813_vm9, %v2973_v60, %v5429_v7  ;;  %v2827_v39 = vsel %vm2813_vm9, %v2762_v42, %v4929_v36  ;;  %v2844_v8 = vsel %vm2813_vm9, %v2779_v54, %v4973_v28  ;;  %v924_v23 = vld [vmem:[#allocation2 + $0x268] sm:$0xff] }
 0x419   :  { %v3084_v61 = vsel %vm2878_vm10, %v3020_v13, %v5433_v12  ;;  %v3101_v6 = vsel %vm2878_vm10, %v3037_v57, %v5434_v20  ;;  %v5439_v26 = vunpack.i.h.bf16 %v5437_v32  ;;  %v5438_v63 = vunpack.i.l.bf16 %v5437_v32  ;;  %v925_v12 = vld [vmem:[#allocation2 + $0x270] sm:$0xff] }
 0x41a   :  { %3499 = vmatprep.mubr.f32.mxu0 %v3084_v61  ;;  %3584 = vmatprep.mubr.f32.mxu1 %v3101_v6  ;;  %v2892_v51 = vsel %vm2878_vm10, %v2827_v39, %v5084_v19  ;;  %v2909_v59 = vsel %vm2878_vm10, %v2844_v8, %v5128_v25  ;;  %v4738_v45 = vunpack.i.l.bf16 %v9045_v3  ;;  %v4933_v42 = vunpack.i.l.bf16 %v9046_v9  ;;  %v5447_v40 = vpop.permute.xlu1 %5446  ;;  %v1150_v39 = vld [vmem:[#allocation2 + $0x51] sm:$0xff]  ;;  %v9050_v9 = vld [vmem:[#allocation30_spill] sm:$0xff] }
 0x41b   :  { %3500 = vmatmul.mubr.f32.gmra.mrb[28].mxu0 %v2892_v51  ;;  %3585 = vmatmul.mubr.f32.gmra.mrb[32].mxu1 %v2909_v59  ;;  %v4974_v41 = vunpack.i.h.bf16 %v9043_v49  ;;  %v2957_v15 = vsel %vm129_vm1, %v906_v5, %v5438_v63  ;;  %v2974_v37 = vsel %vm129_vm1, %v923_v35, %v5439_v26  ;;  %v5088_v43 = vunpack.i.l.bf16 %v9047_v11  ;;  %v7832_v63 = vpop.permute.xlu0 %5501  ;;  %v926_v35 = vld [vmem:[#allocation2 + $0x288] sm:$0xff] }
 0x41c   :  { %v5129_v22 = vunpack.i.h.bf16 %v9044_v27  ;;  %v5444_v31 = vunpack.i.h.bf16 %v7703_v1  ;;  %v5443_v56 = vunpack.i.l.bf16 %v7703_v1  ;;  %v5449_v0 = vunpack.i.h.bf16 %v5447_v40  ;;  %v668_v1 = vld [vmem:[#allocation2 + $0x247] sm:$0xff] }
 0x41d   :  { %v5448_v48 = vunpack.i.l.bf16 %v5447_v40  ;;  %v2763_v4 = vsel %vm129_vm1, %v650_v24, %v4783_v2  ;;  %v2780_v14 = vsel %vm129_vm1, %v667_v30, %v4824_v47  ;;  %v5454_v10 = vunpack.i.h.bf16 %v7718_v50  ;;  %v9049_v27 = vld [vmem:[#allocation83_spill] sm:$0xff] }
 0x41e   :  { %v5453_v16 = vunpack.i.l.bf16 %v7718_v50  ;;  %v3021_v18 = vsel %vm2813_vm9, %v2957_v15, %v5443_v56  ;;  %v3038_v34 = vsel %vm2813_vm9, %v2974_v37, %v5444_v31  ;;  %v2828_v55 = vsel %vm2813_vm9, %v2763_v4, %v4933_v42  ;;  %v5457_v50 = vpop.permute.xlu1 %5456  ;;  %v669_v47 = vld [vmem:[#allocation2 + $0x24f] sm:$0xff]  ;;  %v9051_v15 = vld [vmem:[#allocation61_spill] sm:$0xff] }
 0x41f   :  { %v3085_v36 = vsel %vm2878_vm10, %v3021_v18, %v5448_v48  ;;  %v3102_v49 = vsel %vm2878_vm10, %v3038_v34, %v5449_v0  ;;  %v2845_v2 = vsel %vm2813_vm9, %v2780_v14, %v4974_v41  ;;  %v4739_v28 = vunpack.i.h.bf16 %v9045_v3  ;;  %v1151_v3 = vld [vmem:[#allocation2 + $0x69] sm:$0xff] }
 0x420   :  { %v4748_v53 = vunpack.i.l.bf16 %v9048_v58  ;;  %3504 = vmatprep.mubr.f32.mxu0 %v3085_v36  ;;  %3589 = vmatprep.mubr.f32.mxu1 %v3102_v49  ;;  %v2893_v17 = vsel %vm2878_vm10, %v2828_v55, %v5088_v43  ;;  %v2910_v19 = vsel %vm2878_vm10, %v2845_v2, %v5129_v22  ;;  %v5133_v25 = vunpack.i.l.bf16 %v9049_v27  ;;  %v1152_v22 = vld [vmem:[#allocation2 + $0x71] sm:$0xff]  ;;  %v9052_v56 = vld [vmem:[#allocation27_spill] sm:$0xff]  ;;  %v7853_v36 = vpop.permute.xlu0 %5511 }
 0x421   :  { %v5459_v7 = vunpack.i.h.bf16 %v5457_v50  ;;  %v5458_v33 = vunpack.i.l.bf16 %v5457_v50  ;;  %3505 = vmatmul.mubr.f32.gmra.mrb[30].mxu0 %v2893_v17  ;;  %3590 = vmatmul.mubr.f32.gmra.mrb[34].mxu1 %v2910_v19  ;;  %v2781_v20 = vsel %vm129_vm1, %v668_v1, %v4738_v45  ;;  %v5463_v44 = vunpack.i.l.bf16 %v7737_v46  ;;  %v1153_v0 = vld [vmem:[#allocation2 + $0x89] sm:$0xff] }
 0x422   :  { %4531 = vmatprep.mubr.msk.f32.mxu0 %vm129_vm1, %v1149_v52  ;;  %v2975_v60 = vsel %vm129_vm1, %v924_v23, %v5453_v16  ;;  %v2976_v62 = vsel %vm129_vm1, %v925_v12, %v5454_v10  ;;  %v4749_v54 = vunpack.i.h.bf16 %v9048_v58  ;;  %v5464_v32 = vunpack.i.h.bf16 %v7737_v46  ;;  %v5467_v61 = vpop.permute.xlu1 %5466  ;;  %v927_v48 = vld [vmem:[#allocation2 + $0x290] sm:$0xff]  ;;  %v670_v16 = vld [vmem:[#allocation2 + $0x267] sm:$0xff] }
 0x423   :  { %v3039_v13 = vsel %vm2813_vm9, %v2975_v60, %v5458_v33  ;;  %v3040_v57 = vsel %vm2813_vm9, %v2976_v62, %v5459_v7  ;;  %v2846_v8 = vsel %vm2813_vm9, %v2781_v20, %v4748_v53  ;;  %v5134_v26 = vunpack.i.h.bf16 %v9049_v27  ;;  %v1154_v58 = vld [vmem:[#allocation2 + $0x91] sm:$0xff]  ;;  %v1155_v19 = vld [vmem:[#allocation2 + $0xa9] sm:$0xff] }
 0x424   :  { %v3103_v6 = vsel %vm2878_vm10, %v3039_v13, %v5463_v44  ;;  %v5468_v51 = vunpack.i.l.bf16 %v5467_v61  ;;  %v2911_v59 = vsel %vm2878_vm10, %v2846_v8, %v5133_v25  ;;  %v2782_v45 = vsel %vm129_vm1, %v669_v47, %v4739_v28  ;;  %v928_v25 = vld [vmem:[#allocation2 + $0x2a8] sm:$0xff]  ;;  %v9053_v20 = vld [vmem:[#allocation24_spill] sm:$0xff] }
 0x425   :  { %3594 = vmatprep.mubr.f32.mxu1 %v3103_v6  ;;  %4532 = vmatmul.mubr.msk.f32.vlgmr.msra.gmra.mrb[32].mxu0 %vm129_vm1, %v1150_v39  ;;  %v5469_v46 = vunpack.i.h.bf16 %v5467_v61  ;;  %v3104_v5 = vsel %vm2878_vm10, %v3040_v57, %v5464_v32  ;;  %v4828_v42 = vunpack.i.l.bf16 %v9050_v9  ;;  %v4978_v37 = vunpack.i.l.bf16 %v9051_v15  ;;  %v671_v52 = vld [vmem:[#allocation2 + $0x26f] sm:$0xff]  ;;  %v9055_v61 = vld [vmem:[#allocation85_spill] sm:$0xff]  ;;  %v7874_v39 = vpop.permute.xlu0 %5521 }
 0x426   :  { %3595 = vmatmul.mubr.f32.gmra.mrb[36].mxu1 %v2911_v59  ;;  %4534 = vmatprep.mubr.msk.f32.mxu0 %vm129_vm1, %v1151_v3  ;;  %v2977_v41 = vsel %vm129_vm1, %v926_v35, %v5468_v51  ;;  %v5473_v11 = vunpack.i.l.bf16 %v7764_v38  ;;  %v5477_v43 = vpop.permute.xlu1 %5476  ;;  %v2847_v31 = vsel %vm2813_vm9, %v2782_v45, %v4749_v54  ;;  %v5138_v40 = vunpack.i.l.bf16 %v9052_v56  ;;  %v9054_v47 = vld [vmem:[#allocation52_spill] sm:$0xff]  ;;  %v672_v45 = vld [vmem:[#allocation2 + $0x287] sm:$0xff] }
 0x427   :  { %3599 = vmatprep.mubr.f32.mxu1 %v3104_v5  ;;  %v5478_v24 = vunpack.i.l.bf16 %v5477_v43  ;;  %v2912_v30 = vsel %vm2878_vm10, %v2847_v31, %v5134_v26  ;;  %v5483_v4 = vunpack.i.l.bf16 %v7788_v21  ;;  %v5479_v14 = vunpack.i.h.bf16 %v5477_v43  ;;  %v1156_v54 = vld [vmem:[#allocation2 + $0xb1] sm:$0xff]  ;;  %v1157_v26 = vld [vmem:[#allocation2 + $0xc9] sm:$0xff] }
 0x428   :  { %v3041_v10 = vsel %vm2813_vm9, %v2977_v41, %v5473_v11  ;;  %v2978_v18 = vsel %vm129_vm1, %v927_v48, %v5469_v46  ;;  %v4829_v34 = vunpack.i.h.bf16 %v9050_v9  ;;  %v5474_v1 = vunpack.i.h.bf16 %v7764_v38  ;;  %v929_v51 = vld [vmem:[#allocation2 + $0x2b0] sm:$0xff] }
 0x429   :  { %4535 = vmatmul.mubr.msk.f32.gmra.mrb[34].mxu0 %vm129_vm1, %v1152_v22  ;;  %v3105_v49 = vsel %vm2878_vm10, %v3041_v10, %v5478_v24  ;;  %v2783_v55 = vsel %vm129_vm1, %v670_v16, %v4828_v42  ;;  %v4979_v2 = vunpack.i.h.bf16 %v9051_v15  ;;  %v5139_v50 = vunpack.i.h.bf16 %v9052_v56  ;;  %v1159_v31 = vld [vmem:[#allocation2 + $0xe9] sm:$0xff]  ;;  %v7895_v10 = vpop.permute.xlu0 %5531 }
 0x42a   :  { %3600 = vmatmul.mubr.f32.gmra.mrb[38].mxu1 %v2912_v30  ;;  %4537 = vmatprep.mubr.msk.f32.mxu0 %vm129_vm1, %v1153_v0  ;;  %v5487_v28 = vpop.permute.xlu1 %5486  ;;  %v2848_v53 = vsel %vm2813_vm9, %v2783_v55, %v4978_v37  ;;  %v3042_v27 = vsel %vm2813_vm9, %v2978_v18, %v5474_v1  ;;  %v5484_v7 = vunpack.i.h.bf16 %v7788_v21  ;;  %v2979_v23 = vsel %vm129_vm1, %v928_v25, %v5483_v4  ;;  %v1158_v37 = vld [vmem:[#allocation2 + $0xd1] sm:$0xff]  ;;  %v930_v56 = vld [vmem:[#allocation2 + $0x2c8] sm:$0xff] }
 0x42b   :  { %3604 = vmatprep.mubr.f32.mxu1 %v3105_v49  ;;  %v5488_v17 = vunpack.i.l.bf16 %v5487_v28  ;;  %v2913_v38 = vsel %vm2878_vm10, %v2848_v53, %v5138_v40  ;;  %v3106_v33 = vsel %vm2878_vm10, %v3042_v27, %v5479_v14  ;;  %v4833_v12 = vunpack.i.l.bf16 %v9053_v20  ;;  %v9056_v48 = vld [vmem:[#allocation32_spill] sm:$0xff]  ;;  %v9057_v18 = vld [vmem:[#allocation63_spill] sm:$0xff] }
 0x42c   :  { %v5489_v44 = vunpack.i.h.bf16 %v5487_v28  ;;  %v2784_v60 = vsel %vm129_vm1, %v671_v52, %v4829_v34  ;;  %v4983_v13 = vunpack.i.l.bf16 %v9054_v47  ;;  %v5493_v21 = vunpack.i.l.bf16 %v7809_v29  ;;  %v1160_v49 = vld [vmem:[#allocation2 + $0xf1] sm:$0xff]  ;;  %v1161_v53 = vld [vmem:[#allocation2 + $0x109] sm:$0xff] }
 0x42d   :  { %4538 = vmatmul.mubr.msk.f32.gmra.mrb[36].mxu0 %vm129_vm1, %v1154_v58  ;;  %v3043_v62 = vsel %vm2813_vm9, %v2979_v23, %v5488_v17  ;;  %v2849_v32 = vsel %vm2813_vm9, %v2784_v60, %v4979_v2  ;;  %v5143_v6 = vunpack.i.l.bf16 %v9055_v61  ;;  %v2980_v46 = vsel %vm129_vm1, %v929_v51, %v5484_v7  ;;  %v9058_v2 = vld [vmem:[#allocation93_spill] sm:$0xff]  ;;  %v931_v17 = vld [vmem:[#allocation2 + $0x2d0] sm:$0xff]  ;;  %v674_v25 = vld [vmem:[#allocation2 + $0x2a7] sm:$0xff] }
 0x42e   :  { %3605 = vmatmul.mubr.f32.gmra.mrb[40].mxu1 %v2913_v38  ;;  %4540 = vmatprep.mubr.msk.f32.mxu0 %vm129_vm1, %v1155_v19  ;;  %v5497_v57 = vpop.permute.xlu1 %5496  ;;  %v2914_v8 = vsel %vm2878_vm10, %v2849_v32, %v5139_v50  ;;  %v3107_v3 = vsel %vm2878_vm10, %v3043_v62, %v5493_v21  ;;  %v4834_v5 = vunpack.i.h.bf16 %v9053_v20  ;;  %v2785_v35 = vsel %vm129_vm1, %v672_v45, %v4833_v12  ;;  %v1162_v60 = vld [vmem:[#allocation2 + $0x111] sm:$0xff]  ;;  %v1163_v21 = vld [vmem:[#allocation2 + $0x129] sm:$0xff] }
 0x42f   :  { %3609 = vmatprep.mubr.f32.mxu1 %v3106_v33  ;;  %v5498_v59 = vunpack.i.l.bf16 %v5497_v57  ;;  %v3044_v9 = vsel %vm2813_vm9, %v2980_v46, %v5489_v44  ;;  %v4984_v42 = vunpack.i.h.bf16 %v9054_v47  ;;  %v5494_v41 = vunpack.i.h.bf16 %v7809_v29  ;;  %v673_v29 = vld [vmem:[#allocation2 + $0x28f] sm:$0xff]  ;;  %v9060_v46 = vld [vmem:[#allocation54_spill] sm:$0xff] }
 0x430   :  { %v2850_v11 = vsel %vm2813_vm9, %v2785_v35, %v4983_v13  ;;  %v5144_v43 = vunpack.i.h.bf16 %v9055_v61  ;;  %v5499_v40 = vunpack.i.h.bf16 %v5497_v57  ;;  %v4838_v4 = vunpack.i.l.bf16 %v9056_v48  ;;  %v7919_v13 = vpop.permute.xlu0 %5541 }
 0x431   :  { %4541 = vmatmul.mubr.msk.f32.gmra.mrb[38].mxu0 %vm129_vm1, %v1156_v54  ;;  %v2915_v22 = vsel %vm2878_vm10, %v2850_v11, %v5143_v6  ;;  %v3108_v30 = vsel %vm2878_vm10, %v3044_v9, %v5494_v41  ;;  %v2981_v0 = vsel %vm129_vm1, %v930_v56, %v5498_v59  ;;  %v5503_v14 = vunpack.i.l.bf16 %v7832_v63  ;;  %v932_v54 = vld [vmem:[#allocation2 + $0x2e8] sm:$0xff]  ;;  %v1164_v9 = vld [vmem:[#allocation2 + $0x131] sm:$0xff] }
 0x432   :  { %3610 = vmatmul.mubr.f32.gmra.mrb[42].mxu1 %v2914_v8  ;;  %4543 = vmatprep.mubr.msk.f32.mxu0 %vm129_vm1, %v1157_v26  ;;  %v5507_v15 = vpop.permute.xlu1 %5506  ;;  %v2786_v16 = vsel %vm129_vm1, %v673_v29, %v4834_v5  ;;  %v4988_v34 = vunpack.i.l.bf16 %v9057_v18  ;;  %v5148_v28 = vunpack.i.l.bf16 %v9058_v2  ;;  %v5513_v38 = vunpack.i.l.bf16 %v7853_v36  ;;  %v675_v6 = vld [vmem:[#allocation2 + $0x2af] sm:$0xff]  ;;  %v9059_v26 = vld [vmem:[#allocation26_spill] sm:$0xff] }
 0x433   :  { %3614 = vmatprep.mubr.f32.mxu1 %v3107_v3  ;;  %v5508_v24 = vunpack.i.l.bf16 %v5507_v15  ;;  %v2851_v55 = vsel %vm2813_vm9, %v2786_v16, %v4984_v42  ;;  %v3045_v50 = vsel %vm2813_vm9, %v2981_v0, %v5503_v14  ;;  %v5509_v19 = vunpack.i.h.bf16 %v5507_v15  ;;  %v9061_v41 = vld [vmem:[#allocation87_spill] sm:$0xff]  ;;  %v1166_v16 = vld [vmem:[#allocation2 + $0x151] sm:$0xff] }
 0x434   :  { %v2916_v58 = vsel %vm2878_vm10, %v2851_v55, %v5144_v43  ;;  %v2982_v7 = vsel %vm129_vm1, %v931_v17, %v5499_v40  ;;  %v4839_v33 = vunpack.i.h.bf16 %v9056_v48  ;;  %v5504_v52 = vunpack.i.h.bf16 %v7832_v63  ;;  %v1165_v11 = vld [vmem:[#allocation2 + $0x149] sm:$0xff] }
 0x435   :  { %4544 = vmatmul.mubr.msk.f32.gmra.mrb[40].mxu0 %vm129_vm1, %v1158_v37  ;;  %v3109_v27 = vsel %vm2878_vm10, %v3045_v50, %v5508_v24  ;;  %v2787_v20 = vsel %vm129_vm1, %v674_v25, %v4838_v4  ;;  %v4989_v12 = vunpack.i.h.bf16 %v9057_v18  ;;  %v5149_v47 = vunpack.i.h.bf16 %v9058_v2  ;;  %v933_v43 = vld [vmem:[#allocation2 + $0x2f0] sm:$0xff]  ;;  %v676_v56 = vld [vmem:[#allocation2 + $0x2c7] sm:$0xff] }
 0x436   :  { %3615 = vmatmul.mubr.f32.gmra.mrb[44].mxu1 %v2915_v22  ;;  %4546 = vmatprep.mubr.msk.f32.mxu0 %vm129_vm1, %v1159_v31  ;;  %v7899_v1 = vpop.permute.xlu1 %5516  ;;  %v2852_v62 = vsel %vm2813_vm9, %v2787_v20, %v4988_v34  ;;  %v3046_v57 = vsel %vm2813_vm9, %v2982_v7, %v5504_v52  ;;  %v5514_v32 = vunpack.i.h.bf16 %v7853_v36  ;;  %v2983_v8 = vsel %vm129_vm1, %v932_v54, %v5513_v38  ;;  %v934_v55 = vld [vmem:[#allocation2 + $0x308] sm:$0xff] }
 0x437   :  { %3619 = vmatprep.mubr.f32.mxu1 %v3108_v30  ;;  %v5518_v23 = vunpack.i.l.bf16 %v7899_v1  ;;  %v2917_v63 = vsel %vm2878_vm10, %v2852_v62, %v5148_v28  ;;  %v3110_v61 = vsel %vm2878_vm10, %v3046_v57, %v5509_v19  ;;  %v4843_v51 = vunpack.i.l.bf16 %v9059_v26  ;;  %v7945_v30 = vpop.permute.xlu0 %5551  ;;  %v9062_v50 = vld [vmem:[#allocation35_spill] sm:$0xff] }
 0x438   :  { %v5519_v59 = vunpack.i.h.bf16 %v7899_v1  ;;  %v2788_v3 = vsel %vm129_vm1, %v675_v6, %v4839_v33  ;;  %v4993_v5 = vunpack.i.l.bf16 %v9060_v46  ;;  %v5523_v36 = vunpack.i.l.bf16 %v7874_v39  ;;  %v1168_v33 = vld [vmem:[#allocation2 + $0x171] sm:$0xff]  ;;  %v678_v54 = vld [vmem:[#allocation2 + $0x2e7] sm:$0xff] }
 0x439   :  { %4547 = vmatmul.mubr.msk.f32.gmra.mrb[42].mxu0 %vm129_vm1, %v1160_v49  ;;  %v3047_v45 = vsel %vm2813_vm9, %v2983_v8, %v5518_v23  ;;  %v2853_v42 = vsel %vm2813_vm9, %v2788_v3, %v4989_v12  ;;  %v5153_v15 = vunpack.i.l.bf16 %v9061_v41  ;;  %v2984_v40 = vsel %vm129_vm1, %v933_v43, %v5514_v32  ;;  %v1167_v49 = vld [vmem:[#allocation2 + $0x169] sm:$0xff]  ;;  %v1170_v3 = vld [vmem:[#allocation2 + $0x191] sm:$0xff] }
 0x43a   :  { %3620 = vmatmul.mubr.f32.gmra.mrb[46].mxu1 %v2916_v58  ;;  %4549 = vmatprep.mubr.msk.f32.mxu0 %vm129_vm1, %v1161_v53  ;;  %v7915_v44 = vpop.permute.xlu1 %5526  ;;  %v2918_v37 = vsel %vm2878_vm10, %v2853_v42, %v5149_v47  ;;  %v3111_v31 = vsel %vm2878_vm10, %v3047_v45, %v5523_v36  ;;  %v4844_v24 = vunpack.i.h.bf16 %v9059_v26  ;;  %v2789_v29 = vsel %vm129_vm1, %v676_v56, %v4843_v51  ;;  %v677_v58 = vld [vmem:[#allocation2 + $0x2cf] sm:$0xff] }
 0x43b   :  { %3624 = vmatprep.mubr.f32.mxu1 %v3109_v27  ;;  %v5528_v22 = vunpack.i.l.bf16 %v7915_v44  ;;  %v3048_v0 = vsel %vm2813_vm9, %v2984_v40, %v5519_v59  ;;  %v4994_v48 = vunpack.i.h.bf16 %v9060_v46  ;;  %v5524_v4 = vunpack.i.h.bf16 %v7874_v39  ;;  %v9063_v27 = vld [vmem:[#allocation65_spill] sm:$0xff]  ;;  %v9064_v23 = vld [vmem:[#allocation96_spill] sm:$0xff]  ;;  %v7970_v12 = vpop.permute.xlu0 %5561 }
 0x43c   :  { %v2854_v18 = vsel %vm2813_vm9, %v2789_v29, %v4993_v5  ;;  %v5154_v34 = vunpack.i.h.bf16 %v9061_v41  ;;  %v5529_v2 = vunpack.i.h.bf16 %v7915_v44  ;;  %v4848_v17 = vunpack.i.l.bf16 %v9062_v50  ;;  %v935_v47 = vld [vmem:[#allocation2 + $0x310] sm:$0xff] }
 0x43d   :  { %4550 = vmatmul.mubr.msk.f32.gmra.mrb[44].mxu0 %vm129_vm1, %v1162_v60  ;;  %v2919_v1 = vsel %vm2878_vm10, %v2854_v18, %v5153_v15  ;;  %v3112_v39 = vsel %vm2878_vm10, %v3048_v0, %v5524_v4  ;;  %v2985_v53 = vsel %vm129_vm1, %v934_v55, %v5528_v22  ;;  %v5533_v38 = vunpack.i.l.bf16 %v7895_v10  ;;  %v1169_v60 = vld [vmem:[#allocation2 + $0x189] sm:$0xff]  ;;  %v1172_v0 = vld [vmem:[#allocation2 + $0x1b1] sm:$0xff] }
 0x43e   :  { %3625 = vmatmul.mubr.f32.gmra.mrb[48].mxu1 %v2917_v63  ;;  %4552 = vmatprep.mubr.msk.f32.mxu0 %vm129_vm1, %v1163_v21  ;;  %v7934_v35 = vpop.permute.xlu1 %5536  ;;  %v2790_v19 = vsel %vm129_vm1, %v677_v58, %v4844_v24  ;;  %v4998_v25 = vunpack.i.l.bf16 %v9063_v27  ;;  %v5158_v20 = vunpack.i.l.bf16 %v9064_v23  ;;  %v5543_v63 = vunpack.i.l.bf16 %v7919_v13  ;;  %v1171_v36 = vld [vmem:[#allocation2 + $0x1a9] sm:$0xff] }
 0x43f   :  { %3629 = vmatprep.mubr.f32.mxu1 %v3110_v61  ;;  %v5538_v28 = vunpack.i.l.bf16 %v7934_v35  ;;  %v2855_v52 = vsel %vm2813_vm9, %v2790_v19, %v4994_v48  ;;  %v3049_v62 = vsel %vm2813_vm9, %v2985_v53, %v5533_v38  ;;  %v5539_v21 = vunpack.i.h.bf16 %v7934_v35  ;;  %v936_v35 = vld [vmem:[#allocation2 + $0x328] sm:$0xff]  ;;  %v7997_v43 = vpop.permute.xlu0 %5571  ;;  %v9067_v4 = vld [vmem:[#allocation88_spill] sm:$0xff] }
 0x440   :  { %v2920_v44 = vsel %vm2878_vm10, %v2855_v52, %v5154_v34  ;;  %v2986_v32 = vsel %vm129_vm1, %v935_v47, %v5529_v2  ;;  %v4849_v61 = vunpack.i.h.bf16 %v9062_v50  ;;  %v5534_v6 = vunpack.i.h.bf16 %v7895_v10  ;;  %v679_v41 = vld [vmem:[#allocation2 + $0x2ef] sm:$0xff]  ;;  %v680_v55 = vld [vmem:[#allocation2 + $0x307] sm:$0xff]  ;;  %v9068_v47 = vld [vmem:[#allocation37_spill] sm:$0xff] }
 0x441   :  { %4553 = vmatmul.mubr.msk.f32.gmra.mrb[46].mxu0 %vm129_vm1, %v1164_v9  ;;  %v3113_v57 = vsel %vm2878_vm10, %v3049_v62, %v5538_v28  ;;  %v2791_v26 = vsel %vm129_vm1, %v678_v54, %v4848_v17  ;;  %v4999_v51 = vunpack.i.h.bf16 %v9063_v27  ;;  %v5159_v46 = vunpack.i.h.bf16 %v9064_v23  ;;  %v1173_v18 = vld [vmem:[#allocation2 + $0x1c9] sm:$0xff]  ;;  %v1174_v17 = vld [vmem:[#allocation2 + $0x1d1] sm:$0xff] }
 0x442   :  { %3630 = vmatmul.mubr.f32.gmra.mrb[50].mxu1 %v2918_v37  ;;  %4555 = vmatprep.mubr.msk.f32.mxu0 %vm129_vm1, %v1165_v11  ;;  %v7951_v14 = vpop.permute.xlu1 %5546  ;;  %v2856_v45 = vsel %vm2813_vm9, %v2791_v26, %v4998_v25  ;;  %v3050_v10 = vsel %vm2813_vm9, %v2986_v32, %v5534_v6  ;;  %v5544_v9 = vunpack.i.h.bf16 %v7919_v13  ;;  %v2987_v15 = vsel %vm129_vm1, %v936_v35, %v5543_v63  ;;  %v9065_v37 = vld [vmem:[#allocation29_spill] sm:$0xff]  ;;  %v9066_v13 = vld [vmem:[#allocation56_spill] sm:$0xff]  ;;  %v938_v52 = vld [vmem:[#allocation2 + $0x348] sm:$0xff] }
 0x443   :  { %3634 = vmatprep.mubr.f32.mxu1 %v3111_v31  ;;  %v5548_v8 = vunpack.i.l.bf16 %v7951_v14  ;;  %v2921_v5 = vsel %vm2878_vm10, %v2856_v45, %v5158_v20  ;;  %v3114_v42 = vsel %vm2878_vm10, %v3050_v10, %v5539_v21  ;;  %v4853_v11 = vunpack.i.l.bf16 %v9065_v37  ;;  %v937_v34 = vld [vmem:[#allocation2 + $0x330] sm:$0xff]  ;;  %v8021_v27 = vpop.permute.xlu0 %5581  ;;  %v9070_v6 = vld [vmem:[#allocation97_spill] sm:$0xff]  ;;  %v682_v10 = vld [vmem:[#allocation2 + $0x327] sm:$0xff] }
 0x444   :  { %v5549_v22 = vunpack.i.h.bf16 %v7951_v14  ;;  %v2792_v31 = vsel %vm129_vm1, %v679_v41, %v4849_v61  ;;  %v5003_v40 = vunpack.i.l.bf16 %v9066_v13  ;;  %v5553_v24 = vunpack.i.l.bf16 %v7945_v30  ;;  %v1176_v32 = vld [vmem:[#allocation2 + $0x1f1] sm:$0xff] }
 0x445   :  { %4556 = vmatmul.mubr.msk.f32.gmra.mrb[48].mxu0 %vm129_vm1, %v1166_v16  ;;  %v3051_v56 = vsel %vm2813_vm9, %v2987_v15, %v5548_v8  ;;  %v2857_v48 = vsel %vm2813_vm9, %v2792_v31, %v4999_v51  ;;  %v5163_v16 = vunpack.i.l.bf16 %v9067_v4  ;;  %v2988_v2 = vsel %vm129_vm1, %v937_v34, %v5544_v9  ;;  %v1177_v51 = vld [vmem:[#allocation2 + $0x209] sm:$0xff]  ;;  %v1178_v31 = vld [vmem:[#allocation2 + $0x211] sm:$0xff] }
 0x446   :  { %3635 = vmatmul.mubr.f32.gmra.mrb[52].mxu1 %v2919_v1  ;;  %4558 = vmatprep.mubr.msk.f32.mxu0 %vm129_vm1, %v1167_v49  ;;  %v7966_v7 = vpop.permute.xlu1 %5556  ;;  %v2922_v14 = vsel %vm2878_vm10, %v2857_v48, %v5159_v46  ;;  %v3115_v49 = vsel %vm2878_vm10, %v3051_v56, %v5553_v24  ;;  %v4854_v28 = vunpack.i.h.bf16 %v9065_v37  ;;  %v3052_v58 = vsel %vm2813_vm9, %v2988_v2, %v5549_v22  ;;  %v939_v45 = vld [vmem:[#allocation2 + $0x350] sm:$0xff]  ;;  %v940_v24 = vld [vmem:[#allocation2 + $0x368] sm:$0xff]  ;;  %v9072_v2 = vld [vmem:[#allocation58_spill] sm:$0xff] }
 0x447   :  { %3639 = vmatprep.mubr.f32.mxu1 %v3112_v39  ;;  %v5558_v1 = vunpack.i.l.bf16 %v7966_v7  ;;  %v2793_v39 = vsel %vm129_vm1, %v680_v55, %v4853_v11  ;;  %v5004_v53 = vunpack.i.h.bf16 %v9066_v13  ;;  %v5554_v50 = vunpack.i.h.bf16 %v7945_v30  ;;  %v8048_v41 = vpop.permute.xlu0 %5591 }
 0x448   :  { %v2858_v38 = vsel %vm2813_vm9, %v2793_v39, %v5003_v40  ;;  %v5164_v19 = vunpack.i.h.bf16 %v9067_v4  ;;  %v5559_v23 = vunpack.i.h.bf16 %v7966_v7  ;;  %v4858_v63 = vunpack.i.l.bf16 %v9068_v47  ;;  %v9069_v7 = vld [vmem:[#allocation68_spill] sm:$0xff] }
 0x449   :  { %4559 = vmatmul.mubr.msk.f32.gmra.mrb[50].mxu0 %vm129_vm1, %v1168_v33  ;;  %v2923_v25 = vsel %vm2878_vm10, %v2858_v38, %v5163_v16  ;;  %v1175_v33 = vld [vmem:[#allocation2 + $0x1e9] sm:$0xff]  ;;  %v3116_v30 = vsel %vm2878_vm10, %v3052_v58, %v5554_v50  ;;  %v2989_v62 = vsel %vm129_vm1, %v938_v52, %v5558_v1  ;;  %v5563_v21 = vunpack.i.l.bf16 %v7970_v12  ;;  %v1180_v4 = vld [vmem:[#allocation2 + $0x231] sm:$0xff] }
 0x44a   :  { %3640 = vmatmul.mubr.f32.gmra.mrb[54].mxu1 %v2920_v44  ;;  %4561 = vmatprep.mubr.msk.f32.mxu0 %vm129_vm1, %v1169_v60  ;;  %v7985_v59 = vpop.permute.xlu1 %5566  ;;  %v681_v60 = vld [vmem:[#allocation2 + $0x30f] sm:$0xff]  ;;  %v5008_v54 = vunpack.i.l.bf16 %v9069_v7  ;;  %v5168_v8 = vunpack.i.l.bf16 %v9070_v6  ;;  %v5573_v46 = vunpack.i.l.bf16 %v7997_v43  ;;  %v2990_v35 = vsel %vm129_vm1, %v939_v45, %v5559_v23  ;;  %v9073_v58 = vld [vmem:[#allocation89_spill] sm:$0xff]  ;;  %v684_v52 = vld [vmem:[#allocation2 + $0x347] sm:$0xff] }
 0x44b   :  { %3644 = vmatprep.mubr.f32.mxu1 %v3113_v57  ;;  %v5568_v20 = vunpack.i.l.bf16 %v7985_v59  ;;  %v2794_v57 = vsel %vm129_vm1, %v681_v60, %v4854_v28  ;;  %v4859_v9 = vunpack.i.h.bf16 %v9068_v47  ;;  %v2795_v37 = vsel %vm129_vm1, %v682_v10, %v4858_v63  ;;  %v683_v16 = vld [vmem:[#allocation2 + $0x32f] sm:$0xff]  ;;  %v8072_v50 = vpop.permute.xlu0 %5601 }
 0x44c   :  { %v2859_v61 = vsel %vm2813_vm9, %v2794_v57, %v5004_v53  ;;  %v5009_v11 = vunpack.i.h.bf16 %v9069_v7  ;;  %v2860_v56 = vsel %vm2813_vm9, %v2795_v37, %v5008_v54  ;;  %v5169_v13 = vunpack.i.h.bf16 %v9070_v6  ;;  %v941_v38 = vld [vmem:[#allocation2 + $0x370] sm:$0xff] }
 0x44d   :  { %4562 = vmatmul.mubr.msk.f32.gmra.mrb[52].mxu0 %vm129_vm1, %v1170_v3  ;;  %v2924_v26 = vsel %vm2878_vm10, %v2859_v61, %v5164_v19  ;;  %v3053_v3 = vsel %vm2813_vm9, %v2989_v62, %v5563_v21  ;;  %v5583_v28 = vunpack.i.l.bf16 %v8021_v27  ;;  %v5173_v53 = vunpack.i.l.bf16 %v9073_v58  ;;  %v1182_v63 = vld [vmem:[#allocation2 + $0x291] sm:$0xff]  ;;  %v1183_v54 = vld [vmem:[#allocation2 + $0x2a9] sm:$0xff] }
 0x44e   :  { %3645 = vmatmul.mubr.f32.gmra.mrb[56].mxu1 %v2921_v5  ;;  %4564 = vmatprep.mubr.msk.f32.mxu0 %vm129_vm1, %v1171_v36  ;;  %v8004_v29 = vpop.permute.xlu1 %5576  ;;  %v5569_v5 = vunpack.i.h.bf16 %v7985_v59  ;;  %v3117_v36 = vsel %vm2878_vm10, %v3053_v3, %v5568_v20  ;;  %v1179_v59 = vld [vmem:[#allocation2 + $0x229] sm:$0xff]  ;;  %v5014_v62 = vunpack.i.h.bf16 %v9072_v2  ;;  %v5584_v47 = vunpack.i.h.bf16 %v8021_v27 }
 0x44f   :  { %3649 = vmatprep.mubr.f32.mxu1 %v3114_v42  ;;  %v5564_v42 = vunpack.i.h.bf16 %v7970_v12  ;;  %v5578_v15 = vunpack.i.l.bf16 %v8004_v29  ;;  %v2925_v12 = vsel %vm2878_vm10, %v2860_v56, %v5168_v8  ;;  %v5579_v1 = vunpack.i.h.bf16 %v8004_v29  ;;  %v1181_v29 = vld [vmem:[#allocation2 + $0x289] sm:$0xff] }
 0x450   :  { %v5174_v57 = vunpack.i.h.bf16 %v9073_v58  ;;  %v685_v8 = vld [vmem:[#allocation2 + $0x34f] sm:$0xff]  ;;  %v5593_v45 = vunpack.i.l.bf16 %v8048_v41  ;;  %v5603_v56 = vunpack.i.l.bf16 %v8072_v50 }
 0x451   :  { %4565 = vmatmul.mubr.msk.f32.gmra.mrb[54].mxu0 %vm129_vm1, %v1172_v0  ;;  %v3054_v40 = vsel %vm2813_vm9, %v2990_v35, %v5564_v42  ;;  %v5574_v0 = vunpack.i.h.bf16 %v7997_v43  ;;  %v5013_v43 = vunpack.i.l.bf16 %v9072_v2  ;;  %v1184_v35 = vld [vmem:[#allocation2 + $0x2b1] sm:$0xff]  ;;  %v9076_v42 = vld [vmem:[#allocation99_spill] sm:$0xff] }
 0x452   :  { %3650 = vmatmul.mubr.f32.gmra.mrb[58].mxu1 %v2922_v14  ;;  %4567 = vmatprep.mubr.msk.f32.mxu0 %vm129_vm1, %v1173_v18  ;;  %v8027_v44 = vpop.permute.xlu1 %5586  ;;  %v3118_v48 = vsel %vm2878_vm10, %v3054_v40, %v5569_v5  ;;  %v2991_v14 = vsel %vm129_vm1, %v940_v24, %v5573_v46  ;;  %v9071_v18 = vld [vmem:[#allocation31_spill] sm:$0xff]  ;;  %v8098_v46 = vpop.permute.xlu0 %5611 }
 0x453   :  { %3654 = vmatprep.mubr.f32.mxu1 %v3115_v49  ;;  %v4863_v34 = vunpack.i.l.bf16 %v9071_v18  ;;  %v2796_v49 = vsel %vm129_vm1, %v683_v16, %v4859_v9  ;;  %v3055_v55 = vsel %vm2813_vm9, %v2991_v14, %v5578_v15  ;;  %v5588_v19 = vunpack.i.l.bf16 %v8027_v44  ;;  %v686_v40 = vld [vmem:[#allocation2 + $0x367] sm:$0xff]  ;;  %v687_v58 = vld [vmem:[#allocation2 + $0x36f] sm:$0xff] }
 0x454   :  { %v2861_v39 = vsel %vm2813_vm9, %v2796_v49, %v5009_v11  ;;  %v2992_v23 = vsel %vm129_vm1, %v941_v38, %v5574_v0  ;;  %v4864_v20 = vunpack.i.h.bf16 %v9071_v18  ;;  %v5589_v61 = vunpack.i.h.bf16 %v8027_v44  ;;  %v9075_v44 = vld [vmem:[#allocation70_spill] sm:$0xff]  ;;  %v944_v2 = vld [vmem:[#allocation2 + $0x3a8] sm:$0xff] }
 0x455   :  { %4568 = vmatmul.mubr.msk.f32.gmra.mrb[56].mxu0 %vm129_vm1, %v1174_v17  ;;  %v2926_v17 = vsel %vm2878_vm10, %v2861_v39, %v5169_v13  ;;  %v3056_v60 = vsel %vm2813_vm9, %v2992_v23, %v5579_v1  ;;  %v5178_v15 = vunpack.i.l.bf16 %v9076_v42  ;;  %v5019_v14 = vunpack.i.h.bf16 %v9075_v44 }
 0x456   :  { %3655 = vmatmul.mubr.f32.gmra.mrb[60].mxu1 %v2923_v25  ;;  %4570 = vmatprep.mubr.msk.f32.mxu0 %vm129_vm1, %v1175_v33  ;;  %v3119_v33 = vsel %vm2878_vm10, %v3055_v55, %v5583_v28  ;;  %v3120_v27 = vsel %vm2878_vm10, %v3056_v60, %v5584_v47  ;;  %v2798_v5 = vsel %vm129_vm1, %v685_v8, %v4864_v20  ;;  %v8121_v1 = vpop.permute.xlu0 %5621  ;;  %v1187_v55 = vld [vmem:[#allocation2 + $0x2e9] sm:$0xff]  ;;  %v5613_v23 = vunpack.i.l.bf16 %v8098_v46  ;;  %v1188_v20 = vld [vmem:[#allocation2 + $0x2f1] sm:$0xff] }
 0x457   :  { %3659 = vmatprep.mubr.f32.mxu1 %v3116_v30  ;;  %v8053_v22 = vpop.permute.xlu1 %5596  ;;  %v2797_v30 = vsel %vm129_vm1, %v684_v52, %v4863_v34  ;;  %v2863_v9 = vsel %vm2813_vm9, %v2798_v5, %v5014_v62  ;;  %v5179_v34 = vunpack.i.h.bf16 %v9076_v42  ;;  %v9079_v60 = vld [vmem:[#allocation91_spill] sm:$0xff] }
 0x458   :  { %v2862_v21 = vsel %vm2813_vm9, %v2797_v30, %v5013_v43  ;;  %v5598_v6 = vunpack.i.l.bf16 %v8053_v22  ;;  %v2928_v37 = vsel %vm2878_vm10, %v2863_v9, %v5174_v57  ;;  %v5599_v13 = vunpack.i.h.bf16 %v8053_v22  ;;  %v1186_v22 = vld [vmem:[#allocation2 + $0x2d1] sm:$0xff] }
 0x459   :  { %4571 = vmatmul.mubr.msk.f32.gmra.mrb[58].mxu0 %vm129_vm1, %v1176_v32  ;;  %v2927_v7 = vsel %vm2878_vm10, %v2862_v21, %v5173_v53  ;;  %v942_v32 = vld [vmem:[#allocation2 + $0x388] sm:$0xff]  ;;  %v5604_v43 = vunpack.i.h.bf16 %v8072_v50  ;;  %v2995_v53 = vsel %vm129_vm1, %v944_v2, %v5603_v56  ;;  %v9078_v50 = vld [vmem:[#allocation60_spill] sm:$0xff]  ;;  %v5183_v62 = vunpack.i.l.bf16 %v9079_v60 }
 0x45a   :  { %3660 = vmatmul.mubr.f32.gmra.mrb[62].mxu1 %v2924_v26  ;;  %4573 = vmatprep.mubr.msk.f32.mxu0 %vm129_vm1, %v1177_v51  ;;  %v2993_v26 = vsel %vm129_vm1, %v942_v32, %v5588_v19  ;;  %v9074_v51 = vld [vmem:[#allocation39_spill] sm:$0xff]  ;;  %v5023_v52 = vunpack.i.l.bf16 %v9078_v50  ;;  %v5024_v8 = vunpack.i.h.bf16 %v9078_v50  ;;  %v5184_v5 = vunpack.i.h.bf16 %v9079_v60  ;;  %v9083_v60 = vld [vmem:[#allocation36_spill] sm:$0xff] }
 0x45b   :  { %3664 = vmatprep.mubr.f32.mxu1 %v3117_v36  ;;  %v8077_v25 = vpop.permute.xlu1 %5606  ;;  %v4868_v3 = vunpack.i.l.bf16 %v9074_v51  ;;  %v5018_v36 = vunpack.i.l.bf16 %v9075_v44  ;;  %v3057_v11 = vsel %vm2813_vm9, %v2993_v26, %v5593_v45  ;;  %v4869_v0 = vunpack.i.h.bf16 %v9074_v51 }
 0x45c   :  { %v5609_v38 = vunpack.i.h.bf16 %v8077_v25  ;;  %v5614_v26 = vunpack.i.h.bf16 %v8098_v46 }
 0x45d   :  { %4574 = vmatmul.mubr.msk.f32.gmra.mrb[60].mxu0 %vm129_vm1, %v1178_v31  ;;  %v943_v31 = vld [vmem:[#allocation2 + $0x390] sm:$0xff]  ;;  %v2799_v16 = vsel %vm129_vm1, %v686_v40, %v4868_v3  ;;  %v2800_v19 = vsel %vm129_vm1, %v687_v58, %v4869_v0 }
 0x45e   :  { %3665 = vmatmul.mubr.f32.gmra.mrb[64].mxu1 %v2925_v12  ;;  %4576 = vmatprep.mubr.msk.f32.mxu0 %vm129_vm1, %v1179_v59  ;;  %v1185_v59 = vld [vmem:[#allocation2 + $0x2c9] sm:$0xff]  ;;  %v3121_v12 = vsel %vm2878_vm10, %v3057_v11, %v5598_v6  ;;  %v2994_v24 = vsel %vm129_vm1, %v943_v31, %v5589_v61  ;;  %v2864_v18 = vsel %vm2813_vm9, %v2799_v16, %v5018_v36  ;;  %v8147_v61 = vpop.permute.xlu0 %5631  ;;  %v1190_v3 = vld [vmem:[#allocation2 + $0x311] sm:$0xff]  ;;  %v5623_v31 = vunpack.i.l.bf16 %v8121_v1 }
 0x45f   :  { %3669 = vmatprep.mubr.f32.mxu1 %v3118_v48  ;;  %v5594_v48 = vunpack.i.h.bf16 %v8048_v41  ;;  %v2929_v49 = vsel %vm2878_vm10, %v2864_v18, %v5178_v15  ;;  %v2865_v30 = vsel %vm2813_vm9, %v2800_v19, %v5019_v14  ;;  %v1191_v36 = vld [vmem:[#allocation2 + $0x329] sm:$0xff]  ;;  %v5633_v18 = vunpack.i.l.bf16 %v8147_v61 }
 0x460   :  { %v2930_v47 = vsel %vm2878_vm10, %v2865_v30, %v5179_v34  ;;  %v689_v15 = vld [vmem:[#allocation2 + $0x38f] sm:$0xff] }
 0x461   :  { %4577 = vmatmul.mubr.msk.f32.gmra.mrb[62].mxu0 %vm129_vm1, %v1180_v4  ;;  %v8102_v10 = vpop.permute.xlu1 %5616  ;;  %v5608_v4 = vunpack.i.l.bf16 %v8077_v25  ;;  %v3058_v41 = vsel %vm2813_vm9, %v2994_v24, %v5594_v48  ;;  %v945_v25 = vld [vmem:[#allocation2 + $0x3b0] sm:$0xff]  ;;  %v9082_v24 = vld [vmem:[#allocation6_spill] sm:$0xff] }
 0x462   :  { %3670 = vmatmul.mubr.f32.gmra.mrb[66].mxu1 %v2926_v17  ;;  %4579 = vmatprep.mubr.msk.f32.mxu0 %vm129_vm1, %v1181_v29  ;;  %v3122_v39 = vsel %vm2878_vm10, %v3058_v41, %v5599_v13  ;;  %v9077_v17 = vld [vmem:[#allocation33_spill] sm:$0xff]  ;;  %v5618_v21 = vunpack.i.l.bf16 %v8102_v10  ;;  %v5619_v9 = vunpack.i.h.bf16 %v8102_v10  ;;  %v9081_v13 = vld [vmem:[#allocation72_spill] sm:$0xff]  ;;  %v5188_v0 = vunpack.i.l.bf16 %v9082_v24  ;;  %v8170_v48 = vpop.permute.xlu0 %5641  ;;  %v690_v41 = vld [vmem:[#allocation2 + $0x3a7] sm:$0xff] }
 0x463   :  { %3674 = vmatprep.mubr.f32.mxu1 %v3119_v33  ;;  %v4873_v29 = vunpack.i.l.bf16 %v9077_v17  ;;  %v3059_v33 = vsel %vm2813_vm9, %v2995_v53, %v5608_v4  ;;  %v4874_v32 = vunpack.i.h.bf16 %v9077_v17  ;;  %v1192_v10 = vld [vmem:[#allocation2 + $0x331] sm:$0xff]  ;;  %v1193_v16 = vld [vmem:[#allocation2 + $0x349] sm:$0xff] }
 0x464   :  { %v3123_v57 = vsel %vm2878_vm10, %v3059_v33, %v5613_v23  ;;  %v1194_v17 = vld [vmem:[#allocation2 + $0x351] sm:$0xff]  ;;  %v1195_v33 = vld [vmem:[#allocation2 + $0x369] sm:$0xff] }
 0x465   :  { %4580 = vmatmul.mubr.msk.f32.gmra.mrb[64].mxu0 %vm129_vm1, %v1182_v63  ;;  %v8127_v28 = vpop.permute.xlu1 %5626  ;;  %v1189_v63 = vld [vmem:[#allocation2 + $0x309] sm:$0xff]  ;;  %v2802_v56 = vsel %vm129_vm1, %v689_v15, %v4874_v32  ;;  %v5644_v15 = vunpack.i.h.bf16 %v8170_v48 }
 0x466   :  { %3675 = vmatmul.mubr.f32.gmra.mrb[68].mxu1 %v2927_v7  ;;  %4582 = vmatprep.mubr.msk.f32.mxu0 %vm129_vm1, %v1183_v54  ;;  %v688_v7 = vld [vmem:[#allocation2 + $0x387] sm:$0xff]  ;;  %v2996_v54 = vsel %vm129_vm1, %v945_v25, %v5604_v43  ;;  %v5628_v42 = vunpack.i.l.bf16 %v8127_v28  ;;  %v2867_v40 = vsel %vm2813_vm9, %v2802_v56, %v5024_v8  ;;  %v5629_v34 = vunpack.i.h.bf16 %v8127_v28 }
 0x467   :  { %3679 = vmatprep.mubr.f32.mxu1 %v3120_v27  ;;  %v2801_v6 = vsel %vm129_vm1, %v688_v7, %v4873_v29  ;;  %v3060_v27 = vsel %vm2813_vm9, %v2996_v54, %v5609_v38  ;;  %v2932_v4 = vsel %vm2878_vm10, %v2867_v40, %v5184_v5  ;;  %v5029_v28 = vunpack.i.h.bf16 %v9081_v13 }
 0x468   :  { %v2866_v45 = vsel %vm2813_vm9, %v2801_v6, %v5023_v52  ;;  %v3124_v46 = vsel %vm2878_vm10, %v3060_v27, %v5614_v26  ;;  %v5189_v38 = vunpack.i.h.bf16 %v9082_v24  ;;  %v5634_v52 = vunpack.i.h.bf16 %v8147_v61  ;;  %v1196_v61 = vld [vmem:[#allocation2 + $0x371] sm:$0xff] }
 0x469   :  { %4583 = vmatmul.mubr.msk.f32.gmra.mrb[66].mxu0 %vm129_vm1, %v1184_v35  ;;  %v8153_v51 = vpop.permute.xlu1 %5636  ;;  %v2931_v44 = vsel %vm2878_vm10, %v2866_v45, %v5183_v62  ;;  %v946_v35 = vld [vmem:[#allocation2 + $0x3c8] sm:$0xff]  ;;  %v4883_v62 = vunpack.i.l.bf16 %v9083_v60  ;;  %v5643_v54 = vunpack.i.l.bf16 %v8170_v48  ;;  %v9085_v27 = vld [vmem:[#allocation92_spill] sm:$0xff] }
 0x46a   :  { %3680 = vmatmul.mubr.f32.gmra.mrb[70].mxu1 %v2928_v37  ;;  %4585 = vmatprep.mubr.msk.f32.mxu0 %vm129_vm1, %v1185_v59  ;;  %v2997_v37 = vsel %vm129_vm1, %v946_v35, %v5618_v21  ;;  %v9080_v59 = vld [vmem:[#allocation40_spill] sm:$0xff]  ;;  %v5638_v58 = vunpack.i.l.bf16 %v8153_v51  ;;  %v5193_v8 = vunpack.i.l.bf16 %v9085_v27  ;;  %v4884_v35 = vunpack.i.h.bf16 %v9083_v60 }
 0x46b   :  { %3684 = vmatprep.mubr.f32.mxu1 %v3121_v12  ;;  %v4878_v11 = vunpack.i.l.bf16 %v9080_v59  ;;  %v5028_v12 = vunpack.i.l.bf16 %v9081_v13  ;;  %v3061_v14 = vsel %vm2813_vm9, %v2997_v37, %v5623_v31  ;;  %v4879_v43 = vunpack.i.h.bf16 %v9080_v59  ;;  %v1198_v37 = vld [vmem:[#allocation2 + $0x391] sm:$0xff]  ;;  %v1199_v13 = vld [vmem:[#allocation2 + $0x3a9] sm:$0xff] }
 0x46c   :  { %v693_v48 = vld [vmem:[#allocation2 + $0x3cf] sm:$0xff] }
 0x46d   :  { %4586 = vmatmul.mubr.msk.f32.gmra.mrb[68].mxu0 %vm129_vm1, %v1186_v22  ;;  %v947_v22 = vld [vmem:[#allocation2 + $0x3d0] sm:$0xff]  ;;  %v2803_v53 = vsel %vm129_vm1, %v690_v41, %v4878_v11  ;;  %v5194_v11 = vunpack.i.h.bf16 %v9085_v27  ;;  %v9089_v27 = vld [vmem:[#allocation38_spill] sm:$0xff] }
 0x46e   :  { %3685 = vmatmul.mubr.f32.gmra.mrb[72].mxu1 %v2929_v49  ;;  %4588 = vmatprep.mubr.msk.f32.mxu0 %vm129_vm1, %v1187_v55  ;;  %v8177_v49 = vpop.permute.xlu1 %5646  ;;  %v3125_v55 = vsel %vm2878_vm10, %v3061_v14, %v5628_v42  ;;  %v2998_v2 = vsel %vm129_vm1, %v947_v22, %v5619_v9  ;;  %v2868_v29 = vsel %vm2813_vm9, %v2803_v53, %v5028_v12  ;;  %v950_v12 = vld [vmem:[#allocation2 + $0x408] sm:$0xff] }
 0x46f   :  { %3689 = vmatprep.mubr.f32.mxu1 %v3122_v39  ;;  %v5624_v39 = vunpack.i.h.bf16 %v8121_v1  ;;  %v2933_v19 = vsel %vm2878_vm10, %v2868_v29, %v5188_v0  ;;  %v948_v1 = vld [vmem:[#allocation2 + $0x3e8] sm:$0xff]  ;;  %v5648_v45 = vunpack.i.l.bf16 %v8177_v49 }
 0x470   :  { %v2999_v30 = vsel %vm129_vm1, %v948_v1, %v5633_v18  ;;  %v2806_v18 = vsel %vm129_vm1, %v693_v48, %v4884_v35  ;;  %v1206_v48 = vld [vmem:[#allocation2 + $0x411] sm:$0xff] }
 0x471   :  { %4589 = vmatmul.mubr.msk.f32.gmra.mrb[70].mxu0 %vm129_vm1, %v1188_v20  ;;  %v3062_v50 = vsel %vm2813_vm9, %v2998_v2, %v5624_v39  ;;  %v691_v20 = vld [vmem:[#allocation2 + $0x3af] sm:$0xff]  ;;  %v3063_v21 = vsel %vm2813_vm9, %v2999_v30, %v5638_v58  ;;  %v9088_v2 = vld [vmem:[#allocation106_spill] sm:$0xff] }
 0x472   :  { %3690 = vmatmul.mubr.f32.gmra.mrb[74].mxu1 %v2930_v47  ;;  %4591 = vmatprep.mubr.msk.f32.mxu0 %vm129_vm1, %v1189_v63  ;;  %v3126_v23 = vsel %vm2878_vm10, %v3062_v50, %v5629_v34  ;;  %v8197_v47 = vpop.permute.xlu0 %5651  ;;  %v5639_v63 = vunpack.i.h.bf16 %v8153_v51  ;;  %v2804_v25 = vsel %vm129_vm1, %v691_v20, %v4879_v43  ;;  %v8204_v32 = vpop.permute.xlu1 %5656  ;;  %v1197_v51 = vld [vmem:[#allocation2 + $0x389] sm:$0xff]  ;;  %v3127_v5 = vsel %vm2878_vm10, %v3063_v21, %v5643_v54  ;;  %v9087_v34 = vld [vmem:[#allocation74_spill] sm:$0xff] }
 0x473   :  { %3694 = vmatprep.mubr.f32.mxu1 %v3123_v57  ;;  %v9084_v57 = vld [vmem:[#allocation62_spill] sm:$0xff]  ;;  %v2869_v6 = vsel %vm2813_vm9, %v2804_v25, %v5029_v28  ;;  %v5658_v40 = vunpack.i.l.bf16 %v8204_v32  ;;  %v5653_v22 = vunpack.i.l.bf16 %v8197_v47  ;;  %v5198_v43 = vunpack.i.l.bf16 %v9088_v2  ;;  %v1201_v58 = vld [vmem:[#allocation2 + $0x3c9] sm:$0xff] }
 0x474   :  { %v5033_v7 = vunpack.i.l.bf16 %v9084_v57  ;;  %v2934_v26 = vsel %vm2878_vm10, %v2869_v6, %v5189_v38  ;;  %v951_v28 = vld [vmem:[#allocation2 + $0x410] sm:$0xff]  ;;  %v5659_v29 = vunpack.i.h.bf16 %v8204_v32  ;;  %v5654_v1 = vunpack.i.h.bf16 %v8197_v47 }
 0x475   :  { %4592 = vmatmul.mubr.msk.f32.gmra.mrb[72].mxu0 %vm129_vm1, %v1190_v3  ;;  %v949_v3 = vld [vmem:[#allocation2 + $0x3f0] sm:$0xff]  ;;  %v5039_v30 = vunpack.i.h.bf16 %v9087_v34  ;;  %v5199_v25 = vunpack.i.h.bf16 %v9088_v2 }
 0x476   :  { %3695 = vmatmul.mubr.f32.gmra.mrb[76].mxu1 %v2931_v44  ;;  %4594 = vmatprep.mubr.msk.f32.mxu0 %vm129_vm1, %v1191_v36  ;;  %v692_v44 = vld [vmem:[#allocation2 + $0x3c7] sm:$0xff]  ;;  %v3000_v36 = vsel %vm129_vm1, %v949_v3, %v5634_v52  ;;  %v8221_v31 = vpop.permute.xlu0 %5661  ;;  %v8227_v24 = vpop.permute.xlu1 %5666 }
 0x477   :  { %3699 = vmatprep.mubr.f32.mxu1 %v3124_v46  ;;  %v2805_v9 = vsel %vm129_vm1, %v692_v44, %v4883_v62  ;;  %v3064_v42 = vsel %vm2813_vm9, %v3000_v36, %v5639_v63  ;;  %v5034_v46 = vunpack.i.h.bf16 %v9084_v57  ;;  %v1202_v62 = vld [vmem:[#allocation2 + $0x3d1] sm:$0xff]  ;;  %v1203_v57 = vld [vmem:[#allocation2 + $0x3e9] sm:$0xff]  ;;  %v5664_v54 = vunpack.i.h.bf16 %v8221_v31 }
 0x478   :  { %v2870_v59 = vsel %vm2813_vm9, %v2805_v9, %v5033_v7  ;;  %v3128_v0 = vsel %vm2878_vm10, %v3064_v42, %v5644_v15  ;;  %v952_v7 = vld [vmem:[#allocation2 + $0x428] sm:$0xff]  ;;  %v1204_v36 = vld [vmem:[#allocation2 + $0x3f1] sm:$0xff]  ;;  %v9091_v9 = vld [vmem:[#allocation94_spill] sm:$0xff] }
 0x479   :  { %4595 = vmatmul.mubr.msk.f32.gmra.mrb[74].mxu0 %vm129_vm1, %v1192_v10  ;;  %v2935_v56 = vsel %vm2878_vm10, %v2870_v59, %v5193_v8  ;;  %v5649_v10 = vunpack.i.h.bf16 %v8177_v49  ;;  %v5038_v49 = vunpack.i.l.bf16 %v9087_v34  ;;  %v2871_v41 = vsel %vm2813_vm9, %v2806_v18, %v5034_v46  ;;  %v953_v59 = vld [vmem:[#allocation2 + $0x430] sm:$0xff] }
 0x47a   :  { %3700 = vmatmul.mubr.f32.gmra.mrb[78].mxu1 %v2932_v4  ;;  %4597 = vmatprep.mubr.msk.f32.mxu0 %vm129_vm1, %v1193_v16  ;;  %v3001_v4 = vsel %vm129_vm1, %v950_v12, %v5648_v45  ;;  %v9086_v16 = vld [vmem:[#allocation42_spill] sm:$0xff]  ;;  %v2936_v39 = vsel %vm2878_vm10, %v2871_v41, %v5194_v11  ;;  %v5672_v52 = vpop.permute.xlu0 %5671  ;;  %v2170_v60 = vpop.permute.xlu1 %2169  ;;  %v4893_v8 = vunpack.i.l.bf16 %v9089_v27  ;;  %v9090_v45 = vld [vmem:[#allocation64_spill] sm:$0xff]  ;;  %v5203_v42 = vunpack.i.l.bf16 %v9091_v9 }
 0x47b   :  { %3704 = vmatprep.mubr.f32.mxu1 %v3125_v55  ;;  %v4888_v14 = vunpack.i.l.bf16 %v9086_v16  ;;  %v1200_v55 = vld [vmem:[#allocation2 + $0x3b1] sm:$0xff]  ;;  %v3065_v53 = vsel %vm2813_vm9, %v3001_v4, %v5653_v22  ;;  %v4889_v50 = vunpack.i.h.bf16 %v9086_v16  ;;  %v5673_v44 = vunpack.i.l.bf16 %v5672_v52  ;;  %v1207_v18 = vld [vmem:[#allocation2 + $0x429] sm:$0xff] }
 0x47c   :  { %v3129_v38 = vsel %vm2878_vm10, %v3065_v53, %v5658_v40  ;;  %v4894_v12 = vunpack.i.h.bf16 %v9089_v27  ;;  %v5204_v16 = vunpack.i.h.bf16 %v9091_v9  ;;  %v9092_v41 = vld [vmem:[#allocation44_spill] sm:$0xff] }
 0x47d   :  { %4598 = vmatmul.mubr.msk.f32.gmra.mrb[76].mxu0 %vm129_vm1, %v1194_v17  ;;  %v5663_v17 = vunpack.i.l.bf16 %v8221_v31  ;;  %v4898_v2 = vunpack.i.l.bf16 %v9092_v41  ;;  %v699_v27 = vld [vmem:[#allocation2 + $0x42f] sm:$0xff] }
 0x47e   :  { %3705 = vmatmul.mubr.f32.gmra.mrb[80].mxu1 %v2933_v19  ;;  %4600 = vmatprep.mubr.msk.f32.mxu0 %vm129_vm1, %v1195_v33  ;;  %v694_v19 = vld [vmem:[#allocation2 + $0x3e7] sm:$0xff]  ;;  %v3002_v33 = vsel %vm129_vm1, %v951_v28, %v5649_v10  ;;  %v2426_v46 = vpop.permute.xlu0 %2425  ;;  %v2682_v11 = vpop.permute.xlu1 %2681 }
 0x47f   :  { %3709 = vmatprep.mubr.f32.mxu1 %v3126_v23  ;;  %v5668_v23 = vunpack.i.l.bf16 %v8227_v24  ;;  %v2807_v20 = vsel %vm129_vm1, %v694_v19, %v4888_v14  ;;  %v3066_v47 = vsel %vm2813_vm9, %v3002_v33, %v5654_v1  ;;  %v3003_v6 = vsel %vm129_vm1, %v952_v7, %v5663_v17  ;;  %v954_v14 = vld [vmem:[#allocation2 + $0x448] sm:$0xff]  ;;  %v1208_v17 = vld [vmem:[#allocation2 + $0x431] sm:$0xff] }
 0x480   :  { %v2872_v63 = vsel %vm2813_vm9, %v2807_v20, %v5038_v49  ;;  %v3130_v32 = vsel %vm2878_vm10, %v3066_v47, %v5659_v29  ;;  %v3005_v34 = vsel %vm129_vm1, %v954_v14, %v2170_v60  ;;  %v955_v33 = vld [vmem:[#allocation2 + $0x450] sm:$0xff]  ;;  %v4899_v60 = vunpack.i.h.bf16 %v9092_v41 }
 0x481   :  { %4601 = vmatmul.mubr.msk.f32.gmra.mrb[78].mxu0 %vm129_vm1, %v1196_v61  ;;  %v2937_v21 = vsel %vm2878_vm10, %v2872_v63, %v5198_v43  ;;  %v695_v61 = vld [vmem:[#allocation2 + $0x3ef] sm:$0xff]  ;;  %v3067_v3 = vsel %vm2813_vm9, %v3003_v6, %v5668_v23 }
 0x482   :  { %3710 = vmatmul.mubr.f32.gmra.mrb[82].mxu1 %v2934_v26  ;;  %4603 = vmatprep.mubr.msk.f32.mxu0 %vm129_vm1, %v1197_v51  ;;  %v5669_v26 = vunpack.i.h.bf16 %v8227_v24  ;;  %v2808_v51 = vsel %vm129_vm1, %v695_v61, %v4889_v50  ;;  %v3131_v31 = vsel %vm2878_vm10, %v3067_v3, %v5673_v44  ;;  %v5044_v24 = vunpack.i.h.bf16 %v9090_v45  ;;  %v2172_v43 = vpop.permute.xlu0 %2171  ;;  %v2428_v28 = vpop.permute.xlu1 %2427  ;;  %v1209_v1 = vld [vmem:[#allocation2 + $0x449] sm:$0xff]  ;;  %v1210_v47 = vld [vmem:[#allocation2 + $0x451] sm:$0xff] }
 0x483   :  { %3714 = vmatprep.mubr.f32.mxu1 %v3127_v5  ;;  %v5043_v5 = vunpack.i.l.bf16 %v9090_v45  ;;  %v2873_v35 = vsel %vm2813_vm9, %v2808_v51, %v5039_v30  ;;  %v3006_v23 = vsel %vm129_vm1, %v955_v33, %v2172_v43  ;;  %v698_v30 = vld [vmem:[#allocation2 + $0x427] sm:$0xff]  ;;  %v1212_v6 = vld [vmem:[#allocation2 + $0x471] sm:$0xff] }
 0x484   :  { %v2938_v15 = vsel %vm2878_vm10, %v2873_v35, %v5199_v25  ;;  %v2811_v25 = vsel %vm129_vm1, %v698_v30, %v4898_v2 }
 0x485   :  { %4604 = vmatmul.mubr.msk.f32.gmra.mrb[80].mxu0 %vm129_vm1, %v1198_v37  ;;  %v1205_v37 = vld [vmem:[#allocation2 + $0x409] sm:$0xff] }
 0x486   :  { %3715 = vmatmul.mubr.f32.gmra.mrb[84].mxu1 %v2935_v56  ;;  %4606 = vmatprep.mubr.msk.f32.mxu0 %vm129_vm1, %v1199_v13  ;;  %v696_v56 = vld [vmem:[#allocation2 + $0x407] sm:$0xff]  ;;  %v3004_v13 = vsel %vm129_vm1, %v953_v59, %v5664_v54  ;;  %v2684_v63 = vpop.permute.xlu0 %2683 }
 0x487   :  { %3719 = vmatprep.mubr.f32.mxu1 %v3128_v0  ;;  %v2809_v10 = vsel %vm129_vm1, %v696_v56, %v4893_v8  ;;  %v3068_v40 = vsel %vm2813_vm9, %v3004_v13, %v5669_v26  ;;  %v5674_v0 = vunpack.i.h.bf16 %v5672_v52  ;;  %v3069_v52 = vsel %vm2813_vm9, %v3005_v34, %v2426_v46 }
 0x488   :  { %v2874_v4 = vsel %vm2813_vm9, %v2809_v10, %v5043_v5  ;;  %v3133_v20 = vsel %vm2878_vm10, %v3069_v52, %v2682_v11  ;;  %v2812_v8 = vsel %vm129_vm1, %v699_v27, %v4899_v60 }
 0x489   :  { %4607 = vmatmul.mubr.msk.f32.gmra.mrb[82].mxu0 %vm129_vm1, %v1200_v55  ;;  %v2939_v22 = vsel %vm2878_vm10, %v2874_v4, %v5203_v42  ;;  %v3132_v49 = vsel %vm2878_vm10, %v3068_v40, %v5674_v0  ;;  %v697_v55 = vld [vmem:[#allocation2 + $0x40f] sm:$0xff] }
 0x48a   :  { %3720 = vmatmul.mubr.f32.gmra.mrb[86].mxu1 %v2936_v39  ;;  %4609 = vmatprep.mubr.msk.f32.mxu0 %vm129_vm1, %v1201_v58  ;;  %v2810_v39 = vsel %vm129_vm1, %v697_v55, %v4894_v12  ;;  %v9093_v58 = vld [vmem:[#allocation76_spill] sm:$0xff] }
 0x48b   :  { %3724 = vmatprep.mubr.f32.mxu1 %v3129_v38  ;;  %v5048_v53 = vunpack.i.l.bf16 %v9093_v58  ;;  %v2875_v29 = vsel %vm2813_vm9, %v2810_v39, %v5044_v24  ;;  %v9094_v38 = vld [vmem:[#allocation124_spill] sm:$0xff] }
 0x48c   :  { %v5208_v19 = vunpack.i.l.bf16 %v9094_v38  ;;  %v2940_v50 = vsel %vm2878_vm10, %v2875_v29, %v5204_v16  ;;  %v5209_v54 = vunpack.i.h.bf16 %v9094_v38 }
 0x48d   :  { %4610 = vmatmul.mubr.msk.f32.gmra.mrb[84].mxu0 %vm129_vm1, %v1202_v62  ;;  %v3070_v62 = vsel %vm2813_vm9, %v3006_v23, %v2428_v28  ;;  %v2876_v7 = vsel %vm2813_vm9, %v2811_v25, %v5048_v53 }
 0x48e   :  { %3725 = vmatmul.mubr.f32.gmra.mrb[88].mxu1 %v2937_v21  ;;  %4612 = vmatprep.mubr.msk.f32.mxu0 %vm129_vm1, %v1203_v57  ;;  %v1211_v21 = vld [vmem:[#allocation2 + $0x469] sm:$0xff]  ;;  %v5049_v57 = vunpack.i.h.bf16 %v9093_v58  ;;  %v3134_v61 = vsel %vm2878_vm10, %v3070_v62, %v2684_v63 }
 0x48f   :  { %3729 = vmatprep.mubr.f32.mxu1 %v3130_v32  ;;  %v2941_v32 = vsel %vm2878_vm10, %v2876_v7, %v5208_v19 }
 0x490   :  { %v2877_v51 = vsel %vm2813_vm9, %v2812_v8, %v5049_v57 }
 0x491   :  { %4613 = vmatmul.mubr.msk.f32.gmra.mrb[86].mxu0 %vm129_vm1, %v1204_v36  ;;  %v2942_v45 = vsel %vm2878_vm10, %v2877_v51, %v5209_v54 }
 0x492   :  { %3730 = vmatmul.mubr.f32.gmra.mrb[90].mxu1 %v2938_v15  ;;  %4615 = vmatprep.mubr.msk.f32.mxu0 %vm129_vm1, %v1205_v37 }
 0x493   :  { %3734 = vmatprep.mubr.f32.mxu1 %v3131_v31 }
 0x495   :  { %4616 = vmatmul.mubr.msk.f32.gmra.mrb[88].mxu0 %vm129_vm1, %v1206_v48 }
 0x496   :  { %3735 = vmatmul.mubr.f32.gmra.mrb[92].mxu1 %v2939_v22  ;;  %4618 = vmatprep.mubr.msk.f32.mxu0 %vm129_vm1, %v1207_v18 }
 0x497   :  { %3739 = vmatprep.mubr.f32.mxu1 %v3132_v49 }
 0x499   :  { %4619 = vmatmul.mubr.msk.f32.gmra.mrb[90].mxu0 %vm129_vm1, %v1208_v17 }
 0x49a   :  { %3740 = vmatmul.mubr.f32.gmra.mrb[94].mxu1 %v2940_v50  ;;  %4621 = vmatprep.mubr.msk.f32.mxu0 %vm129_vm1, %v1209_v1  ;;  %v8305_v26 = vpop.f32.mrb[2].mxu1 }
 0x49b   :  { %3744 = vmatprep.mubr.f32.mxu1 %v3133_v20  ;;  %v3513_v3 = vpop.f32.mrb[3].mxu1 }
 0x49d   :  { %4622 = vmatmul.mubr.msk.f32.gmra.mrb[92].mxu0 %vm129_vm1, %v1210_v47 }
 0x49e   :  { %3745 = vmatmul.mubr.f32.gmra.mrb[96].mxu1 %v2941_v32  ;;  %4624 = vmatprep.mubr.msk.f32.mxu0 %vm129_vm1, %v1211_v21  ;;  %v8310_v5 = vpop.f32.mrb[4].mxu1 }
 0x49f   :  { %3749 = vmatprep.mubr.f32.mxu1 %v3134_v61  ;;  %v3518_v44 = vpop.f32.mrb[5].mxu1  ;;  %v3436_v36 = vpop.f32.mrb[2].mxu0 }
 0x4a0   :  { %v3438_v35 = vpop.f32.mrb[3].mxu0 }
 0x4a1   :  { %4625 = vmatmul.mubr.msk.f32.gmra.mrb[94].mxu0 %vm129_vm1, %v1212_v6 }
 0x4a2   :  { %3750 = vmatmul.mubr.f32.gmra.mrb[98].mxu1 %v2942_v45  ;;  %v8363_v45 = vld [vmem:[%s8621_s4] ss:$0 sm:$0xff]  ;;  %s5709_s4 = smov [#allocation3]  }
 0x4a3   :  { %v8312_v9 = vpop.f32.mrb[6].mxu1  ;;  %v3437_v35 = vadd.f32 %v8363_v45, %v3436_v36  ;;  %s4353_s8 = sshll.u32 %s5709_s4, 4  ;;  %s4354_s8 = int_to_ptr.vmem [resolvable:$true] %s4353_s8 }
 0x4a4   :  { %v3523_v42 = vpop.f32.mrb[7].mxu1  ;;  %s5679_s9 = scalar_lea.vmem %s4354_s8, 2048  ;;  %p5684_p1 = scmp.lt.s32.totalorder %s4354_s8, %s4354_s8 }
 0x4a5   :  { %p5680_p0 = scmp.ne.s32.totalorder %s4354_s8, %s5679_s9  ;;  %p5685_p2 = scmp.lt.s32.totalorder %s5679_s9, %s5679_s9 }
 0x4a7   :  { %v3441_v46 = vpop.f32.mrb[4].mxu0  ;;  %v8314_v37 = vpop.f32.mrb[8].mxu1  ;;  %p5686_p3 = por %p5685_p2, %p5684_p1 }
 0x4a8   :  { %v3443_v15 = vpop.f32.mrb[5].mxu0  ;;  %v3528_v59 = vpop.f32.mrb[9].mxu1  ;;  %v3442_v44 = vadd.f32 %v8363_v45, %v3441_v46 }
 0x4a9   :  { %p5687_p4 = pnand %p5686_p3, %p5680_p0 }
 0x4ac   :  { %v3446_v11 = vpop.f32.mrb[6].mxu0  ;;  %v8316_v31 = vpop.f32.mrb[10].mxu1 }
 0x4ad   :  { %v3448_v56 = vpop.f32.mrb[7].mxu0  ;;  %v3533_v13 = vpop.f32.mrb[11].mxu1 }
 0x4b1   :  { %v3451_v12 = vpop.f32.mrb[8].mxu0  ;;  %v8318_v10 = vpop.f32.mrb[12].mxu1 }
 0x4b2   :  { %v3453_v40 = vpop.f32.mrb[9].mxu0  ;;  %v3538_v24 = vpop.f32.mrb[13].mxu1 }
 0x4b3   :  { %v3452_v24 = vadd.f32 %v8363_v45, %v3451_v12 }
 0x4b5   :  { %v8320_v0 = vpop.f32.mrb[10].mxu0 }
 0x4b6   :  { %v8322_v48 = vpop.f32.mrb[14].mxu1  ;;  %v3458_v4 = vpop.f32.mrb[11].mxu0 }
 0x4b7   :  { %v3543_v16 = vpop.f32.mrb[15].mxu1  ;;  %v3447_v4 = vadd.f32 %v8363_v45, %v3446_v11 }
 0x4bd   :  { %v3461_v14 = vpop.f32.mrb[12].mxu0  ;;  %v8324_v22 = vpop.f32.mrb[16].mxu1 }
 0x4be   :  { %v3463_v18 = vpop.f32.mrb[13].mxu0  ;;  %v3548_v34 = vpop.f32.mrb[17].mxu1  ;;  %v3462_v36 = vadd.f32 %v8363_v45, %v3461_v14 }
 0x4c4   :  { %v8326_v49 = vpop.f32.mrb[14].mxu0  ;;  %v8328_v55 = vpop.f32.mrb[18].mxu1 }
 0x4c5   :  { %v3468_v41 = vpop.f32.mrb[15].mxu0  ;;  %v3553_v2 = vpop.f32.mrb[19].mxu1 }
 0x4c9   :  { %v3471_v43 = vpop.f32.mrb[16].mxu0 }
 0x4ca   :  { %v3473_v58 = vpop.f32.mrb[17].mxu0 }
 0x4cb   :  { %v8330_v39 = vpop.f32.mrb[20].mxu1 }
 0x4cc   :  { %v3558_v53 = vpop.f32.mrb[21].mxu1 }
 0x4cd   :  { %v3457_v53 = vadd.f32 %v8363_v45, %v8320_v0 }
 0x4d0   :  { %v8332_v28 = vpop.f32.mrb[18].mxu0 }
 0x4d1   :  { %v8334_v17 = vpop.f32.mrb[22].mxu1  ;;  %v3478_v29 = vpop.f32.mrb[19].mxu0 }
 0x4d2   :  { %v3563_v38 = vpop.f32.mrb[23].mxu1 }
 0x4d5   :  { %v8336_v19 = vpop.f32.mrb[20].mxu0 }
 0x4d6   :  { %v3483_v50 = vpop.f32.mrb[21].mxu0 }
 0x4d7   :  { %v8338_v33 = vpop.f32.mrb[24].mxu1 }
 0x4d8   :  { %v3568_v1 = vpop.f32.mrb[25].mxu1 }
 0x4dd   :  { %v8340_v52 = vpop.f32.mrb[22].mxu0  ;;  %v8342_v23 = vpop.f32.mrb[26].mxu1 }
 0x4de   :  { %v3488_v20 = vpop.f32.mrb[23].mxu0  ;;  %v3573_v30 = vpop.f32.mrb[27].mxu1 }
 0x4df   :  { %v3472_v30 = vadd.f32 %v8363_v45, %v3471_v43 }
 0x4e2   :  { %v8344_v60 = vpop.f32.mrb[24].mxu0 }
 0x4e3   :  { %v8346_v62 = vpop.f32.mrb[28].mxu1  ;;  %v3493_v63 = vpop.f32.mrb[25].mxu0 }
 0x4e4   :  { %v3578_v25 = vpop.f32.mrb[29].mxu1  ;;  %v3467_v63 = vadd.f32 %v8363_v45, %v8326_v49 }
 0x4e9   :  { %v8348_v21 = vpop.f32.mrb[26].mxu0  ;;  %v8350_v57 = vpop.f32.mrb[30].mxu1 }
 0x4ea   :  { %v3498_v47 = vpop.f32.mrb[27].mxu0  ;;  %v3583_v7 = vpop.f32.mrb[31].mxu1 }
 0x4ee   :  { %v8352_v54 = vpop.f32.mrb[28].mxu0  ;;  %v8354_v32 = vpop.f32.mrb[32].mxu1 }
 0x4ef   :  { %v3503_v61 = vpop.f32.mrb[29].mxu0  ;;  %v3588_v6 = vpop.f32.mrb[33].mxu1 }
 0x4f4   :  { %v8356_v27 = vpop.f32.mrb[30].mxu0  ;;  %v8358_v8 = vpop.f32.mrb[34].mxu1 }
 0x4f5   :  { %v3508_v51 = vpop.f32.mrb[31].mxu0  ;;  %v3593_v3 = vpop.f32.mrb[35].mxu1 }
 0x4f6   :  { %v3482_v51 = vadd.f32 %v8363_v45, %v8336_v19  ;;  %v3477_v3 = vadd.f32 %v8363_v45, %v8332_v28 }
 0x4f8   :  { %v4533_v42 = vpop.f32.mrb[32].mxu0 }
 0x4f9   :  { %v3827_v15 = vadd.f32 %v4533_v42, %v3442_v44  ;;  %v8367_v59 = vpop.f32.mrb[36].mxu1  ;;  %v3821_v56 = vpop.f32.mrb[33].mxu0 }
 0x4fa   :  { %v3822_v13 = vadd.f32 %v3821_v56, %v3437_v35  ;;  %v3598_v40 = vpop.f32.mrb[37].mxu1 }
 0x4fb   :  { %v4141_v29 = vmax.f32 %v3827_v15, 0.0  ;;  %v3487_v40 = vadd.f32 %v8363_v45, %v8340_v52 }
 0x4fc   :  { %v4140_v16 = vmax.f32 %v3822_v13, 0.0  ;;  %v4536_v18 = vpop.f32.mrb[34].mxu0  ;;  %v3492_v13 = vadd.f32 %v8363_v45, %v8344_v60  ;;  %v3497_v60 = vadd.f32 %v8363_v45, %v8348_v21 }
 0x4fd   :  { %v3837_v34 = vadd.f32 %v4536_v18, %v3452_v24  ;;  %v8371_v41 = vpop.f32.mrb[38].mxu1  ;;  %v3831_v2 = vpop.f32.mrb[35].mxu0 }
 0x4fe   :  { %v3832_v46 = vadd.f32 %v3831_v2, %v3447_v4  ;;  %v3603_v58 = vpop.f32.mrb[39].mxu1  ;;  %4204 = vxpose.xlu1.b32.start [1/16] (narrow) %v4140_v16, 32  ;;  %v3502_v2 = vadd.f32 %v8363_v45, %v8352_v54  ;;  %v3507_v54 = vadd.f32 %v8363_v45, %v8356_v27 }
 0x4ff   :  { %v4143_v44 = vmax.f32 %v3837_v34, 0.0 }
 0x500   :  { %v4539_v38 = vpop.f32.mrb[36].mxu0  ;;  %v4142_v25 = vmax.f32 %v3832_v46, 0.0 }
 0x501   :  { %v3847_v50 = vadd.f32 %v4539_v38, %v3462_v36  ;;  %v8376_v12 = vpop.f32.mrb[40].mxu1  ;;  %v3841_v11 = vpop.f32.mrb[37].mxu0 }
 0x502   :  { %v3842_v1 = vadd.f32 %v3841_v11, %v3457_v53  ;;  %v3608_v20 = vpop.f32.mrb[41].mxu1  ;;  %4205 = vxpose.xlu1.b32.cont [2/16] (narrow) %v4141_v29, 32  ;;  %v3512_v11 = vadd.f32 %v8363_v45, %v8305_v26  ;;  %v3517_v26 = vadd.f32 %v8363_v45, %v8310_v5 }
 0x503   :  { %v4145_v46 = vmax.f32 %v3847_v50, 0.0 }
 0x504   :  { %v4542_v47 = vpop.f32.mrb[38].mxu0  ;;  %v4144_v19 = vmax.f32 %v3842_v1, 0.0 }
 0x505   :  { %v3857_v14 = vadd.f32 %v4542_v47, %v3472_v30  ;;  %v8381_v7 = vpop.f32.mrb[42].mxu1  ;;  %v3851_v0 = vpop.f32.mrb[39].mxu0  ;;  %v3522_v47 = vadd.f32 %v8363_v45, %v8312_v9 }
 0x506   :  { %v3852_v61 = vadd.f32 %v3851_v0, %v3467_v63  ;;  %v3613_v6 = vpop.f32.mrb[43].mxu1  ;;  %4206 = vxpose.xlu1.b32.cont [3/16] (narrow) %v4142_v25, 32 }
 0x507   :  { %v4147_v0 = vmax.f32 %v3857_v14, 0.0 }
 0x508   :  { %v4545_v43 = vpop.f32.mrb[40].mxu0  ;;  %v4146_v1 = vmax.f32 %v3852_v61, 0.0 }
 0x509   :  { %v8387_v35 = vadd.f32 %v4545_v43, %v3482_v51  ;;  %v8389_v49 = vpop.f32.mrb[44].mxu1  ;;  %v3861_v42 = vpop.f32.mrb[41].mxu0  ;;  %v3532_v43 = vadd.f32 %v8363_v45, %v8316_v31  ;;  %v3537_v31 = vadd.f32 %v8363_v45, %v8318_v10 }
 0x50a   :  { %v3862_v15 = vadd.f32 %v3861_v42, %v3477_v3  ;;  %v3618_v56 = vpop.f32.mrb[45].mxu1  ;;  %4207 = vxpose.xlu1.b32.cont [4/16] (narrow) %v4143_v44, 32  ;;  %v3527_v42 = vadd.f32 %v8363_v45, %v8314_v37 }
 0x50c   :  { %v4548_v24 = vpop.f32.mrb[42].mxu0  ;;  %v4148_v56 = vmax.f32 %v3862_v15, 0.0 }
 0x50d   :  { %v8395_v4 = vadd.f32 %v4548_v24, %v3492_v13  ;;  %v8397_v28 = vpop.f32.mrb[46].mxu1  ;;  %v3871_v16 = vpop.f32.mrb[43].mxu0 }
 0x50e   :  { %v8399_v18 = vadd.f32 %v3871_v16, %v3487_v40  ;;  %v3623_v34 = vpop.f32.mrb[47].mxu1  ;;  %4208 = vxpose.xlu1.b32.cont [5/16] (narrow) %v4144_v19, 32  ;;  %v3542_v16 = vadd.f32 %v8363_v45, %v8322_v48  ;;  %v3547_v48 = vadd.f32 %v8363_v45, %v8324_v22 }
 0x50f   :  { %v4149_v34 = vmax.f32 %v8387_v35, 0.0  ;;  %v4151_v22 = vmax.f32 %v8395_v4, 0.0 }
 0x510   :  { %v4551_v58 = vpop.f32.mrb[44].mxu0  ;;  %v4150_v10 = vmax.f32 %v8399_v18, 0.0 }
 0x511   :  { %v8405_v52 = vadd.f32 %v4551_v58, %v3502_v2  ;;  %v8407_v36 = vpop.f32.mrb[48].mxu1  ;;  %v3881_v53 = vpop.f32.mrb[45].mxu0 }
 0x512   :  { %v8409_v29 = vadd.f32 %v3881_v53, %v3497_v60  ;;  %v3628_v38 = vpop.f32.mrb[49].mxu1  ;;  %4209 = vxpose.xlu1.b32.cont [6/16] (narrow) %v4145_v46, 32 }
 0x513   :  { %v3552_v38 = vadd.f32 %v8363_v45, %v8328_v55  ;;  %v3557_v55 = vadd.f32 %v8363_v45, %v8330_v39 }
 0x514   :  { %v4554_v20 = vpop.f32.mrb[46].mxu0  ;;  %v4152_v39 = vmax.f32 %v8409_v29, 0.0  ;;  %v4153_v29 = vmax.f32 %v8405_v52, 0.0 }
 0x515   :  { %v8415_v21 = vadd.f32 %v4554_v20, %v3512_v11  ;;  %v8417_v50 = vpop.f32.mrb[50].mxu1  ;;  %v3891_v30 = vpop.f32.mrb[47].mxu0 }
 0x516   :  { %v8419_v63 = vadd.f32 %v3891_v30, %v3507_v54  ;;  %v3633_v25 = vpop.f32.mrb[51].mxu1  ;;  %4210 = vxpose.xlu1.b32.cont [7/16] (narrow) %v4146_v1, 32 }
 0x518   :  { %v4557_v6 = vpop.f32.mrb[48].mxu0  ;;  %v4154_v52 = vmax.f32 %v8419_v63, 0.0  ;;  %v4155_v63 = vmax.f32 %v8415_v21, 0.0 }
 0x519   :  { %v3907_v27 = vadd.f32 %v4557_v6, %v3522_v47  ;;  %v8425_v61 = vpop.f32.mrb[52].mxu1  ;;  %v3901_v51 = vpop.f32.mrb[49].mxu0  ;;  %v3562_v47 = vadd.f32 %v8363_v45, %v8334_v17  ;;  %v3567_v17 = vadd.f32 %v8363_v45, %v8338_v33  ;;  %v3577_v33 = vadd.f32 %v8363_v45, %v8346_v62 }
 0x51a   :  { %v3902_v3 = vadd.f32 %v3901_v51, %v3517_v26  ;;  %v3638_v44 = vpop.f32.mrb[53].mxu1  ;;  %4211 = vxpose.xlu1.b32.cont [8/16] (narrow) %v4147_v0, 32  ;;  %v3587_v62 = vadd.f32 %v8363_v45, %v8354_v32  ;;  %v3597_v32 = vadd.f32 %v8363_v45, %v8367_v59  ;;  %v3607_v59 = vadd.f32 %v8363_v45, %v8376_v12 }
 0x51b   :  { %v4157_v37 = vmax.f32 %v3907_v27, 0.0  ;;  %v3572_v44 = vadd.f32 %v8363_v45, %v8342_v23  ;;  %v3582_v23 = vadd.f32 %v8363_v45, %v8350_v57  ;;  %v3592_v57 = vadd.f32 %v8363_v45, %v8358_v8 }
 0x51c   :  { %v4156_v9 = vmax.f32 %v3902_v3, 0.0  ;;  %v4560_v13 = vpop.f32.mrb[50].mxu0  ;;  %v3602_v8 = vadd.f32 %v8363_v45, %v8371_v41  ;;  %v3612_v41 = vadd.f32 %v8363_v45, %v8381_v7  ;;  %v3617_v7 = vadd.f32 %v8363_v45, %v8389_v49 }
 0x51d   :  { %v3917_v40 = vadd.f32 %v4560_v13, %v3532_v43  ;;  %v8431_v5 = vpop.f32.mrb[54].mxu1  ;;  %v3911_v14 = vpop.f32.mrb[51].mxu0 }
 0x51e   :  { %v3912_v19 = vadd.f32 %v3911_v14, %v3527_v42  ;;  %v3643_v24 = vpop.f32.mrb[55].mxu1  ;;  %4236 = vxpose.xlu0.b32.start [1/16] (narrow) %v4156_v9, 32  ;;  %4212 = vxpose.xlu1.b32.cont [9/16] (narrow) %v4148_v56, 32 }
 0x51f   :  { %v4159_v18 = vmax.f32 %v3917_v40, 0.0 }
 0x520   :  { %v4563_v15 = vpop.f32.mrb[52].mxu0  ;;  %v4158_v11 = vmax.f32 %v3912_v19, 0.0 }
 0x521   :  { %v3927_v2 = vadd.f32 %v4563_v15, %v3542_v16  ;;  %v8438_v60 = vpop.f32.mrb[56].mxu1  ;;  %v3921_v46 = vpop.f32.mrb[53].mxu0 }
 0x522   :  { %v3922_v58 = vadd.f32 %v3921_v46, %v3537_v31  ;;  %v3648_v53 = vpop.f32.mrb[57].mxu1  ;;  %4237 = vxpose.xlu0.b32.cont [2/16] (narrow) %v4157_v37, 32  ;;  %4213 = vxpose.xlu1.b32.cont [10/16] (narrow) %v4149_v34, 32 }
 0x523   :  { %v4161_v14 = vmax.f32 %v3927_v2, 0.0 }
 0x524   :  { %v4566_v35 = vpop.f32.mrb[54].mxu0  ;;  %v4160_v4 = vmax.f32 %v3922_v58, 0.0 }
 0x525   :  { %v8445_v54 = vadd.f32 %v4566_v35, %v3552_v38  ;;  %v8447_v1 = vpop.f32.mrb[58].mxu1  ;;  %v3931_v20 = vpop.f32.mrb[55].mxu0 }
 0x526   :  { %v3932_v30 = vadd.f32 %v3931_v20, %v3547_v48  ;;  %v3653_v25 = vpop.f32.mrb[59].mxu1  ;;  %4238 = vxpose.xlu0.b32.cont [3/16] (narrow) %v4158_v11, 32  ;;  %4214 = vxpose.xlu1.b32.cont [11/16] (narrow) %v4150_v10, 32 }
 0x527   :  { %v4163_v10 = vmax.f32 %v8445_v54, 0.0 }
 0x528   :  { %v4569_v26 = vpop.f32.mrb[56].mxu0  ;;  %v4162_v15 = vmax.f32 %v3932_v30, 0.0 }
 0x529   :  { %v8454_v0 = vadd.f32 %v4569_v26, %v3562_v47  ;;  %v8456_v6 = vpop.f32.mrb[60].mxu1  ;;  %v3941_v27 = vpop.f32.mrb[57].mxu0 }
 0x52a   :  { %v3942_v51 = vadd.f32 %v3941_v27, %v3557_v55  ;;  %v3658_v3 = vpop.f32.mrb[61].mxu1  ;;  %4239 = vxpose.xlu0.b32.cont [4/16] (narrow) %v4159_v18, 32  ;;  %4215 = vxpose.xlu1.b32.cont [12/16] (narrow) %v4151_v22, 32 }
 0x52b   :  { %v3622_v3 = vadd.f32 %v8363_v45, %v8397_v28  ;;  %v3627_v28 = vadd.f32 %v8363_v45, %v8407_v36 }
 0x52c   :  { %v4572_v43 = vpop.f32.mrb[58].mxu0  ;;  %v4164_v21 = vmax.f32 %v3942_v51, 0.0 }
 0x52d   :  { %v8463_v42 = vadd.f32 %v4572_v43, %v3572_v44  ;;  %v8465_v56 = vpop.f32.mrb[62].mxu1  ;;  %v3951_v9 = vpop.f32.mrb[59].mxu0  ;;  %v4165_v44 = vmax.f32 %v8454_v0, 0.0 }
 0x52e   :  { %v8467_v13 = vadd.f32 %v3951_v9, %v3567_v17  ;;  %v3663_v40 = vpop.f32.mrb[63].mxu1  ;;  %4240 = vxpose.xlu0.b32.cont [5/16] (narrow) %v4160_v4, 32  ;;  %4216 = vxpose.xlu1.b32.cont [13/16] (narrow) %v4152_v39, 32  ;;  %v3632_v9 = vadd.f32 %v8363_v45, %v8417_v50  ;;  %v3637_v50 = vadd.f32 %v8363_v45, %v8425_v61 }
 0x530   :  { %v4575_v19 = vpop.f32.mrb[60].mxu0  ;;  %v4166_v49 = vmax.f32 %v8467_v13, 0.0 }
 0x531   :  { %v8474_v24 = vadd.f32 %v4575_v19, %v3582_v23  ;;  %v8476_v16 = vpop.f32.mrb[64].mxu1  ;;  %v3961_v31 = vpop.f32.mrb[61].mxu0  ;;  %v3642_v19 = vadd.f32 %v8363_v45, %v8431_v5  ;;  %v3647_v5 = vadd.f32 %v8363_v45, %v8438_v60 }
 0x532   :  { %v8478_v34 = vadd.f32 %v3961_v31, %v3577_v33  ;;  %v3668_v37 = vpop.f32.mrb[65].mxu1  ;;  %4241 = vxpose.xlu0.b32.cont [6/16] (narrow) %v4161_v14, 32  ;;  %4217 = vxpose.xlu1.b32.cont [14/16] (narrow) %v4153_v29, 32  ;;  %v4167_v31 = vmax.f32 %v8463_v42, 0.0 }
 0x534   :  { %v4578_v2 = vpop.f32.mrb[62].mxu0 }
 0x535   :  { %v8485_v46 = vadd.f32 %v4578_v2, %v3592_v57  ;;  %v8487_v58 = vpop.f32.mrb[66].mxu1  ;;  %v3971_v53 = vpop.f32.mrb[63].mxu0  ;;  %v4168_v2 = vmax.f32 %v8478_v34, 0.0 }
 0x536   :  { %v8489_v38 = vadd.f32 %v3971_v53, %v3587_v62  ;;  %v3673_v48 = vpop.f32.mrb[67].mxu1  ;;  %4242 = vxpose.xlu0.b32.cont [7/16] (narrow) %v4162_v15, 32  ;;  %4218 = vxpose.xlu1.b32.cont [15/16] (narrow) %v4154_v52, 32  ;;  %v3652_v15 = vadd.f32 %v8363_v45, %v8447_v1  ;;  %v3657_v1 = vadd.f32 %v8363_v45, %v8456_v6 }
 0x538   :  { %v4581_v11 = vpop.f32.mrb[64].mxu0 }
 0x539   :  { %v8497_v35 = vadd.f32 %v4581_v11, %v3602_v8  ;;  %v8499_v20 = vpop.f32.mrb[68].mxu1  ;;  %v3981_v30 = vpop.f32.mrb[65].mxu0 }
 0x53a   :  { %v8501_v25 = vadd.f32 %v3981_v30, %v3597_v32  ;;  %v3678_v47 = vpop.f32.mrb[69].mxu1  ;;  %4243 = vxpose.xlu0.b32.cont [8/16] (narrow) %v4163_v10, 32  ;;  %4219 = vxpose.xlu1.b32.end [16/16] (narrow) %v4155_v63, 32  ;;  %v3662_v63 = vadd.f32 %v8363_v45, %v8465_v56  ;;  %v4169_v10 = vmax.f32 %v8474_v24, 0.0  ;;  %v3667_v56 = vadd.f32 %v8363_v45, %v8476_v16 }
 0x53c   :  { %v4584_v55 = vpop.f32.mrb[66].mxu0 }
 0x53d   :  { %v8507_v54 = vadd.f32 %v4584_v55, %v3612_v41  ;;  %v8509_v22 = vpop.f32.mrb[70].mxu1  ;;  %v3991_v18 = vpop.f32.mrb[67].mxu0 }
 0x53e   :  { %v8511_v26 = vadd.f32 %v3991_v18, %v3607_v59  ;;  %v3683_v27 = vpop.f32.mrb[71].mxu1  ;;  %4244 = vxpose.xlu0.b32.cont [9/16] (narrow) %v4164_v21, 32  ;;  %v3672_v59 = vadd.f32 %v8363_v45, %v8487_v58  ;;  %v4170_v21 = vmax.f32 %v8489_v38, 0.0  ;;  %v3677_v58 = vadd.f32 %v8363_v45, %v8499_v20 }
 0x540   :  { %v4587_v12 = vpop.f32.mrb[68].mxu0 }
 0x541   :  { %v8518_v51 = vadd.f32 %v4587_v12, %v3622_v3  ;;  %v8520_v17 = vpop.f32.mrb[72].mxu1  ;;  %v4001_v39 = vpop.f32.mrb[69].mxu0 }
 0x542   :  { %v8522_v4 = vadd.f32 %v4001_v39, %v3617_v7  ;;  %v3688_v43 = vpop.f32.mrb[73].mxu1  ;;  %4245 = vxpose.xlu0.b32.cont [10/16] (narrow) %v4165_v44, 32  ;;  %v3682_v7 = vadd.f32 %v8363_v45, %v8509_v22  ;;  %v4171_v44 = vmax.f32 %v8485_v46, 0.0 }
 0x544   :  { %v4590_v40 = vpop.f32.mrb[70].mxu0 }
 0x545   :  { %v8529_v0 = vadd.f32 %v4590_v40, %v3632_v9  ;;  %v3691_v23 = vpop.f32.mrb[74].mxu1  ;;  %v4011_v33 = vpop.f32.mrb[71].mxu0  ;;  %v3687_v40 = vadd.f32 %v8363_v45, %v8520_v17 }
 0x546   :  { %v8531_v29 = vadd.f32 %v4011_v33, %v3627_v28  ;;  %v3693_v14 = vpop.f32.mrb[75].mxu1  ;;  %4246 = vxpose.xlu0.b32.cont [11/16] (narrow) %v4166_v49, 32  ;;  %v3692_v28 = vadd.f32 %v8363_v45, %v3691_v23  ;;  %v4172_v49 = vmax.f32 %v8501_v25, 0.0 }
 0x548   :  { %v4593_v36 = vpop.f32.mrb[72].mxu0 }
 0x549   :  { %v8538_v37 = vadd.f32 %v4593_v36, %v3642_v19  ;;  %v3696_v13 = vpop.f32.mrb[76].mxu1  ;;  %v4021_v57 = vpop.f32.mrb[73].mxu0  ;;  %v4173_v36 = vmax.f32 %v8497_v35, 0.0 }
 0x54a   :  { %v8540_v62 = vadd.f32 %v4021_v57, %v3637_v50  ;;  %v3698_v52 = vpop.f32.mrb[77].mxu1  ;;  %4247 = vxpose.xlu0.b32.cont [12/16] (narrow) %v4167_v31, 32  ;;  %v3697_v23 = vadd.f32 %v8363_v45, %v3696_v13 }
 0x54c   :  { %v4596_v61 = vpop.f32.mrb[74].mxu0 }
 0x54d   :  { %v8547_v53 = vadd.f32 %v4596_v61, %v3652_v15  ;;  %v3701_v42 = vpop.f32.mrb[78].mxu1  ;;  %v4031_v48 = vpop.f32.mrb[75].mxu0 }
 0x54e   :  { %v8549_v8 = vadd.f32 %v4031_v48, %v3647_v5  ;;  %v3703_v32 = vpop.f32.mrb[79].mxu1  ;;  %4248 = vxpose.xlu0.b32.cont [13/16] (narrow) %v4168_v2, 32  ;;  %v3702_v31 = vadd.f32 %v8363_v45, %v3701_v42  ;;  %v4174_v48 = vmax.f32 %v8511_v26, 0.0 }
 0x550   :  { %v4599_v60 = vpop.f32.mrb[76].mxu0 }
 0x551   :  { %v8556_v11 = vadd.f32 %v4599_v60, %v3662_v63  ;;  %v3706_v34 = vpop.f32.mrb[80].mxu1  ;;  %v4041_v30 = vpop.f32.mrb[77].mxu0 }
 0x552   :  { %v8558_v47 = vadd.f32 %v4041_v30, %v3657_v1  ;;  %v3708_v41 = vpop.f32.mrb[81].mxu1  ;;  %4249 = vxpose.xlu0.b32.cont [14/16] (narrow) %v4169_v10, 32  ;;  %v3707_v32 = vadd.f32 %v8363_v45, %v3706_v34 }
 0x553   :  { %v4175_v41 = vmax.f32 %v8507_v54, 0.0 }
 0x554   :  { %v4602_v6 = vpop.f32.mrb[78].mxu0 }
 0x555   :  { %v8565_v55 = vadd.f32 %v4602_v6, %v3672_v59  ;;  %v3711_v24 = vpop.f32.mrb[82].mxu1  ;;  %v4051_v18 = vpop.f32.mrb[79].mxu0 }
 0x556   :  { %v8567_v27 = vadd.f32 %v4051_v18, %v3667_v56  ;;  %v3713_v3 = vpop.f32.mrb[83].mxu1  ;;  %4250 = vxpose.xlu0.b32.cont [15/16] (narrow) %v4170_v21, 32  ;;  %v3712_v61 = vadd.f32 %v8363_v45, %v3711_v24 }
 0x558   :  { %v4605_v16 = vpop.f32.mrb[80].mxu0 }
 0x559   :  { %v4067_v12 = vadd.f32 %v4605_v16, %v3682_v7  ;;  %v3716_v38 = vpop.f32.mrb[84].mxu1  ;;  %v4061_v39 = vpop.f32.mrb[81].mxu0  ;;  %v4176_v7 = vmax.f32 %v8522_v4, 0.0 }
 0x55a   :  { %v4062_v43 = vadd.f32 %v4061_v39, %v3677_v58  ;;  %v3718_v9 = vpop.f32.mrb[85].mxu1  ;;  %4251 = vxpose.xlu0.b32.end [16/16] (narrow) %v4171_v44, 32  ;;  %v3717_v59 = vadd.f32 %v8363_v45, %v3716_v38 }
 0x55b   :  { %v4189_v57 = vmax.f32 %v4067_v12, 0.0 }
 0x55c   :  { %v4188_v22 = vmax.f32 %v4062_v43, 0.0  ;;  %v4608_v33 = vpop.f32.mrb[82].mxu0 }
 0x55d   :  { %v4077_v46 = vadd.f32 %v4608_v33, %v3692_v28  ;;  %v3721_v14 = vpop.f32.mrb[86].mxu1  ;;  %v4071_v19 = vpop.f32.mrb[83].mxu0  ;;  %v4177_v28 = vmax.f32 %v8518_v51, 0.0 }
 0x55e   :  { %v4072_v20 = vadd.f32 %v4071_v19, %v3687_v40  ;;  %v3723_v50 = vpop.f32.mrb[87].mxu1  ;;  %4276 = vxpose.xlu0.b32.start [1/16] (narrow) %v4172_v49, 32  ;;  %4308 = vxpose.xlu1.b32.start [1/16] (narrow) %v4188_v22, 32  ;;  %v3722_v30 = vadd.f32 %v8363_v45, %v3721_v14 }
 0x55f   :  { %v4191_v56 = vmax.f32 %v4077_v46, 0.0 }
 0x560   :  { %v4611_v25 = vpop.f32.mrb[84].mxu0  ;;  %v4190_v42 = vmax.f32 %v4072_v20, 0.0  ;;  %v4178_v20 = vmax.f32 %v8531_v29, 0.0  ;;  %v4180_v29 = vmax.f32 %v8540_v62, 0.0  ;;  %v4183_v62 = vmax.f32 %v8547_v53, 0.0 }
 0x561   :  { %v4087_v52 = vadd.f32 %v4611_v25, %v3702_v31  ;;  %v3726_v15 = vpop.f32.mrb[88].mxu1  ;;  %v4081_v17 = vpop.f32.mrb[85].mxu0  ;;  %v4187_v53 = vmax.f32 %v8565_v55, 0.0 }
 0x562   :  { %v4082_v5 = vadd.f32 %v4081_v17, %v3697_v23  ;;  %v3728_v2 = vpop.f32.mrb[89].mxu1  ;;  %4277 = vxpose.xlu0.b32.cont [2/16] (narrow) %v4173_v36, 32  ;;  %4309 = vxpose.xlu1.b32.cont [2/16] (narrow) %v4189_v57, 32  ;;  %v3727_v44 = vadd.f32 %v8363_v45, %v3726_v15  ;;  %v4179_v15 = vmax.f32 %v8529_v0, 0.0  ;;  %v4182_v0 = vmax.f32 %v8549_v8, 0.0 }
 0x563   :  { %v4193_v49 = vmax.f32 %v4087_v52, 0.0 }
 0x564   :  { %v4614_v63 = vpop.f32.mrb[86].mxu0  ;;  %v4192_v58 = vmax.f32 %v4082_v5, 0.0 }
 0x565   :  { %v4097_v35 = vadd.f32 %v4614_v63, %v3712_v61  ;;  %v3731_v1 = vpop.f32.mrb[90].mxu1  ;;  %v4091_v13 = vpop.f32.mrb[87].mxu0 }
 0x566   :  { %v4092_v10 = vadd.f32 %v4091_v13, %v3707_v32  ;;  %v3733_v60 = vpop.f32.mrb[91].mxu1  ;;  %4278 = vxpose.xlu0.b32.cont [3/16] (narrow) %v4174_v48, 32  ;;  %4310 = vxpose.xlu1.b32.cont [3/16] (narrow) %v4190_v42, 32  ;;  %v3732_v3 = vadd.f32 %v8363_v45, %v3731_v1  ;;  %v4181_v48 = vmax.f32 %v8538_v37, 0.0  ;;  %v4184_v37 = vmax.f32 %v8558_v47, 0.0 }
 0x567   :  { %v4195_v17 = vmax.f32 %v4097_v35, 0.0  ;;  %v4186_v60 = vmax.f32 %v8567_v27, 0.0 }
 0x568   :  { %v4617_v21 = vpop.f32.mrb[88].mxu0  ;;  %v4194_v50 = vmax.f32 %v4092_v10, 0.0  ;;  %v4185_v10 = vmax.f32 %v8556_v11, 0.0 }
 0x569   :  { %v4107_v26 = vadd.f32 %v4617_v21, %v3722_v30  ;;  %v3736_v6 = vpop.f32.mrb[92].mxu1  ;;  %v4101_v34 = vpop.f32.mrb[89].mxu0 }
 0x56a   :  { %v4102_v24 = vadd.f32 %v4101_v34, %v3717_v59  ;;  %v3738_v18 = vpop.f32.mrb[93].mxu1  ;;  %4279 = vxpose.xlu0.b32.cont [4/16] (narrow) %v4175_v41, 32  ;;  %4311 = vxpose.xlu1.b32.cont [4/16] (narrow) %v4191_v56, 32  ;;  %v3737_v40 = vadd.f32 %v8363_v45, %v3736_v6 }
 0x56c   :  { %v4620_v16 = vpop.f32.mrb[90].mxu0  ;;  %v4196_v2 = vmax.f32 %v4102_v24, 0.0 }
 0x56d   :  { %v4117_v54 = vadd.f32 %v4620_v16, %v3732_v3  ;;  %v3741_v12 = vpop.f32.mrb[94].mxu1  ;;  %v4111_v38 = vpop.f32.mrb[91].mxu0 }
 0x56e   :  { %v3742_v39 = vadd.f32 %v8363_v45, %v3741_v12  ;;  %v4112_v43 = vadd.f32 %v4111_v38, %v3727_v44  ;;  %v3743_v9 = vpop.f32.mrb[95].mxu1  ;;  %4280 = vxpose.xlu0.b32.cont [5/16] (narrow) %v4176_v7, 32  ;;  %4312 = vxpose.xlu1.b32.cont [5/16] (narrow) %v4192_v58, 32 }
 0x56f   :  { %v4199_v35 = vmax.f32 %v4117_v54, 0.0 }
 0x570   :  { %v4623_v22 = vpop.f32.mrb[92].mxu0  ;;  %v4198_v42 = vmax.f32 %v4112_v43, 0.0 }
 0x571   :  { %v4127_v4 = vadd.f32 %v4623_v22, %v3742_v39  ;;  %v3746_v33 = vpop.f32.mrb[96].mxu1  ;;  %v4121_v46 = vpop.f32.mrb[93].mxu0 }
 0x572   :  { %v4122_v14 = vadd.f32 %v4121_v46, %v3737_v40  ;;  %v3748_v19 = vpop.f32.mrb[97].mxu1  ;;  %4281 = vxpose.xlu0.b32.cont [6/16] (narrow) %v4177_v28, 32  ;;  %4313 = vxpose.xlu1.b32.cont [6/16] (narrow) %v4193_v49, 32  ;;  %v3747_v31 = vadd.f32 %v8363_v45, %v3746_v33 }
 0x573   :  { %v4201_v8 = vmax.f32 %v4127_v4, 0.0 }
 0x574   :  { %v4626_v36 = vpop.f32.mrb[94].mxu0  ;;  %v4200_v13 = vmax.f32 %v4122_v14, 0.0 }
 0x575   :  { %v3751_v23 = vpop.f32.mrb[98].mxu1  ;;  %v4131_v57 = vpop.f32.mrb[95].mxu0 }
 0x576   :  { %v3752_v51 = vadd.f32 %v8363_v45, %v3751_v23  ;;  %v4132_v25 = vadd.f32 %v4131_v57, %v3747_v31  ;;  %v3753_v52 = vpop.f32.mrb[99].mxu1  ;;  %4282 = vxpose.xlu0.b32.cont [7/16] (narrow) %v4178_v20, 32  ;;  %4314 = vxpose.xlu1.b32.cont [7/16] (narrow) %v4194_v50, 32  ;;  %v4197_v45 = vmax.f32 %v4107_v26, 0.0 }
 0x578   :  { %v4137_v5 = vadd.f32 %v4626_v36, %v3752_v51  ;;  %v4202_v30 = vmax.f32 %v4132_v25, 0.0 }
 0x57a   :  { %4283 = vxpose.xlu0.b32.cont [8/16] (narrow) %v4179_v15, 32  ;;  %4315 = vxpose.xlu1.b32.cont [8/16] (narrow) %v4195_v17, 32  ;;  %v4203_v41 = vmax.f32 %v4137_v5, 0.0 }
 0x57e   :  { %4284 = vxpose.xlu0.b32.cont [9/16] (narrow) %v4180_v29, 32  ;;  %4316 = vxpose.xlu1.b32.cont [9/16] (narrow) %v4196_v2, 32  ;;  %v4220_v61 = vpop.trf.xlu1 }
 0x57f   :  { %4268 = vst [vmem:[#allocation3] sm:$0xff] %v4220_v61 }
 0x582   :  { %4285 = vxpose.xlu0.b32.cont [10/16] (narrow) %v4181_v48, 32  ;;  %4317 = vxpose.xlu1.b32.cont [10/16] (narrow) %v4197_v45, 32  ;;  %v4221_v32 = vpop.trf.xlu1 }
 0x583   :  { %4270 = vst [vmem:[#allocation3 + $0x10] sm:$0xff] %v4221_v32 }
 0x586   :  { %4286 = vxpose.xlu0.b32.cont [11/16] (narrow) %v4182_v0, 32  ;;  %4318 = vxpose.xlu1.b32.cont [11/16] (narrow) %v4198_v42, 32  ;;  %v4222_v63 = vpop.trf.xlu1 }
 0x587   :  { %4272 = vst [vmem:[#allocation3 + $0x20] sm:$0xff] %v4222_v63 }
 0x58a   :  { %4287 = vxpose.xlu0.b32.cont [12/16] (narrow) %v4183_v62, 32  ;;  %4319 = vxpose.xlu1.b32.cont [12/16] (narrow) %v4199_v35, 32  ;;  %v4223_v1 = vpop.trf.xlu1 }
 0x58b   :  { %4274 = vst [vmem:[#allocation3 + $0x30] sm:$0xff] %v4223_v1 }
 0x58e   :  { %4288 = vxpose.xlu0.b32.cont [13/16] (narrow) %v4184_v37, 32  ;;  %4320 = vxpose.xlu1.b32.cont [13/16] (narrow) %v4200_v13, 32 }
 0x592   :  { %4289 = vxpose.xlu0.b32.cont [14/16] (narrow) %v4185_v10, 32  ;;  %4321 = vxpose.xlu1.b32.cont [14/16] (narrow) %v4201_v8, 32 }
 0x596   :  { %4290 = vxpose.xlu0.b32.cont [15/16] (narrow) %v4186_v60, 32  ;;  %4322 = vxpose.xlu1.b32.cont [15/16] (narrow) %v4202_v30, 32 }
 0x59a   :  { %4291 = vxpose.xlu0.b32.end [16/16] (narrow) %v4187_v53, 32  ;;  %4323 = vxpose.xlu1.b32.end [16/16] (narrow) %v4203_v41, 32 }
 0x59e   :  { %v4252_v59 = vpop.trf.xlu0 }
 0x59f   :  { %4269 = vst [vmem:[#allocation3 + $0x8] sm:$0xff] %v4252_v59 }
 0x5a2   :  { %v4253_v47 = vpop.trf.xlu0 }
 0x5a3   :  { %4271 = vst [vmem:[#allocation3 + $0x18] sm:$0xff] %v4253_v47 }
 0x5a6   :  { %v4254_v56 = vpop.trf.xlu0 }
 0x5a7   :  { %4273 = vst [vmem:[#allocation3 + $0x28] sm:$0xff] %v4254_v56 }
 0x5aa   :  { %v4255_v11 = vpop.trf.xlu0 }
 0x5ab   :  { %4275 = vst [vmem:[#allocation3 + $0x38] sm:$0xff] %v4255_v11 }
 0x5de   :  { %v4292_v21 = vpop.trf.xlu0  ;;  %v4324_v26 = vpop.trf.xlu1 }
 0x5df   :  { %4340 = vst [vmem:[#allocation3 + $0x40] sm:$0xff] %v4292_v21  ;;  %4341 = vst [vmem:[#allocation3 + $0x48] sm:$0xff] %v4324_v26 }
 0x5e2   :  { %v4293_v27 = vpop.trf.xlu0  ;;  %v4325_v6 = vpop.trf.xlu1 }
 0x5e3   :  { %4342 = vst [vmem:[#allocation3 + $0x50] sm:$0xff] %v4293_v27  ;;  %4343 = vst [vmem:[#allocation3 + $0x58] sm:$0xff] %v4325_v6 }
 0x5e6   :  { %v4294_v55 = vpop.trf.xlu0  ;;  %v4326_v34 = vpop.trf.xlu1 }
 0x5e7   :  { %4344 = vst [vmem:[#allocation3 + $0x60] sm:$0xff] %v4294_v55  ;;  %4345 = vst [vmem:[#allocation3 + $0x68] sm:$0xff] %v4326_v34 }
 0x5ea   :  { %v4295_v24 = vpop.trf.xlu0  ;;  %v4327_v18 = vpop.trf.xlu1 }
 0x5eb   :  { %4346 = vst [vmem:[#allocation3 + $0x70] sm:$0xff] %v4295_v24  ;;  %4347 = vst [vmem:[#allocation3 + $0x78] sm:$0xff] %v4327_v18 }
 0x5ec   :  { %5690 = shalt.err (!%p5687_p4)
}
 0x5ed   :  { %s5691_s7 = scalar_lea.hbm %s8622_s5, 2048 }
 0x5ee   :  { %p5692_p5 = scmp.ne.s32.totalorder %s8622_s5, %s5691_s7  ;;  %p5695_p6 = scmp.lt.u32.totalorder %s5691_s7, %s8622_s5 }
 0x5f0   :  { %p5697_p7 = pnand %p5695_p6, %p5692_p5 }
 0x5f2   :  { %5700 = shalt.err (!%p5697_p7)
}
 0x5f3   :  { %s5710_s14 = smov 256   ;;  %s5711_s15 = smov 16  }
 0x5f4   :  { %4359 = dma.vmem_to_hbm [thread:$0]  %s4354_s8, 2048, %s8622_s5, [#allocation4], %s5710_s14, %s5710_s14, %s5711_s15  }
 0x5f5   :  { %5701 = dma.done.wait [#allocation4], 2048  }
 0x5f6   :  { %5702 = vsyncadd [#allocation4], 4294965248 }
 0x5f7   :  { %4363 = vsyncpa [#allocation4], 1 }

</bundles_post_ra>
